<compile_context>
chip_gen: v6e
topology: v6e:2x2x1
jax: 0.10.0
libtpu: 0.0.40
codegen_flags: <defaults>
</compile_context>

<pallas_src>
import functools

import jax
import jax.numpy as jnp
from jax.experimental import pallas as pl
from jax.experimental.pallas import tpu as pltpu


def _leaky_relu(v, alpha):
    return jnp.where(v >= 0, v, alpha * v)


def _gatv2_attention(lr, v, blin, a_row, bias, alpha, E):
    """GATv2 attention for one batch element; node projections precomputed.

    lr:   (N, 2E) = [left | right] node projections (Linear weight applied,
          the Linear bias `blin` is added to the pairwise sum below).
    v:    (N, D)  raw node values (attention is applied to the raw nodes).
    bias: (N, N)  additive attention bias.
    """
    left = lr[:, :E]                                                  # (N, E)
    right = lr[:, E:]                                                 # (N, E)
    # lin(concat(v_i, v_j)) == left_i + right_j + blin   (exact split)
    t = left[:, None, :] + right[None, :, :] + blin[None, :, :]       # (N, N, E)
    t = _leaky_relu(t, alpha)
    e = jnp.sum(t * a_row[None, :, :], axis=-1) + bias                # (N, N)
    e = e - jnp.max(e, axis=-1, keepdims=True)                        # stable softmax
    p = jnp.exp(e)
    att = p * pl.reciprocal(jnp.sum(p, axis=-1, keepdims=True), approx=True)
    h = jnp.dot(att, v, preferred_element_type=jnp.float32)           # (N, D)
    return jax.nn.sigmoid(h)


def _gru_cell(h, gx, wh, bh, H):
    """One GRU step (torch gate order [r|z|n]); gx = x_t @ Wi + bi hoisted."""
    hh = jnp.dot(h, wh, preferred_element_type=jnp.float32) + bh      # (B, 3H)
    rz = jax.nn.sigmoid(gx[:, :2 * H] + hh[:, :2 * H])                # fused r,z
    r = rz[:, :H]
    z = rz[:, H:]
    ng = jnp.tanh(gx[:, 2 * H:] + r * hh[:, 2 * H:])
    return (1.0 - z) * ng + z * h


def _mtad_gat_kernel(
    # conv
    x_col_ref, conv_w_ref, conv_b_ref,
    # feature GAT
    f_wlr_ref, f_blin_ref, f_a_ref, f_bias_ref,
    # temporal GAT
    t_wlr_ref, t_blin_ref, t_a_ref, t_bias_ref,
    # GRU encoder
    wi_x_ref, wi_f_ref, wi_t_ref, gru_wh_ref, gru_bi_ref, gru_bh_ref,
    # forecasting MLP
    fc0_wT_ref, fc0_b_ref, fc1_wT_ref, fc1_b_ref,
    # reconstruction decoder
    rec_wrep_ref, rec_wh_ref, rec_bi_ref, rec_bh_ref,
    rec_fc_wT_ref, rec_fc_b_ref,
    # outputs
    pred_ref, recon_ref,
    # scratch
    hs_ref,
    *, B, n, k, H, Hr, alpha):
    f32 = jnp.float32

    # ---- 1) ConvLayer: one im2col matmul for the whole batch + ReLU --------
    xc_flat = jnp.maximum(
        jnp.dot(x_col_ref[...].astype(f32), conv_w_ref[...],
                preferred_element_type=f32)
        + conv_b_ref[...], 0.0)                                       # (B*n, k)

    # ---- 2) GATv2 node projections (batched, hoisted out of the B loop) ----
    # Feature GAT nodes are the columns of xc (features, node dim = window);
    # temporal GAT nodes are the rows (timestamps, node dim = n_features).
    xcT_flat = jnp.concatenate(
        [xc_flat[b * n:(b + 1) * n, :].T for b in range(B)], axis=0)  # (B*k, n)
    lrf_all = jnp.dot(xcT_flat, f_wlr_ref[...],
                      preferred_element_type=f32)                      # (B*k, 4n)
    lrt_all = jnp.dot(xc_flat, t_wlr_ref[...],
                      preferred_element_type=f32)                      # (B*n, 4k)

    f_blin, f_a, f_bias = f_blin_ref[...], f_a_ref[...], f_bias_ref[...]
    t_blin, t_a, t_bias = t_blin_ref[...], t_a_ref[...], t_bias_ref[...]
    hf_list, ht_list = [], []
    for b in range(B):                                # B is tiny: static unroll
        vf = xcT_flat[b * k:(b + 1) * k, :]                            # (k, n)
        hf = _gatv2_attention(lrf_all[b * k:(b + 1) * k, :], vf,
                              f_blin, f_a, f_bias, alpha, 2 * n)       # (k, n)
        hf_list.append(hf.T)                                           # (n, k)
        vt = xc_flat[b * n:(b + 1) * n, :]                             # (n, k)
        ht_list.append(_gatv2_attention(lrt_all[b * n:(b + 1) * n, :], vt,
                                        t_blin, t_a, t_bias, alpha, 2 * k))
    h_feat_flat = jnp.concatenate(hf_list, axis=0)                     # (B*n, k)
    h_temp_flat = jnp.concatenate(ht_list, axis=0)                     # (B*n, k)

    # ---- 3) GRU encoder: input projections hoisted out of the recurrence ---
    # h_cat @ Wi == xc @ Wi[:k] + h_feat @ Wi[k:2k] + h_temp @ Wi[2k:]
    xp = (jnp.dot(xc_flat, wi_x_ref[...], preferred_element_type=f32)
          + jnp.dot(h_feat_flat, wi_f_ref[...], preferred_element_type=f32)
          + jnp.dot(h_temp_flat, wi_t_ref[...], preferred_element_type=f32)
          + gru_bi_ref[...])                                           # (B*n, 3H)
    xp = xp.reshape(B, n, 3 * H)
    gru_wh = gru_wh_ref[...]
    gru_bh = gru_bh_ref[...]
    h = jnp.zeros((B, H), f32)
    for t in range(n):                         # serial chain: only h @ Wh inside
        h = _gru_cell(h, xp[:, t, :], gru_wh, gru_bh, H)
    h_end = h                                                          # (B, H)

    # ---- 4) Forecasting MLP -------------------------------------------------
    z0 = jnp.maximum(
        jnp.dot(h_end, fc0_wT_ref[...], preferred_element_type=f32)
        + fc0_b_ref[...], 0.0)
    pred_ref[...] = (jnp.dot(z0, fc1_wT_ref[...], preferred_element_type=f32)
                     + fc1_b_ref[...]).astype(pred_ref.dtype)

    # ---- 5) Reconstruction: GRU decoder + single output FC ------------------
    # repeat_interleave(window).view(...) is folded into rec_wrep[t], so the
    # per-step input projection is just h_end @ rec_wrep[t] (hoisted).
    rec_bi = rec_bi_ref[...]
    gx_rec = [jnp.dot(h_end, rec_wrep_ref[t], preferred_element_type=f32) + rec_bi
              for t in range(n)]                                       # n x (B, 3Hr)
    rec_wh = rec_wh_ref[...]
    rec_bh = rec_bh_ref[...]
    hd = jnp.zeros((B, Hr), f32)
    for t in range(n):
        hd = _gru_cell(hd, gx_rec[t], rec_wh, rec_bh, Hr)
        hs_ref[:, t, :] = hd                                           # VMEM scratch
    hs = hs_ref[...].reshape(B * n, Hr)
    rec = (jnp.dot(hs, rec_fc_wT_ref[...], preferred_element_type=f32)
           + rec_fc_b_ref[...])                                        # (B*n, out)
    recon_ref[...] = rec.reshape(B, n, -1).astype(recon_ref.dtype)


def mtad_gat_forward(x, P, alpha):
    """Fused MTAD-GAT forward. x: (B, window, n_features). Returns (pred, recons)."""
    B, n, k = x.shape
    f32 = jnp.float32
    x = x.astype(f32)

    # ---- ConvLayer preprocessing: pad + im2col (layout glue only) ----------
    ks = P["conv_w"].shape[2]
    pad = (ks - 1) // 2
    xpad = jnp.pad(x, ((0, 0), (pad, pad), (0, 0)))
    x_col = jnp.concatenate([xpad[:, j:j + n, :] for j in range(ks)],
                            axis=-1).reshape(B * n, ks * k)             # (B*n, ks*k)
    conv_w = jnp.transpose(P["conv_w"], (2, 1, 0)).reshape(ks * k, k)   # (ks*k, k)
    conv_b = P["conv_b"].reshape(1, k)

    # ---- GAT weights: fuse the left/right halves of the concat Linear ------
    Wf = P["feat_lin_w"]                                            # (2n, 2n)
    f_wlr = jnp.concatenate([Wf[:, :n].T, Wf[:, n:].T], axis=1)     # (n, 4n)
    Wt = P["temp_lin_w"]                                            # (2k, 2k)
    t_wlr = jnp.concatenate([Wt[:, :k].T, Wt[:, k:].T], axis=1)     # (k, 4k)

    # ---- GRU encoder: pack gates [r|z|n] along columns, split rows for the
    #      (xc | h_feat | h_temp) concat --------------------------------------
    H = P["gru_w_hh"].shape[1]
    wi_all = P["gru_w_ih"].T                                        # (3k, 3H)
    wi_x, wi_f, wi_t = wi_all[:k], wi_all[k:2 * k], wi_all[2 * k:]
    gru_wh = P["gru_w_hh"].T                                        # (H, 3H)
    gru_bi = P["gru_b_ih"].reshape(1, -1)
    gru_bh = P["gru_b_hh"].reshape(1, -1)

    # ---- Forecasting MLP ----------------------------------------------------
    fc0_wT = P["fc0_w"].T
    fc0_b = P["fc0_b"].reshape(1, -1)
    fc1_wT = P["fc1_w"].T
    fc1_b = P["fc1_b"].reshape(1, -1)
    out_dim = P["fc1_w"].shape[0]

    # ---- Reconstruction decoder: fold torch's repeat_interleave(window)
    #      .view(B, window, H) into per-timestep input weights ----------------
    Hr = P["rec_w_hh"].shape[1]
    rec_wi = P["rec_w_ih"].T                                        # (H, 3Hr)
    # h_rep[b, t, j] = h_end[b, (t*H + j) // window]
    idx = (jnp.arange(n)[:, None] * H + jnp.arange(H)[None, :]) // n    # (n, H)
    onehot = jax.nn.one_hot(idx, H, dtype=f32)                          # (n, H, H)
    rec_wrep = jnp.einsum("tji,jg->tig", onehot, rec_wi)                # (n, H, 3Hr)
    rec_wh = P["rec_w_hh"].T                                        # (Hr, 3Hr)
    rec_bi = P["rec_b_ih"].reshape(1, -1)
    rec_bh = P["rec_b_hh"].reshape(1, -1)
    rec_fc_wT = P["rec_fc_w"].T
    rec_fc_b = P["rec_fc_b"].reshape(1, -1)

    kernel = functools.partial(_mtad_gat_kernel, B=B, n=n, k=k, H=H, Hr=Hr,
                               alpha=alpha)
    return pl.pallas_call(
        kernel,
        out_shape=(jax.ShapeDtypeStruct((B, out_dim), x.dtype),
                   jax.ShapeDtypeStruct((B, n, out_dim), x.dtype)),
        scratch_shapes=[pltpu.VMEM((B, n, Hr), jnp.float32)],
    )(x_col, conv_w, conv_b,
      f_wlr, P["feat_lin_b"].reshape(1, -1), P["feat_a"].reshape(1, -1), P["feat_bias"],
      t_wlr, P["temp_lin_b"].reshape(1, -1), P["temp_a"].reshape(1, -1), P["temp_bias"],
      wi_x, wi_f, wi_t, gru_wh, gru_bi, gru_bh,
      fc0_wT, fc0_b, fc1_wT, fc1_b,
      rec_wrep, rec_wh, rec_bi, rec_bh,
      rec_fc_wT, rec_fc_b)


if __name__ == "__main__":
    # Small shapes consistent with the module.
    B, window, n_features, out_dim = 2, 8, 4, 4
    kernel_size = 7
    gru_hid = 32
    forecast_hid = 32
    recon_hid = 32
    alpha = 0.2

    keys = iter(jax.random.split(jax.random.PRNGKey(0), 64))

    def nxt(shape, scale=0.1):
        return scale * jax.random.normal(next(keys), shape, jnp.float32)

    x = jax.random.normal(next(keys), (B, window, n_features), jnp.float32)

    P = {
        # ConvLayer: Conv1d(k -> k, kernel_size)
        "conv_w": nxt((n_features, n_features, kernel_size)),
        "conv_b": nxt((n_features,)),
        # FeatureAttentionLayer (GATv2): Linear(2*window -> 2*window), a (2*window,1), bias (k,k)
        "feat_lin_w": nxt((2 * window, 2 * window)),
        "feat_lin_b": nxt((2 * window,)),
        "feat_a": nxt((2 * window, 1)),
        "feat_bias": nxt((n_features, n_features), 0.01),
        # TemporalAttentionLayer (GATv2): Linear(2*k -> 2*k), a (2*k,1), bias (n,n)
        "temp_lin_w": nxt((2 * n_features, 2 * n_features)),
        "temp_lin_b": nxt((2 * n_features,)),
        "temp_a": nxt((2 * n_features, 1)),
        "temp_bias": nxt((window, window), 0.01),
        # GRU encoder (torch layout, gate order [r|z|n])
        "gru_w_ih": nxt((3 * gru_hid, 3 * n_features)),
        "gru_w_hh": nxt((3 * gru_hid, gru_hid)),
        "gru_b_ih": nxt((3 * gru_hid,)),
        "gru_b_hh": nxt((3 * gru_hid,)),
        # Forecasting_Model: Linear(gru_hid, hid), Linear(hid, out)
        "fc0_w": nxt((forecast_hid, gru_hid)),
        "fc0_b": nxt((forecast_hid,)),
        "fc1_w": nxt((out_dim, forecast_hid)),
        "fc1_b": nxt((out_dim,)),
        # ReconstructionModel: GRU(gru_hid -> recon_hid) + Linear(recon_hid, out)
        "rec_w_ih": nxt((3 * recon_hid, gru_hid)),
        "rec_w_hh": nxt((3 * recon_hid, recon_hid)),
        "rec_b_ih": nxt((3 * recon_hid,)),
        "rec_b_hh": nxt((3 * recon_hid,)),
        "rec_fc_w": nxt((out_dim, recon_hid)),
        "rec_fc_b": nxt((out_dim,)),
    }

    fwd = jax.jit(lambda xx, PP: mtad_gat_forward(xx, PP, alpha))
    predictions, recons = fwd(x, P)
    jax.block_until_ready(predictions)
    jax.block_until_ready(recons)

    assert predictions.shape == (B, out_dim)
    assert recons.shape == (B, window, out_dim)
    print("KERNEL_OK")
</pallas_src>

<mosaic_0001>
module attributes {stable_mosaic.version = 11 : i64} {
  func.func @_mtad_gat_kernel(%arg0: memref<16x28xf32, #tpu.memory_space<vmem>>, %arg1: memref<28x4xf32, #tpu.memory_space<vmem>>, %arg2: memref<1x4xf32, #tpu.memory_space<vmem>>, %arg3: memref<8x32xf32, #tpu.memory_space<vmem>>, %arg4: memref<1x16xf32, #tpu.memory_space<vmem>>, %arg5: memref<1x16xf32, #tpu.memory_space<vmem>>, %arg6: memref<4x4xf32, #tpu.memory_space<vmem>>, %arg7: memref<4x16xf32, #tpu.memory_space<vmem>>, %arg8: memref<1x8xf32, #tpu.memory_space<vmem>>, %arg9: memref<1x8xf32, #tpu.memory_space<vmem>>, %arg10: memref<8x8xf32, #tpu.memory_space<vmem>>, %arg11: memref<4x96xf32, #tpu.memory_space<vmem>>, %arg12: memref<4x96xf32, #tpu.memory_space<vmem>>, %arg13: memref<4x96xf32, #tpu.memory_space<vmem>>, %arg14: memref<32x96xf32, #tpu.memory_space<vmem>>, %arg15: memref<1x96xf32, #tpu.memory_space<vmem>>, %arg16: memref<1x96xf32, #tpu.memory_space<vmem>>, %arg17: memref<32x32xf32, #tpu.memory_space<vmem>>, %arg18: memref<1x32xf32, #tpu.memory_space<vmem>>, %arg19: memref<32x4xf32, #tpu.memory_space<vmem>>, %arg20: memref<1x4xf32, #tpu.memory_space<vmem>>, %arg21: memref<8x32x96xf32, #tpu.memory_space<vmem>>, %arg22: memref<32x96xf32, #tpu.memory_space<vmem>>, %arg23: memref<1x96xf32, #tpu.memory_space<vmem>>, %arg24: memref<1x96xf32, #tpu.memory_space<vmem>>, %arg25: memref<32x4xf32, #tpu.memory_space<vmem>>, %arg26: memref<1x4xf32, #tpu.memory_space<vmem>>, %arg27: memref<2x4xf32, #tpu.memory_space<vmem>>, %arg28: memref<2x8x4xf32, #tpu.memory_space<vmem>>, %arg29: memref<2x8x32xf32, #tpu.memory_space<vmem>>) attributes {dimension_semantics = [], scalar_prefetch = 0 : i64, scratch_operands = 1 : i64, tpu.core_type = #tpu.core_type<tc>} {
    %c0 = arith.constant 0 : index
    %c0_0 = arith.constant 0 : index
    %0 = vector.load %arg0[%c0, %c0_0] : memref<16x28xf32, #tpu.memory_space<vmem>>, vector<16x28xf32>
    %c0_1 = arith.constant 0 : index
    %c0_2 = arith.constant 0 : index
    %1 = vector.load %arg1[%c0_1, %c0_2] : memref<28x4xf32, #tpu.memory_space<vmem>>, vector<28x4xf32>
    %cst = arith.constant dense<0.000000e+00> : vector<16x4xf32>
    %2 = tpu.matmul %0, %1, %cst {dimension_numbers = #tpu.dot_dimension_numbers<[1], [0], [0], [1], [0, 0, 1, 1], [], []>} : vector<16x28xf32>, vector<28x4xf32>, vector<16x4xf32> -> vector<16x4xf32>
    %c0_3 = arith.constant 0 : index
    %c0_4 = arith.constant 0 : index
    %3 = vector.load %arg2[%c0_3, %c0_4] : memref<1x4xf32, #tpu.memory_space<vmem>>, vector<1x4xf32>
    %4 = vector.broadcast %3 : vector<1x4xf32> to vector<16x4xf32>
    %5 = arith.addf %2, %4 : vector<16x4xf32>
    %cst_5 = arith.constant 0.000000e+00 : f32
    %6 = vector.broadcast %cst_5 : f32 to vector<16x4xf32>
    %7 = arith.maximumf %5, %6 : vector<16x4xf32>
    %8 = vector.extract_strided_slice %7 {offsets = [0, 0], sizes = [8, 4], strides = [1, 1]} : vector<16x4xf32> to vector<8x4xf32>
    %9 = tpu.transpose %8, [1, 0] : vector<8x4xf32> -> vector<4x8xf32>
    %10 = vector.extract_strided_slice %7 {offsets = [8, 0], sizes = [8, 4], strides = [1, 1]} : vector<16x4xf32> to vector<8x4xf32>
    %11 = tpu.transpose %10, [1, 0] : vector<8x4xf32> -> vector<4x8xf32>
    %12 = tpu.concatenate %9, %11 in 0 : vector<4x8xf32>, vector<4x8xf32> -> vector<8x8xf32>
    %c0_6 = arith.constant 0 : index
    %c0_7 = arith.constant 0 : index
    %13 = vector.load %arg3[%c0_6, %c0_7] : memref<8x32xf32, #tpu.memory_space<vmem>>, vector<8x32xf32>
    %cst_8 = arith.constant dense<0.000000e+00> : vector<8x32xf32>
    %14 = tpu.matmul %12, %13, %cst_8 {dimension_numbers = #tpu.dot_dimension_numbers<[1], [0], [0], [1], [0, 0, 1, 1], [], []>} : vector<8x8xf32>, vector<8x32xf32>, vector<8x32xf32> -> vector<8x32xf32>
    %c0_9 = arith.constant 0 : index
    %c0_10 = arith.constant 0 : index
    %15 = vector.load %arg7[%c0_9, %c0_10] : memref<4x16xf32, #tpu.memory_space<vmem>>, vector<4x16xf32>
    %cst_11 = arith.constant dense<0.000000e+00> : vector<16x16xf32>
    %16 = tpu.matmul %7, %15, %cst_11 {dimension_numbers = #tpu.dot_dimension_numbers<[1], [0], [0], [1], [0, 0, 1, 1], [], []>} : vector<16x4xf32>, vector<4x16xf32>, vector<16x16xf32> -> vector<16x16xf32>
    %c0_12 = arith.constant 0 : index
    %c0_13 = arith.constant 0 : index
    %17 = vector.load %arg4[%c0_12, %c0_13] : memref<1x16xf32, #tpu.memory_space<vmem>>, vector<1x16xf32>
    %c0_14 = arith.constant 0 : index
    %c0_15 = arith.constant 0 : index
    %18 = vector.load %arg5[%c0_14, %c0_15] : memref<1x16xf32, #tpu.memory_space<vmem>>, vector<1x16xf32>
    %c0_16 = arith.constant 0 : index
    %c0_17 = arith.constant 0 : index
    %19 = vector.load %arg6[%c0_16, %c0_17] : memref<4x4xf32, #tpu.memory_space<vmem>>, vector<4x4xf32>
    %c0_18 = arith.constant 0 : index
    %c0_19 = arith.constant 0 : index
    %20 = vector.load %arg8[%c0_18, %c0_19] : memref<1x8xf32, #tpu.memory_space<vmem>>, vector<1x8xf32>
    %c0_20 = arith.constant 0 : index
    %c0_21 = arith.constant 0 : index
    %21 = vector.load %arg9[%c0_20, %c0_21] : memref<1x8xf32, #tpu.memory_space<vmem>>, vector<1x8xf32>
    %c0_22 = arith.constant 0 : index
    %c0_23 = arith.constant 0 : index
    %22 = vector.load %arg10[%c0_22, %c0_23] : memref<8x8xf32, #tpu.memory_space<vmem>>, vector<8x8xf32>
    %23 = vector.extract_strided_slice %12 {offsets = [0, 0], sizes = [4, 8], strides = [1, 1]} : vector<8x8xf32> to vector<4x8xf32>
    %24 = vector.extract_strided_slice %14 {offsets = [0, 0], sizes = [4, 32], strides = [1, 1]} : vector<8x32xf32> to vector<4x32xf32>
    %25 = vector.extract_strided_slice %24 {offsets = [0, 0], sizes = [4, 16], strides = [1, 1]} : vector<4x32xf32> to vector<4x16xf32>
    %26 = vector.extract_strided_slice %24 {offsets = [0, 16], sizes = [4, 16], strides = [1, 1]} : vector<4x32xf32> to vector<4x16xf32>
    %27 = vector.shape_cast %25 : vector<4x16xf32> to vector<4x1x16xf32>
    %28 = vector.shape_cast %26 : vector<4x16xf32> to vector<1x4x16xf32>
    %29 = vector.broadcast %27 : vector<4x1x16xf32> to vector<4x4x16xf32>
    %30 = vector.broadcast %28 : vector<1x4x16xf32> to vector<4x4x16xf32>
    %31 = arith.addf %29, %30 : vector<4x4x16xf32>
    %32 = vector.shape_cast %17 : vector<1x16xf32> to vector<1x1x16xf32>
    %33 = vector.broadcast %32 : vector<1x1x16xf32> to vector<4x4x16xf32>
    %34 = arith.addf %31, %33 : vector<4x4x16xf32>
    %cst_24 = arith.constant 0.000000e+00 : f32
    %35 = vector.broadcast %cst_24 : f32 to vector<4x4x16xf32>
    %36 = arith.cmpf oge, %34, %35 : vector<4x4x16xf32>
    %cst_25 = arith.constant 2.000000e-01 : f32
    %37 = vector.broadcast %cst_25 : f32 to vector<4x4x16xf32>
    %38 = arith.mulf %37, %34 : vector<4x4x16xf32>
    %39 = arith.select %36, %34, %38 : vector<4x4x16xi1>, vector<4x4x16xf32>
    %40 = vector.shape_cast %18 : vector<1x16xf32> to vector<1x1x16xf32>
    %41 = vector.broadcast %40 : vector<1x1x16xf32> to vector<4x4x16xf32>
    %42 = arith.mulf %39, %41 : vector<4x4x16xf32>
    %cst_26 = arith.constant dense<0.000000e+00> : vector<4x4xf32>
    %43 = vector.multi_reduction <add>, %42, %cst_26 [2] : vector<4x4x16xf32> to vector<4x4xf32>
    %44 = arith.addf %43, %19 : vector<4x4xf32>
    %cst_27 = arith.constant dense<0xFF800000> : vector<4xf32>
    %45 = vector.multi_reduction <maximumf>, %44, %cst_27 [1] : vector<4x4xf32> to vector<4xf32>
    %46 = vector.shape_cast %45 : vector<4xf32> to vector<4x1xf32>
    %47 = vector.broadcast %46 : vector<4x1xf32> to vector<4x4xf32>
    %48 = arith.subf %44, %47 : vector<4x4xf32>
    %49 = math.exp %48 : vector<4x4xf32>
    %cst_28 = arith.constant dense<0.000000e+00> : vector<4xf32>
    %50 = vector.multi_reduction <add>, %49, %cst_28 [1] : vector<4x4xf32> to vector<4xf32>
    %51 = vector.shape_cast %50 : vector<4xf32> to vector<4x1xf32>
    %52 = tpu.reciprocal %51 {approx = true} : vector<4x1xf32> -> vector<4x1xf32>
    %53 = vector.broadcast %52 : vector<4x1xf32> to vector<4x4xf32>
    %54 = arith.mulf %49, %53 : vector<4x4xf32>
    %cst_29 = arith.constant dense<0.000000e+00> : vector<4x8xf32>
    %55 = tpu.matmul %54, %23, %cst_29 {dimension_numbers = #tpu.dot_dimension_numbers<[1], [0], [0], [1], [0, 0, 1, 1], [], []>} : vector<4x4xf32>, vector<4x8xf32>, vector<4x8xf32> -> vector<4x8xf32>
    %56 = arith.negf %55 : vector<4x8xf32>
    %57 = math.exp %56 : vector<4x8xf32>
    %cst_30 = arith.constant 1.000000e+00 : f32
    %58 = vector.broadcast %cst_30 : f32 to vector<4x8xf32>
    %59 = arith.addf %58, %57 : vector<4x8xf32>
    %60 = arith.divf %58, %59 : vector<4x8xf32>
    %61 = tpu.transpose %60, [1, 0] : vector<4x8xf32> -> vector<8x4xf32>
    %62 = vector.extract_strided_slice %7 {offsets = [0, 0], sizes = [8, 4], strides = [1, 1]} : vector<16x4xf32> to vector<8x4xf32>
    %63 = vector.extract_strided_slice %16 {offsets = [0, 0], sizes = [8, 16], strides = [1, 1]} : vector<16x16xf32> to vector<8x16xf32>
    %64 = vector.extract_strided_slice %63 {offsets = [0, 0], sizes = [8, 8], strides = [1, 1]} : vector<8x16xf32> to vector<8x8xf32>
    %65 = vector.extract_strided_slice %63 {offsets = [0, 8], sizes = [8, 8], strides = [1, 1]} : vector<8x16xf32> to vector<8x8xf32>
    %66 = vector.shape_cast %64 : vector<8x8xf32> to vector<8x1x8xf32>
    %67 = vector.shape_cast %65 : vector<8x8xf32> to vector<1x8x8xf32>
    %68 = vector.broadcast %66 : vector<8x1x8xf32> to vector<8x8x8xf32>
    %69 = vector.broadcast %67 : vector<1x8x8xf32> to vector<8x8x8xf32>
    %70 = arith.addf %68, %69 : vector<8x8x8xf32>
    %71 = vector.shape_cast %20 : vector<1x8xf32> to vector<1x1x8xf32>
    %72 = vector.broadcast %71 : vector<1x1x8xf32> to vector<8x8x8xf32>
    %73 = arith.addf %70, %72 : vector<8x8x8xf32>
    %cst_31 = arith.constant 0.000000e+00 : f32
    %74 = vector.broadcast %cst_31 : f32 to vector<8x8x8xf32>
    %75 = arith.cmpf oge, %73, %74 : vector<8x8x8xf32>
    %cst_32 = arith.constant 2.000000e-01 : f32
    %76 = vector.broadcast %cst_32 : f32 to vector<8x8x8xf32>
    %77 = arith.mulf %76, %73 : vector<8x8x8xf32>
    %78 = arith.select %75, %73, %77 : vector<8x8x8xi1>, vector<8x8x8xf32>
    %79 = vector.shape_cast %21 : vector<1x8xf32> to vector<1x1x8xf32>
    %80 = vector.broadcast %79 : vector<1x1x8xf32> to vector<8x8x8xf32>
    %81 = arith.mulf %78, %80 : vector<8x8x8xf32>
    %cst_33 = arith.constant dense<0.000000e+00> : vector<8x8xf32>
    %82 = vector.multi_reduction <add>, %81, %cst_33 [2] : vector<8x8x8xf32> to vector<8x8xf32>
    %83 = arith.addf %82, %22 : vector<8x8xf32>
    %cst_34 = arith.constant dense<0xFF800000> : vector<8xf32>
    %84 = vector.multi_reduction <maximumf>, %83, %cst_34 [1] : vector<8x8xf32> to vector<8xf32>
    %85 = vector.shape_cast %84 : vector<8xf32> to vector<8x1xf32>
    %86 = vector.broadcast %85 : vector<8x1xf32> to vector<8x8xf32>
    %87 = arith.subf %83, %86 : vector<8x8xf32>
    %88 = math.exp %87 : vector<8x8xf32>
    %cst_35 = arith.constant dense<0.000000e+00> : vector<8xf32>
    %89 = vector.multi_reduction <add>, %88, %cst_35 [1] : vector<8x8xf32> to vector<8xf32>
    %90 = vector.shape_cast %89 : vector<8xf32> to vector<8x1xf32>
    %91 = tpu.reciprocal %90 {approx = true} : vector<8x1xf32> -> vector<8x1xf32>
    %92 = vector.broadcast %91 : vector<8x1xf32> to vector<8x8xf32>
    %93 = arith.mulf %88, %92 : vector<8x8xf32>
    %cst_36 = arith.constant dense<0.000000e+00> : vector<8x4xf32>
    %94 = tpu.matmul %93, %62, %cst_36 {dimension_numbers = #tpu.dot_dimension_numbers<[1], [0], [0], [1], [0, 0, 1, 1], [], []>} : vector<8x8xf32>, vector<8x4xf32>, vector<8x4xf32> -> vector<8x4xf32>
    %95 = arith.negf %94 : vector<8x4xf32>
    %96 = math.exp %95 : vector<8x4xf32>
    %cst_37 = arith.constant 1.000000e+00 : f32
    %97 = vector.broadcast %cst_37 : f32 to vector<8x4xf32>
    %98 = arith.addf %97, %96 : vector<8x4xf32>
    %99 = arith.divf %97, %98 : vector<8x4xf32>
    %100 = vector.extract_strided_slice %12 {offsets = [4, 0], sizes = [4, 8], strides = [1, 1]} : vector<8x8xf32> to vector<4x8xf32>
    %101 = vector.extract_strided_slice %14 {offsets = [4, 0], sizes = [4, 32], strides = [1, 1]} : vector<8x32xf32> to vector<4x32xf32>
    %102 = vector.extract_strided_slice %101 {offsets = [0, 0], sizes = [4, 16], strides = [1, 1]} : vector<4x32xf32> to vector<4x16xf32>
    %103 = vector.extract_strided_slice %101 {offsets = [0, 16], sizes = [4, 16], strides = [1, 1]} : vector<4x32xf32> to vector<4x16xf32>
    %104 = vector.shape_cast %102 : vector<4x16xf32> to vector<4x1x16xf32>
    %105 = vector.shape_cast %103 : vector<4x16xf32> to vector<1x4x16xf32>
    %106 = vector.broadcast %104 : vector<4x1x16xf32> to vector<4x4x16xf32>
    %107 = vector.broadcast %105 : vector<1x4x16xf32> to vector<4x4x16xf32>
    %108 = arith.addf %106, %107 : vector<4x4x16xf32>
    %109 = vector.shape_cast %17 : vector<1x16xf32> to vector<1x1x16xf32>
    %110 = vector.broadcast %109 : vector<1x1x16xf32> to vector<4x4x16xf32>
    %111 = arith.addf %108, %110 : vector<4x4x16xf32>
    %cst_38 = arith.constant 0.000000e+00 : f32
    %112 = vector.broadcast %cst_38 : f32 to vector<4x4x16xf32>
    %113 = arith.cmpf oge, %111, %112 : vector<4x4x16xf32>
    %cst_39 = arith.constant 2.000000e-01 : f32
    %114 = vector.broadcast %cst_39 : f32 to vector<4x4x16xf32>
    %115 = arith.mulf %114, %111 : vector<4x4x16xf32>
    %116 = arith.select %113, %111, %115 : vector<4x4x16xi1>, vector<4x4x16xf32>
    %117 = vector.shape_cast %18 : vector<1x16xf32> to vector<1x1x16xf32>
    %118 = vector.broadcast %117 : vector<1x1x16xf32> to vector<4x4x16xf32>
    %119 = arith.mulf %116, %118 : vector<4x4x16xf32>
    %cst_40 = arith.constant dense<0.000000e+00> : vector<4x4xf32>
    %120 = vector.multi_reduction <add>, %119, %cst_40 [2] : vector<4x4x16xf32> to vector<4x4xf32>
    %121 = arith.addf %120, %19 : vector<4x4xf32>
    %cst_41 = arith.constant dense<0xFF800000> : vector<4xf32>
    %122 = vector.multi_reduction <maximumf>, %121, %cst_41 [1] : vector<4x4xf32> to vector<4xf32>
    %123 = vector.shape_cast %122 : vector<4xf32> to vector<4x1xf32>
    %124 = vector.broadcast %123 : vector<4x1xf32> to vector<4x4xf32>
    %125 = arith.subf %121, %124 : vector<4x4xf32>
    %126 = math.exp %125 : vector<4x4xf32>
    %cst_42 = arith.constant dense<0.000000e+00> : vector<4xf32>
    %127 = vector.multi_reduction <add>, %126, %cst_42 [1] : vector<4x4xf32> to vector<4xf32>
    %128 = vector.shape_cast %127 : vector<4xf32> to vector<4x1xf32>
    %129 = tpu.reciprocal %128 {approx = true} : vector<4x1xf32> -> vector<4x1xf32>
    %130 = vector.broadcast %129 : vector<4x1xf32> to vector<4x4xf32>
    %131 = arith.mulf %126, %130 : vector<4x4xf32>
    %cst_43 = arith.constant dense<0.000000e+00> : vector<4x8xf32>
    %132 = tpu.matmul %131, %100, %cst_43 {dimension_numbers = #tpu.dot_dimension_numbers<[1], [0], [0], [1], [0, 0, 1, 1], [], []>} : vector<4x4xf32>, vector<4x8xf32>, vector<4x8xf32> -> vector<4x8xf32>
    %133 = arith.negf %132 : vector<4x8xf32>
    %134 = math.exp %133 : vector<4x8xf32>
    %cst_44 = arith.constant 1.000000e+00 : f32
    %135 = vector.broadcast %cst_44 : f32 to vector<4x8xf32>
    %136 = arith.addf %135, %134 : vector<4x8xf32>
    %137 = arith.divf %135, %136 : vector<4x8xf32>
    %138 = tpu.transpose %137, [1, 0] : vector<4x8xf32> -> vector<8x4xf32>
    %139 = vector.extract_strided_slice %7 {offsets = [8, 0], sizes = [8, 4], strides = [1, 1]} : vector<16x4xf32> to vector<8x4xf32>
    %140 = vector.extract_strided_slice %16 {offsets = [8, 0], sizes = [8, 16], strides = [1, 1]} : vector<16x16xf32> to vector<8x16xf32>
    %141 = vector.extract_strided_slice %140 {offsets = [0, 0], sizes = [8, 8], strides = [1, 1]} : vector<8x16xf32> to vector<8x8xf32>
    %142 = vector.extract_strided_slice %140 {offsets = [0, 8], sizes = [8, 8], strides = [1, 1]} : vector<8x16xf32> to vector<8x8xf32>
    %143 = vector.shape_cast %141 : vector<8x8xf32> to vector<8x1x8xf32>
    %144 = vector.shape_cast %142 : vector<8x8xf32> to vector<1x8x8xf32>
    %145 = vector.broadcast %143 : vector<8x1x8xf32> to vector<8x8x8xf32>
    %146 = vector.broadcast %144 : vector<1x8x8xf32> to vector<8x8x8xf32>
    %147 = arith.addf %145, %146 : vector<8x8x8xf32>
    %148 = vector.shape_cast %20 : vector<1x8xf32> to vector<1x1x8xf32>
    %149 = vector.broadcast %148 : vector<1x1x8xf32> to vector<8x8x8xf32>
    %150 = arith.addf %147, %149 : vector<8x8x8xf32>
    %cst_45 = arith.constant 0.000000e+00 : f32
    %151 = vector.broadcast %cst_45 : f32 to vector<8x8x8xf32>
    %152 = arith.cmpf oge, %150, %151 : vector<8x8x8xf32>
    %cst_46 = arith.constant 2.000000e-01 : f32
    %153 = vector.broadcast %cst_46 : f32 to vector<8x8x8xf32>
    %154 = arith.mulf %153, %150 : vector<8x8x8xf32>
    %155 = arith.select %152, %150, %154 : vector<8x8x8xi1>, vector<8x8x8xf32>
    %156 = vector.shape_cast %21 : vector<1x8xf32> to vector<1x1x8xf32>
    %157 = vector.broadcast %156 : vector<1x1x8xf32> to vector<8x8x8xf32>
    %158 = arith.mulf %155, %157 : vector<8x8x8xf32>
    %cst_47 = arith.constant dense<0.000000e+00> : vector<8x8xf32>
    %159 = vector.multi_reduction <add>, %158, %cst_47 [2] : vector<8x8x8xf32> to vector<8x8xf32>
    %160 = arith.addf %159, %22 : vector<8x8xf32>
    %cst_48 = arith.constant dense<0xFF800000> : vector<8xf32>
    %161 = vector.multi_reduction <maximumf>, %160, %cst_48 [1] : vector<8x8xf32> to vector<8xf32>
    %162 = vector.shape_cast %161 : vector<8xf32> to vector<8x1xf32>
    %163 = vector.broadcast %162 : vector<8x1xf32> to vector<8x8xf32>
    %164 = arith.subf %160, %163 : vector<8x8xf32>
    %165 = math.exp %164 : vector<8x8xf32>
    %cst_49 = arith.constant dense<0.000000e+00> : vector<8xf32>
    %166 = vector.multi_reduction <add>, %165, %cst_49 [1] : vector<8x8xf32> to vector<8xf32>
    %167 = vector.shape_cast %166 : vector<8xf32> to vector<8x1xf32>
    %168 = tpu.reciprocal %167 {approx = true} : vector<8x1xf32> -> vector<8x1xf32>
    %169 = vector.broadcast %168 : vector<8x1xf32> to vector<8x8xf32>
    %170 = arith.mulf %165, %169 : vector<8x8xf32>
    %cst_50 = arith.constant dense<0.000000e+00> : vector<8x4xf32>
    %171 = tpu.matmul %170, %139, %cst_50 {dimension_numbers = #tpu.dot_dimension_numbers<[1], [0], [0], [1], [0, 0, 1, 1], [], []>} : vector<8x8xf32>, vector<8x4xf32>, vector<8x4xf32> -> vector<8x4xf32>
    %172 = arith.negf %171 : vector<8x4xf32>
    %173 = math.exp %172 : vector<8x4xf32>
    %cst_51 = arith.constant 1.000000e+00 : f32
    %174 = vector.broadcast %cst_51 : f32 to vector<8x4xf32>
    %175 = arith.addf %174, %173 : vector<8x4xf32>
    %176 = arith.divf %174, %175 : vector<8x4xf32>
    %177 = tpu.concatenate %61, %138 in 0 : vector<8x4xf32>, vector<8x4xf32> -> vector<16x4xf32>
    %178 = tpu.concatenate %99, %176 in 0 : vector<8x4xf32>, vector<8x4xf32> -> vector<16x4xf32>
    %c0_52 = arith.constant 0 : index
    %c0_53 = arith.constant 0 : index
    %179 = vector.load %arg11[%c0_52, %c0_53] : memref<4x96xf32, #tpu.memory_space<vmem>>, vector<4x96xf32>
    %cst_54 = arith.constant dense<0.000000e+00> : vector<16x96xf32>
    %180 = tpu.matmul %7, %179, %cst_54 {dimension_numbers = #tpu.dot_dimension_numbers<[1], [0], [0], [1], [0, 0, 1, 1], [], []>} : vector<16x4xf32>, vector<4x96xf32>, vector<16x96xf32> -> vector<16x96xf32>
    %c0_55 = arith.constant 0 : index
    %c0_56 = arith.constant 0 : index
    %181 = vector.load %arg12[%c0_55, %c0_56] : memref<4x96xf32, #tpu.memory_space<vmem>>, vector<4x96xf32>
    %cst_57 = arith.constant dense<0.000000e+00> : vector<16x96xf32>
    %182 = tpu.matmul %177, %181, %cst_57 {dimension_numbers = #tpu.dot_dimension_numbers<[1], [0], [0], [1], [0, 0, 1, 1], [], []>} : vector<16x4xf32>, vector<4x96xf32>, vector<16x96xf32> -> vector<16x96xf32>
    %183 = arith.addf %180, %182 : vector<16x96xf32>
    %c0_58 = arith.constant 0 : index
    %c0_59 = arith.constant 0 : index
    %184 = vector.load %arg13[%c0_58, %c0_59] : memref<4x96xf32, #tpu.memory_space<vmem>>, vector<4x96xf32>
    %cst_60 = arith.constant dense<0.000000e+00> : vector<16x96xf32>
    %185 = tpu.matmul %178, %184, %cst_60 {dimension_numbers = #tpu.dot_dimension_numbers<[1], [0], [0], [1], [0, 0, 1, 1], [], []>} : vector<16x4xf32>, vector<4x96xf32>, vector<16x96xf32> -> vector<16x96xf32>
    %186 = arith.addf %183, %185 : vector<16x96xf32>
    %c0_61 = arith.constant 0 : index
    %c0_62 = arith.constant 0 : index
    %187 = vector.load %arg15[%c0_61, %c0_62] : memref<1x96xf32, #tpu.memory_space<vmem>>, vector<1x96xf32>
    %188 = vector.broadcast %187 : vector<1x96xf32> to vector<16x96xf32>
    %189 = arith.addf %186, %188 : vector<16x96xf32>
    %190 = vector.shape_cast %189 : vector<16x96xf32> to vector<2x8x96xf32>
    %c0_63 = arith.constant 0 : index
    %c0_64 = arith.constant 0 : index
    %191 = vector.load %arg14[%c0_63, %c0_64] : memref<32x96xf32, #tpu.memory_space<vmem>>, vector<32x96xf32>
    %c0_65 = arith.constant 0 : index
    %c0_66 = arith.constant 0 : index
    %192 = vector.load %arg16[%c0_65, %c0_66] : memref<1x96xf32, #tpu.memory_space<vmem>>, vector<1x96xf32>
    %cst_67 = arith.constant 0.000000e+00 : f32
    %193 = vector.broadcast %cst_67 : f32 to vector<2x32xf32>
    %194 = vector.extract_strided_slice %190 {offsets = [0, 0, 0], sizes = [2, 1, 96], strides = [1, 1, 1]} : vector<2x8x96xf32> to vector<2x1x96xf32>
    %195 = vector.shape_cast %194 : vector<2x1x96xf32> to vector<2x96xf32>
    %cst_68 = arith.constant dense<0.000000e+00> : vector<2x96xf32>
    %196 = tpu.matmul %193, %191, %cst_68 {dimension_numbers = #tpu.dot_dimension_numbers<[1], [0], [0], [1], [0, 0, 1, 1], [], []>} : vector<2x32xf32>, vector<32x96xf32>, vector<2x96xf32> -> vector<2x96xf32>
    %197 = vector.broadcast %192 : vector<1x96xf32> to vector<2x96xf32>
    %198 = arith.addf %196, %197 : vector<2x96xf32>
    %199 = vector.extract_strided_slice %195 {offsets = [0, 0], sizes = [2, 64], strides = [1, 1]} : vector<2x96xf32> to vector<2x64xf32>
    %200 = vector.extract_strided_slice %198 {offsets = [0, 0], sizes = [2, 64], strides = [1, 1]} : vector<2x96xf32> to vector<2x64xf32>
    %201 = arith.addf %199, %200 : vector<2x64xf32>
    %202 = arith.negf %201 : vector<2x64xf32>
    %203 = math.exp %202 : vector<2x64xf32>
    %cst_69 = arith.constant 1.000000e+00 : f32
    %204 = vector.broadcast %cst_69 : f32 to vector<2x64xf32>
    %205 = arith.addf %204, %203 : vector<2x64xf32>
    %206 = arith.divf %204, %205 : vector<2x64xf32>
    %207 = vector.extract_strided_slice %206 {offsets = [0, 0], sizes = [2, 32], strides = [1, 1]} : vector<2x64xf32> to vector<2x32xf32>
    %208 = vector.extract_strided_slice %206 {offsets = [0, 32], sizes = [2, 32], strides = [1, 1]} : vector<2x64xf32> to vector<2x32xf32>
    %209 = vector.extract_strided_slice %195 {offsets = [0, 64], sizes = [2, 32], strides = [1, 1]} : vector<2x96xf32> to vector<2x32xf32>
    %210 = vector.extract_strided_slice %198 {offsets = [0, 64], sizes = [2, 32], strides = [1, 1]} : vector<2x96xf32> to vector<2x32xf32>
    %211 = arith.mulf %207, %210 : vector<2x32xf32>
    %212 = arith.addf %209, %211 : vector<2x32xf32>
    %213 = math.tanh %212 : vector<2x32xf32>
    %cst_70 = arith.constant 1.000000e+00 : f32
    %214 = vector.broadcast %cst_70 : f32 to vector<2x32xf32>
    %215 = arith.subf %214, %208 : vector<2x32xf32>
    %216 = arith.mulf %215, %213 : vector<2x32xf32>
    %217 = arith.mulf %208, %193 : vector<2x32xf32>
    %218 = arith.addf %216, %217 : vector<2x32xf32>
    %219 = vector.extract_strided_slice %190 {offsets = [0, 1, 0], sizes = [2, 1, 96], strides = [1, 1, 1]} : vector<2x8x96xf32> to vector<2x1x96xf32>
    %220 = vector.shape_cast %219 : vector<2x1x96xf32> to vector<2x96xf32>
    %cst_71 = arith.constant dense<0.000000e+00> : vector<2x96xf32>
    %221 = tpu.matmul %218, %191, %cst_71 {dimension_numbers = #tpu.dot_dimension_numbers<[1], [0], [0], [1], [0, 0, 1, 1], [], []>} : vector<2x32xf32>, vector<32x96xf32>, vector<2x96xf32> -> vector<2x96xf32>
    %222 = vector.broadcast %192 : vector<1x96xf32> to vector<2x96xf32>
    %223 = arith.addf %221, %222 : vector<2x96xf32>
    %224 = vector.extract_strided_slice %220 {offsets = [0, 0], sizes = [2, 64], strides = [1, 1]} : vector<2x96xf32> to vector<2x64xf32>
    %225 = vector.extract_strided_slice %223 {offsets = [0, 0], sizes = [2, 64], strides = [1, 1]} : vector<2x96xf32> to vector<2x64xf32>
    %226 = arith.addf %224, %225 : vector<2x64xf32>
    %227 = arith.negf %226 : vector<2x64xf32>
    %228 = math.exp %227 : vector<2x64xf32>
    %cst_72 = arith.constant 1.000000e+00 : f32
    %229 = vector.broadcast %cst_72 : f32 to vector<2x64xf32>
    %230 = arith.addf %229, %228 : vector<2x64xf32>
    %231 = arith.divf %229, %230 : vector<2x64xf32>
    %232 = vector.extract_strided_slice %231 {offsets = [0, 0], sizes = [2, 32], strides = [1, 1]} : vector<2x64xf32> to vector<2x32xf32>
    %233 = vector.extract_strided_slice %231 {offsets = [0, 32], sizes = [2, 32], strides = [1, 1]} : vector<2x64xf32> to vector<2x32xf32>
    %234 = vector.extract_strided_slice %220 {offsets = [0, 64], sizes = [2, 32], strides = [1, 1]} : vector<2x96xf32> to vector<2x32xf32>
    %235 = vector.extract_strided_slice %223 {offsets = [0, 64], sizes = [2, 32], strides = [1, 1]} : vector<2x96xf32> to vector<2x32xf32>
    %236 = arith.mulf %232, %235 : vector<2x32xf32>
    %237 = arith.addf %234, %236 : vector<2x32xf32>
    %238 = math.tanh %237 : vector<2x32xf32>
    %cst_73 = arith.constant 1.000000e+00 : f32
    %239 = vector.broadcast %cst_73 : f32 to vector<2x32xf32>
    %240 = arith.subf %239, %233 : vector<2x32xf32>
    %241 = arith.mulf %240, %238 : vector<2x32xf32>
    %242 = arith.mulf %233, %218 : vector<2x32xf32>
    %243 = arith.addf %241, %242 : vector<2x32xf32>
    %244 = vector.extract_strided_slice %190 {offsets = [0, 2, 0], sizes = [2, 1, 96], strides = [1, 1, 1]} : vector<2x8x96xf32> to vector<2x1x96xf32>
    %245 = vector.shape_cast %244 : vector<2x1x96xf32> to vector<2x96xf32>
    %cst_74 = arith.constant dense<0.000000e+00> : vector<2x96xf32>
    %246 = tpu.matmul %243, %191, %cst_74 {dimension_numbers = #tpu.dot_dimension_numbers<[1], [0], [0], [1], [0, 0, 1, 1], [], []>} : vector<2x32xf32>, vector<32x96xf32>, vector<2x96xf32> -> vector<2x96xf32>
    %247 = vector.broadcast %192 : vector<1x96xf32> to vector<2x96xf32>
    %248 = arith.addf %246, %247 : vector<2x96xf32>
    %249 = vector.extract_strided_slice %245 {offsets = [0, 0], sizes = [2, 64], strides = [1, 1]} : vector<2x96xf32> to vector<2x64xf32>
    %250 = vector.extract_strided_slice %248 {offsets = [0, 0], sizes = [2, 64], strides = [1, 1]} : vector<2x96xf32> to vector<2x64xf32>
    %251 = arith.addf %249, %250 : vector<2x64xf32>
    %252 = arith.negf %251 : vector<2x64xf32>
    %253 = math.exp %252 : vector<2x64xf32>
    %cst_75 = arith.constant 1.000000e+00 : f32
    %254 = vector.broadcast %cst_75 : f32 to vector<2x64xf32>
    %255 = arith.addf %254, %253 : vector<2x64xf32>
    %256 = arith.divf %254, %255 : vector<2x64xf32>
    %257 = vector.extract_strided_slice %256 {offsets = [0, 0], sizes = [2, 32], strides = [1, 1]} : vector<2x64xf32> to vector<2x32xf32>
    %258 = vector.extract_strided_slice %256 {offsets = [0, 32], sizes = [2, 32], strides = [1, 1]} : vector<2x64xf32> to vector<2x32xf32>
    %259 = vector.extract_strided_slice %245 {offsets = [0, 64], sizes = [2, 32], strides = [1, 1]} : vector<2x96xf32> to vector<2x32xf32>
    %260 = vector.extract_strided_slice %248 {offsets = [0, 64], sizes = [2, 32], strides = [1, 1]} : vector<2x96xf32> to vector<2x32xf32>
    %261 = arith.mulf %257, %260 : vector<2x32xf32>
    %262 = arith.addf %259, %261 : vector<2x32xf32>
    %263 = math.tanh %262 : vector<2x32xf32>
    %cst_76 = arith.constant 1.000000e+00 : f32
    %264 = vector.broadcast %cst_76 : f32 to vector<2x32xf32>
    %265 = arith.subf %264, %258 : vector<2x32xf32>
    %266 = arith.mulf %265, %263 : vector<2x32xf32>
    %267 = arith.mulf %258, %243 : vector<2x32xf32>
    %268 = arith.addf %266, %267 : vector<2x32xf32>
    %269 = vector.extract_strided_slice %190 {offsets = [0, 3, 0], sizes = [2, 1, 96], strides = [1, 1, 1]} : vector<2x8x96xf32> to vector<2x1x96xf32>
    %270 = vector.shape_cast %269 : vector<2x1x96xf32> to vector<2x96xf32>
    %cst_77 = arith.constant dense<0.000000e+00> : vector<2x96xf32>
    %271 = tpu.matmul %268, %191, %cst_77 {dimension_numbers = #tpu.dot_dimension_numbers<[1], [0], [0], [1], [0, 0, 1, 1], [], []>} : vector<2x32xf32>, vector<32x96xf32>, vector<2x96xf32> -> vector<2x96xf32>
    %272 = vector.broadcast %192 : vector<1x96xf32> to vector<2x96xf32>
    %273 = arith.addf %271, %272 : vector<2x96xf32>
    %274 = vector.extract_strided_slice %270 {offsets = [0, 0], sizes = [2, 64], strides = [1, 1]} : vector<2x96xf32> to vector<2x64xf32>
    %275 = vector.extract_strided_slice %273 {offsets = [0, 0], sizes = [2, 64], strides = [1, 1]} : vector<2x96xf32> to vector<2x64xf32>
    %276 = arith.addf %274, %275 : vector<2x64xf32>
    %277 = arith.negf %276 : vector<2x64xf32>
    %278 = math.exp %277 : vector<2x64xf32>
    %cst_78 = arith.constant 1.000000e+00 : f32
    %279 = vector.broadcast %cst_78 : f32 to vector<2x64xf32>
    %280 = arith.addf %279, %278 : vector<2x64xf32>
    %281 = arith.divf %279, %280 : vector<2x64xf32>
    %282 = vector.extract_strided_slice %281 {offsets = [0, 0], sizes = [2, 32], strides = [1, 1]} : vector<2x64xf32> to vector<2x32xf32>
    %283 = vector.extract_strided_slice %281 {offsets = [0, 32], sizes = [2, 32], strides = [1, 1]} : vector<2x64xf32> to vector<2x32xf32>
    %284 = vector.extract_strided_slice %270 {offsets = [0, 64], sizes = [2, 32], strides = [1, 1]} : vector<2x96xf32> to vector<2x32xf32>
    %285 = vector.extract_strided_slice %273 {offsets = [0, 64], sizes = [2, 32], strides = [1, 1]} : vector<2x96xf32> to vector<2x32xf32>
    %286 = arith.mulf %282, %285 : vector<2x32xf32>
    %287 = arith.addf %284, %286 : vector<2x32xf32>
    %288 = math.tanh %287 : vector<2x32xf32>
    %cst_79 = arith.constant 1.000000e+00 : f32
    %289 = vector.broadcast %cst_79 : f32 to vector<2x32xf32>
    %290 = arith.subf %289, %283 : vector<2x32xf32>
    %291 = arith.mulf %290, %288 : vector<2x32xf32>
    %292 = arith.mulf %283, %268 : vector<2x32xf32>
    %293 = arith.addf %291, %292 : vector<2x32xf32>
    %294 = vector.extract_strided_slice %190 {offsets = [0, 4, 0], sizes = [2, 1, 96], strides = [1, 1, 1]} : vector<2x8x96xf32> to vector<2x1x96xf32>
    %295 = vector.shape_cast %294 : vector<2x1x96xf32> to vector<2x96xf32>
    %cst_80 = arith.constant dense<0.000000e+00> : vector<2x96xf32>
    %296 = tpu.matmul %293, %191, %cst_80 {dimension_numbers = #tpu.dot_dimension_numbers<[1], [0], [0], [1], [0, 0, 1, 1], [], []>} : vector<2x32xf32>, vector<32x96xf32>, vector<2x96xf32> -> vector<2x96xf32>
    %297 = vector.broadcast %192 : vector<1x96xf32> to vector<2x96xf32>
    %298 = arith.addf %296, %297 : vector<2x96xf32>
    %299 = vector.extract_strided_slice %295 {offsets = [0, 0], sizes = [2, 64], strides = [1, 1]} : vector<2x96xf32> to vector<2x64xf32>
    %300 = vector.extract_strided_slice %298 {offsets = [0, 0], sizes = [2, 64], strides = [1, 1]} : vector<2x96xf32> to vector<2x64xf32>
    %301 = arith.addf %299, %300 : vector<2x64xf32>
    %302 = arith.negf %301 : vector<2x64xf32>
    %303 = math.exp %302 : vector<2x64xf32>
    %cst_81 = arith.constant 1.000000e+00 : f32
    %304 = vector.broadcast %cst_81 : f32 to vector<2x64xf32>
    %305 = arith.addf %304, %303 : vector<2x64xf32>
    %306 = arith.divf %304, %305 : vector<2x64xf32>
    %307 = vector.extract_strided_slice %306 {offsets = [0, 0], sizes = [2, 32], strides = [1, 1]} : vector<2x64xf32> to vector<2x32xf32>
    %308 = vector.extract_strided_slice %306 {offsets = [0, 32], sizes = [2, 32], strides = [1, 1]} : vector<2x64xf32> to vector<2x32xf32>
    %309 = vector.extract_strided_slice %295 {offsets = [0, 64], sizes = [2, 32], strides = [1, 1]} : vector<2x96xf32> to vector<2x32xf32>
    %310 = vector.extract_strided_slice %298 {offsets = [0, 64], sizes = [2, 32], strides = [1, 1]} : vector<2x96xf32> to vector<2x32xf32>
    %311 = arith.mulf %307, %310 : vector<2x32xf32>
    %312 = arith.addf %309, %311 : vector<2x32xf32>
    %313 = math.tanh %312 : vector<2x32xf32>
    %cst_82 = arith.constant 1.000000e+00 : f32
    %314 = vector.broadcast %cst_82 : f32 to vector<2x32xf32>
    %315 = arith.subf %314, %308 : vector<2x32xf32>
    %316 = arith.mulf %315, %313 : vector<2x32xf32>
    %317 = arith.mulf %308, %293 : vector<2x32xf32>
    %318 = arith.addf %316, %317 : vector<2x32xf32>
    %319 = vector.extract_strided_slice %190 {offsets = [0, 5, 0], sizes = [2, 1, 96], strides = [1, 1, 1]} : vector<2x8x96xf32> to vector<2x1x96xf32>
    %320 = vector.shape_cast %319 : vector<2x1x96xf32> to vector<2x96xf32>
    %cst_83 = arith.constant dense<0.000000e+00> : vector<2x96xf32>
    %321 = tpu.matmul %318, %191, %cst_83 {dimension_numbers = #tpu.dot_dimension_numbers<[1], [0], [0], [1], [0, 0, 1, 1], [], []>} : vector<2x32xf32>, vector<32x96xf32>, vector<2x96xf32> -> vector<2x96xf32>
    %322 = vector.broadcast %192 : vector<1x96xf32> to vector<2x96xf32>
    %323 = arith.addf %321, %322 : vector<2x96xf32>
    %324 = vector.extract_strided_slice %320 {offsets = [0, 0], sizes = [2, 64], strides = [1, 1]} : vector<2x96xf32> to vector<2x64xf32>
    %325 = vector.extract_strided_slice %323 {offsets = [0, 0], sizes = [2, 64], strides = [1, 1]} : vector<2x96xf32> to vector<2x64xf32>
    %326 = arith.addf %324, %325 : vector<2x64xf32>
    %327 = arith.negf %326 : vector<2x64xf32>
    %328 = math.exp %327 : vector<2x64xf32>
    %cst_84 = arith.constant 1.000000e+00 : f32
    %329 = vector.broadcast %cst_84 : f32 to vector<2x64xf32>
    %330 = arith.addf %329, %328 : vector<2x64xf32>
    %331 = arith.divf %329, %330 : vector<2x64xf32>
    %332 = vector.extract_strided_slice %331 {offsets = [0, 0], sizes = [2, 32], strides = [1, 1]} : vector<2x64xf32> to vector<2x32xf32>
    %333 = vector.extract_strided_slice %331 {offsets = [0, 32], sizes = [2, 32], strides = [1, 1]} : vector<2x64xf32> to vector<2x32xf32>
    %334 = vector.extract_strided_slice %320 {offsets = [0, 64], sizes = [2, 32], strides = [1, 1]} : vector<2x96xf32> to vector<2x32xf32>
    %335 = vector.extract_strided_slice %323 {offsets = [0, 64], sizes = [2, 32], strides = [1, 1]} : vector<2x96xf32> to vector<2x32xf32>
    %336 = arith.mulf %332, %335 : vector<2x32xf32>
    %337 = arith.addf %334, %336 : vector<2x32xf32>
    %338 = math.tanh %337 : vector<2x32xf32>
    %cst_85 = arith.constant 1.000000e+00 : f32
    %339 = vector.broadcast %cst_85 : f32 to vector<2x32xf32>
    %340 = arith.subf %339, %333 : vector<2x32xf32>
    %341 = arith.mulf %340, %338 : vector<2x32xf32>
    %342 = arith.mulf %333, %318 : vector<2x32xf32>
    %343 = arith.addf %341, %342 : vector<2x32xf32>
    %344 = vector.extract_strided_slice %190 {offsets = [0, 6, 0], sizes = [2, 1, 96], strides = [1, 1, 1]} : vector<2x8x96xf32> to vector<2x1x96xf32>
    %345 = vector.shape_cast %344 : vector<2x1x96xf32> to vector<2x96xf32>
    %cst_86 = arith.constant dense<0.000000e+00> : vector<2x96xf32>
    %346 = tpu.matmul %343, %191, %cst_86 {dimension_numbers = #tpu.dot_dimension_numbers<[1], [0], [0], [1], [0, 0, 1, 1], [], []>} : vector<2x32xf32>, vector<32x96xf32>, vector<2x96xf32> -> vector<2x96xf32>
    %347 = vector.broadcast %192 : vector<1x96xf32> to vector<2x96xf32>
    %348 = arith.addf %346, %347 : vector<2x96xf32>
    %349 = vector.extract_strided_slice %345 {offsets = [0, 0], sizes = [2, 64], strides = [1, 1]} : vector<2x96xf32> to vector<2x64xf32>
    %350 = vector.extract_strided_slice %348 {offsets = [0, 0], sizes = [2, 64], strides = [1, 1]} : vector<2x96xf32> to vector<2x64xf32>
    %351 = arith.addf %349, %350 : vector<2x64xf32>
    %352 = arith.negf %351 : vector<2x64xf32>
    %353 = math.exp %352 : vector<2x64xf32>
    %cst_87 = arith.constant 1.000000e+00 : f32
    %354 = vector.broadcast %cst_87 : f32 to vector<2x64xf32>
    %355 = arith.addf %354, %353 : vector<2x64xf32>
    %356 = arith.divf %354, %355 : vector<2x64xf32>
    %357 = vector.extract_strided_slice %356 {offsets = [0, 0], sizes = [2, 32], strides = [1, 1]} : vector<2x64xf32> to vector<2x32xf32>
    %358 = vector.extract_strided_slice %356 {offsets = [0, 32], sizes = [2, 32], strides = [1, 1]} : vector<2x64xf32> to vector<2x32xf32>
    %359 = vector.extract_strided_slice %345 {offsets = [0, 64], sizes = [2, 32], strides = [1, 1]} : vector<2x96xf32> to vector<2x32xf32>
    %360 = vector.extract_strided_slice %348 {offsets = [0, 64], sizes = [2, 32], strides = [1, 1]} : vector<2x96xf32> to vector<2x32xf32>
    %361 = arith.mulf %357, %360 : vector<2x32xf32>
    %362 = arith.addf %359, %361 : vector<2x32xf32>
    %363 = math.tanh %362 : vector<2x32xf32>
    %cst_88 = arith.constant 1.000000e+00 : f32
    %364 = vector.broadcast %cst_88 : f32 to vector<2x32xf32>
    %365 = arith.subf %364, %358 : vector<2x32xf32>
    %366 = arith.mulf %365, %363 : vector<2x32xf32>
    %367 = arith.mulf %358, %343 : vector<2x32xf32>
    %368 = arith.addf %366, %367 : vector<2x32xf32>
    %369 = vector.extract_strided_slice %190 {offsets = [0, 7, 0], sizes = [2, 1, 96], strides = [1, 1, 1]} : vector<2x8x96xf32> to vector<2x1x96xf32>
    %370 = vector.shape_cast %369 : vector<2x1x96xf32> to vector<2x96xf32>
    %cst_89 = arith.constant dense<0.000000e+00> : vector<2x96xf32>
    %371 = tpu.matmul %368, %191, %cst_89 {dimension_numbers = #tpu.dot_dimension_numbers<[1], [0], [0], [1], [0, 0, 1, 1], [], []>} : vector<2x32xf32>, vector<32x96xf32>, vector<2x96xf32> -> vector<2x96xf32>
    %372 = vector.broadcast %192 : vector<1x96xf32> to vector<2x96xf32>
    %373 = arith.addf %371, %372 : vector<2x96xf32>
    %374 = vector.extract_strided_slice %370 {offsets = [0, 0], sizes = [2, 64], strides = [1, 1]} : vector<2x96xf32> to vector<2x64xf32>
    %375 = vector.extract_strided_slice %373 {offsets = [0, 0], sizes = [2, 64], strides = [1, 1]} : vector<2x96xf32> to vector<2x64xf32>
    %376 = arith.addf %374, %375 : vector<2x64xf32>
    %377 = arith.negf %376 : vector<2x64xf32>
    %378 = math.exp %377 : vector<2x64xf32>
    %cst_90 = arith.constant 1.000000e+00 : f32
    %379 = vector.broadcast %cst_90 : f32 to vector<2x64xf32>
    %380 = arith.addf %379, %378 : vector<2x64xf32>
    %381 = arith.divf %379, %380 : vector<2x64xf32>
    %382 = vector.extract_strided_slice %381 {offsets = [0, 0], sizes = [2, 32], strides = [1, 1]} : vector<2x64xf32> to vector<2x32xf32>
    %383 = vector.extract_strided_slice %381 {offsets = [0, 32], sizes = [2, 32], strides = [1, 1]} : vector<2x64xf32> to vector<2x32xf32>
    %384 = vector.extract_strided_slice %370 {offsets = [0, 64], sizes = [2, 32], strides = [1, 1]} : vector<2x96xf32> to vector<2x32xf32>
    %385 = vector.extract_strided_slice %373 {offsets = [0, 64], sizes = [2, 32], strides = [1, 1]} : vector<2x96xf32> to vector<2x32xf32>
    %386 = arith.mulf %382, %385 : vector<2x32xf32>
    %387 = arith.addf %384, %386 : vector<2x32xf32>
    %388 = math.tanh %387 : vector<2x32xf32>
    %cst_91 = arith.constant 1.000000e+00 : f32
    %389 = vector.broadcast %cst_91 : f32 to vector<2x32xf32>
    %390 = arith.subf %389, %383 : vector<2x32xf32>
    %391 = arith.mulf %390, %388 : vector<2x32xf32>
    %392 = arith.mulf %383, %368 : vector<2x32xf32>
    %393 = arith.addf %391, %392 : vector<2x32xf32>
    %c0_92 = arith.constant 0 : index
    %c0_93 = arith.constant 0 : index
    %394 = vector.load %arg17[%c0_92, %c0_93] : memref<32x32xf32, #tpu.memory_space<vmem>>, vector<32x32xf32>
    %cst_94 = arith.constant dense<0.000000e+00> : vector<2x32xf32>
    %395 = tpu.matmul %393, %394, %cst_94 {dimension_numbers = #tpu.dot_dimension_numbers<[1], [0], [0], [1], [0, 0, 1, 1], [], []>} : vector<2x32xf32>, vector<32x32xf32>, vector<2x32xf32> -> vector<2x32xf32>
    %c0_95 = arith.constant 0 : index
    %c0_96 = arith.constant 0 : index
    %396 = vector.load %arg18[%c0_95, %c0_96] : memref<1x32xf32, #tpu.memory_space<vmem>>, vector<1x32xf32>
    %397 = vector.broadcast %396 : vector<1x32xf32> to vector<2x32xf32>
    %398 = arith.addf %395, %397 : vector<2x32xf32>
    %cst_97 = arith.constant 0.000000e+00 : f32
    %399 = vector.broadcast %cst_97 : f32 to vector<2x32xf32>
    %400 = arith.maximumf %398, %399 : vector<2x32xf32>
    %c0_98 = arith.constant 0 : index
    %c0_99 = arith.constant 0 : index
    %401 = vector.load %arg19[%c0_98, %c0_99] : memref<32x4xf32, #tpu.memory_space<vmem>>, vector<32x4xf32>
    %cst_100 = arith.constant dense<0.000000e+00> : vector<2x4xf32>
    %402 = tpu.matmul %400, %401, %cst_100 {dimension_numbers = #tpu.dot_dimension_numbers<[1], [0], [0], [1], [0, 0, 1, 1], [], []>} : vector<2x32xf32>, vector<32x4xf32>, vector<2x4xf32> -> vector<2x4xf32>
    %c0_101 = arith.constant 0 : index
    %c0_102 = arith.constant 0 : index
    %403 = vector.load %arg20[%c0_101, %c0_102] : memref<1x4xf32, #tpu.memory_space<vmem>>, vector<1x4xf32>
    %404 = vector.broadcast %403 : vector<1x4xf32> to vector<2x4xf32>
    %405 = arith.addf %402, %404 : vector<2x4xf32>
    %c0_103 = arith.constant 0 : index
    %c0_104 = arith.constant 0 : index
    %406 = vector.load %arg27[%c0_103, %c0_104] : memref<2x4xf32, #tpu.memory_space<vmem>>, vector<2x4xf32>
    tpu.vector_store %arg27[%c0_103, %c0_104], %405 {strides = array<i32>} : memref<2x4xf32, #tpu.memory_space<vmem>>, vector<2x4xf32>,
    %c0_105 = arith.constant 0 : index
    %c0_106 = arith.constant 0 : index
    %407 = vector.load %arg23[%c0_105, %c0_106] : memref<1x96xf32, #tpu.memory_space<vmem>>, vector<1x96xf32>
    %c0_107 = arith.constant 0 : index
    %c0_108 = arith.constant 0 : index
    %c0_109 = arith.constant 0 : index
    %408 = vector.load %arg21[%c0_107, %c0_108, %c0_109] : memref<8x32x96xf32, #tpu.memory_space<vmem>>, vector<1x32x96xf32>
    %409 = vector.shape_cast %408 : vector<1x32x96xf32> to vector<32x96xf32>
    %cst_110 = arith.constant dense<0.000000e+00> : vector<2x96xf32>
    %410 = tpu.matmul %393, %409, %cst_110 {dimension_numbers = #tpu.dot_dimension_numbers<[1], [0], [0], [1], [0, 0, 1, 1], [], []>} : vector<2x32xf32>, vector<32x96xf32>, vector<2x96xf32> -> vector<2x96xf32>
    %411 = vector.broadcast %407 : vector<1x96xf32> to vector<2x96xf32>
    %412 = arith.addf %410, %411 : vector<2x96xf32>
    %c1 = arith.constant 1 : index
    %c0_111 = arith.constant 0 : index
    %c0_112 = arith.constant 0 : index
    %413 = vector.load %arg21[%c1, %c0_111, %c0_112] : memref<8x32x96xf32, #tpu.memory_space<vmem>>, vector<1x32x96xf32>
    %414 = vector.shape_cast %413 : vector<1x32x96xf32> to vector<32x96xf32>
    %cst_113 = arith.constant dense<0.000000e+00> : vector<2x96xf32>
    %415 = tpu.matmul %393, %414, %cst_113 {dimension_numbers = #tpu.dot_dimension_numbers<[1], [0], [0], [1], [0, 0, 1, 1], [], []>} : vector<2x32xf32>, vector<32x96xf32>, vector<2x96xf32> -> vector<2x96xf32>
    %416 = vector.broadcast %407 : vector<1x96xf32> to vector<2x96xf32>
    %417 = arith.addf %415, %416 : vector<2x96xf32>
    %c2 = arith.constant 2 : index
    %c0_114 = arith.constant 0 : index
    %c0_115 = arith.constant 0 : index
    %418 = vector.load %arg21[%c2, %c0_114, %c0_115] : memref<8x32x96xf32, #tpu.memory_space<vmem>>, vector<1x32x96xf32>
    %419 = vector.shape_cast %418 : vector<1x32x96xf32> to vector<32x96xf32>
    %cst_116 = arith.constant dense<0.000000e+00> : vector<2x96xf32>
    %420 = tpu.matmul %393, %419, %cst_116 {dimension_numbers = #tpu.dot_dimension_numbers<[1], [0], [0], [1], [0, 0, 1, 1], [], []>} : vector<2x32xf32>, vector<32x96xf32>, vector<2x96xf32> -> vector<2x96xf32>
    %421 = vector.broadcast %407 : vector<1x96xf32> to vector<2x96xf32>
    %422 = arith.addf %420, %421 : vector<2x96xf32>
    %c3 = arith.constant 3 : index
    %c0_117 = arith.constant 0 : index
    %c0_118 = arith.constant 0 : index
    %423 = vector.load %arg21[%c3, %c0_117, %c0_118] : memref<8x32x96xf32, #tpu.memory_space<vmem>>, vector<1x32x96xf32>
    %424 = vector.shape_cast %423 : vector<1x32x96xf32> to vector<32x96xf32>
    %cst_119 = arith.constant dense<0.000000e+00> : vector<2x96xf32>
    %425 = tpu.matmul %393, %424, %cst_119 {dimension_numbers = #tpu.dot_dimension_numbers<[1], [0], [0], [1], [0, 0, 1, 1], [], []>} : vector<2x32xf32>, vector<32x96xf32>, vector<2x96xf32> -> vector<2x96xf32>
    %426 = vector.broadcast %407 : vector<1x96xf32> to vector<2x96xf32>
    %427 = arith.addf %425, %426 : vector<2x96xf32>
    %c4 = arith.constant 4 : index
    %c0_120 = arith.constant 0 : index
    %c0_121 = arith.constant 0 : index
    %428 = vector.load %arg21[%c4, %c0_120, %c0_121] : memref<8x32x96xf32, #tpu.memory_space<vmem>>, vector<1x32x96xf32>
    %429 = vector.shape_cast %428 : vector<1x32x96xf32> to vector<32x96xf32>
    %cst_122 = arith.constant dense<0.000000e+00> : vector<2x96xf32>
    %430 = tpu.matmul %393, %429, %cst_122 {dimension_numbers = #tpu.dot_dimension_numbers<[1], [0], [0], [1], [0, 0, 1, 1], [], []>} : vector<2x32xf32>, vector<32x96xf32>, vector<2x96xf32> -> vector<2x96xf32>
    %431 = vector.broadcast %407 : vector<1x96xf32> to vector<2x96xf32>
    %432 = arith.addf %430, %431 : vector<2x96xf32>
    %c5 = arith.constant 5 : index
    %c0_123 = arith.constant 0 : index
    %c0_124 = arith.constant 0 : index
    %433 = vector.load %arg21[%c5, %c0_123, %c0_124] : memref<8x32x96xf32, #tpu.memory_space<vmem>>, vector<1x32x96xf32>
    %434 = vector.shape_cast %433 : vector<1x32x96xf32> to vector<32x96xf32>
    %cst_125 = arith.constant dense<0.000000e+00> : vector<2x96xf32>
    %435 = tpu.matmul %393, %434, %cst_125 {dimension_numbers = #tpu.dot_dimension_numbers<[1], [0], [0], [1], [0, 0, 1, 1], [], []>} : vector<2x32xf32>, vector<32x96xf32>, vector<2x96xf32> -> vector<2x96xf32>
    %436 = vector.broadcast %407 : vector<1x96xf32> to vector<2x96xf32>
    %437 = arith.addf %435, %436 : vector<2x96xf32>
    %c6 = arith.constant 6 : index
    %c0_126 = arith.constant 0 : index
    %c0_127 = arith.constant 0 : index
    %438 = vector.load %arg21[%c6, %c0_126, %c0_127] : memref<8x32x96xf32, #tpu.memory_space<vmem>>, vector<1x32x96xf32>
    %439 = vector.shape_cast %438 : vector<1x32x96xf32> to vector<32x96xf32>
    %cst_128 = arith.constant dense<0.000000e+00> : vector<2x96xf32>
    %440 = tpu.matmul %393, %439, %cst_128 {dimension_numbers = #tpu.dot_dimension_numbers<[1], [0], [0], [1], [0, 0, 1, 1], [], []>} : vector<2x32xf32>, vector<32x96xf32>, vector<2x96xf32> -> vector<2x96xf32>
    %441 = vector.broadcast %407 : vector<1x96xf32> to vector<2x96xf32>
    %442 = arith.addf %440, %441 : vector<2x96xf32>
    %c7 = arith.constant 7 : index
    %c0_129 = arith.constant 0 : index
    %c0_130 = arith.constant 0 : index
    %443 = vector.load %arg21[%c7, %c0_129, %c0_130] : memref<8x32x96xf32, #tpu.memory_space<vmem>>, vector<1x32x96xf32>
    %444 = vector.shape_cast %443 : vector<1x32x96xf32> to vector<32x96xf32>
    %cst_131 = arith.constant dense<0.000000e+00> : vector<2x96xf32>
    %445 = tpu.matmul %393, %444, %cst_131 {dimension_numbers = #tpu.dot_dimension_numbers<[1], [0], [0], [1], [0, 0, 1, 1], [], []>} : vector<2x32xf32>, vector<32x96xf32>, vector<2x96xf32> -> vector<2x96xf32>
    %446 = vector.broadcast %407 : vector<1x96xf32> to vector<2x96xf32>
    %447 = arith.addf %445, %446 : vector<2x96xf32>
    %c0_132 = arith.constant 0 : index
    %c0_133 = arith.constant 0 : index
    %448 = vector.load %arg22[%c0_132, %c0_133] : memref<32x96xf32, #tpu.memory_space<vmem>>, vector<32x96xf32>
    %c0_134 = arith.constant 0 : index
    %c0_135 = arith.constant 0 : index
    %449 = vector.load %arg24[%c0_134, %c0_135] : memref<1x96xf32, #tpu.memory_space<vmem>>, vector<1x96xf32>
    %cst_136 = arith.constant 0.000000e+00 : f32
    %450 = vector.broadcast %cst_136 : f32 to vector<2x32xf32>
    %cst_137 = arith.constant dense<0.000000e+00> : vector<2x96xf32>
    %451 = tpu.matmul %450, %448, %cst_137 {dimension_numbers = #tpu.dot_dimension_numbers<[1], [0], [0], [1], [0, 0, 1, 1], [], []>} : vector<2x32xf32>, vector<32x96xf32>, vector<2x96xf32> -> vector<2x96xf32>
    %452 = vector.broadcast %449 : vector<1x96xf32> to vector<2x96xf32>
    %453 = arith.addf %451, %452 : vector<2x96xf32>
    %454 = vector.extract_strided_slice %412 {offsets = [0, 0], sizes = [2, 64], strides = [1, 1]} : vector<2x96xf32> to vector<2x64xf32>
    %455 = vector.extract_strided_slice %453 {offsets = [0, 0], sizes = [2, 64], strides = [1, 1]} : vector<2x96xf32> to vector<2x64xf32>
    %456 = arith.addf %454, %455 : vector<2x64xf32>
    %457 = arith.negf %456 : vector<2x64xf32>
    %458 = math.exp %457 : vector<2x64xf32>
    %cst_138 = arith.constant 1.000000e+00 : f32
    %459 = vector.broadcast %cst_138 : f32 to vector<2x64xf32>
    %460 = arith.addf %459, %458 : vector<2x64xf32>
    %461 = arith.divf %459, %460 : vector<2x64xf32>
    %462 = vector.extract_strided_slice %461 {offsets = [0, 0], sizes = [2, 32], strides = [1, 1]} : vector<2x64xf32> to vector<2x32xf32>
    %463 = vector.extract_strided_slice %461 {offsets = [0, 32], sizes = [2, 32], strides = [1, 1]} : vector<2x64xf32> to vector<2x32xf32>
    %464 = vector.extract_strided_slice %412 {offsets = [0, 64], sizes = [2, 32], strides = [1, 1]} : vector<2x96xf32> to vector<2x32xf32>
    %465 = vector.extract_strided_slice %453 {offsets = [0, 64], sizes = [2, 32], strides = [1, 1]} : vector<2x96xf32> to vector<2x32xf32>
    %466 = arith.mulf %462, %465 : vector<2x32xf32>
    %467 = arith.addf %464, %466 : vector<2x32xf32>
    %468 = math.tanh %467 : vector<2x32xf32>
    %cst_139 = arith.constant 1.000000e+00 : f32
    %469 = vector.broadcast %cst_139 : f32 to vector<2x32xf32>
    %470 = arith.subf %469, %463 : vector<2x32xf32>
    %471 = arith.mulf %470, %468 : vector<2x32xf32>
    %472 = arith.mulf %463, %450 : vector<2x32xf32>
    %473 = arith.addf %471, %472 : vector<2x32xf32>
    %c0_140 = arith.constant 0 : index
    %c0_141 = arith.constant 0 : index
    %c0_142 = arith.constant 0 : index
    %474 = vector.load %arg29[%c0_140, %c0_141, %c0_142] : memref<2x8x32xf32, #tpu.memory_space<vmem>>, vector<2x1x32xf32>
    %475 = vector.shape_cast %474 : vector<2x1x32xf32> to vector<2x32xf32>
    %476 = vector.shape_cast %473 : vector<2x32xf32> to vector<2x1x32xf32>
    tpu.vector_store %arg29[%c0_140, %c0_141, %c0_142], %476 {strides = array<i32>} : memref<2x8x32xf32, #tpu.memory_space<vmem>>, vector<2x1x32xf32>,
    %cst_143 = arith.constant dense<0.000000e+00> : vector<2x96xf32>
    %477 = tpu.matmul %473, %448, %cst_143 {dimension_numbers = #tpu.dot_dimension_numbers<[1], [0], [0], [1], [0, 0, 1, 1], [], []>} : vector<2x32xf32>, vector<32x96xf32>, vector<2x96xf32> -> vector<2x96xf32>
    %478 = vector.broadcast %449 : vector<1x96xf32> to vector<2x96xf32>
    %479 = arith.addf %477, %478 : vector<2x96xf32>
    %480 = vector.extract_strided_slice %417 {offsets = [0, 0], sizes = [2, 64], strides = [1, 1]} : vector<2x96xf32> to vector<2x64xf32>
    %481 = vector.extract_strided_slice %479 {offsets = [0, 0], sizes = [2, 64], strides = [1, 1]} : vector<2x96xf32> to vector<2x64xf32>
    %482 = arith.addf %480, %481 : vector<2x64xf32>
    %483 = arith.negf %482 : vector<2x64xf32>
    %484 = math.exp %483 : vector<2x64xf32>
    %cst_144 = arith.constant 1.000000e+00 : f32
    %485 = vector.broadcast %cst_144 : f32 to vector<2x64xf32>
    %486 = arith.addf %485, %484 : vector<2x64xf32>
    %487 = arith.divf %485, %486 : vector<2x64xf32>
    %488 = vector.extract_strided_slice %487 {offsets = [0, 0], sizes = [2, 32], strides = [1, 1]} : vector<2x64xf32> to vector<2x32xf32>
    %489 = vector.extract_strided_slice %487 {offsets = [0, 32], sizes = [2, 32], strides = [1, 1]} : vector<2x64xf32> to vector<2x32xf32>
    %490 = vector.extract_strided_slice %417 {offsets = [0, 64], sizes = [2, 32], strides = [1, 1]} : vector<2x96xf32> to vector<2x32xf32>
    %491 = vector.extract_strided_slice %479 {offsets = [0, 64], sizes = [2, 32], strides = [1, 1]} : vector<2x96xf32> to vector<2x32xf32>
    %492 = arith.mulf %488, %491 : vector<2x32xf32>
    %493 = arith.addf %490, %492 : vector<2x32xf32>
    %494 = math.tanh %493 : vector<2x32xf32>
    %cst_145 = arith.constant 1.000000e+00 : f32
    %495 = vector.broadcast %cst_145 : f32 to vector<2x32xf32>
    %496 = arith.subf %495, %489 : vector<2x32xf32>
    %497 = arith.mulf %496, %494 : vector<2x32xf32>
    %498 = arith.mulf %489, %473 : vector<2x32xf32>
    %499 = arith.addf %497, %498 : vector<2x32xf32>
    %c0_146 = arith.constant 0 : index
    %c1_147 = arith.constant 1 : index
    %c0_148 = arith.constant 0 : index
    %500 = vector.load %arg29[%c0_146, %c1_147, %c0_148] : memref<2x8x32xf32, #tpu.memory_space<vmem>>, vector<2x1x32xf32>
    %501 = vector.shape_cast %500 : vector<2x1x32xf32> to vector<2x32xf32>
    %502 = vector.shape_cast %499 : vector<2x32xf32> to vector<2x1x32xf32>
    tpu.vector_store %arg29[%c0_146, %c1_147, %c0_148], %502 {strides = array<i32>} : memref<2x8x32xf32, #tpu.memory_space<vmem>>, vector<2x1x32xf32>,
    %cst_149 = arith.constant dense<0.000000e+00> : vector<2x96xf32>
    %503 = tpu.matmul %499, %448, %cst_149 {dimension_numbers = #tpu.dot_dimension_numbers<[1], [0], [0], [1], [0, 0, 1, 1], [], []>} : vector<2x32xf32>, vector<32x96xf32>, vector<2x96xf32> -> vector<2x96xf32>
    %504 = vector.broadcast %449 : vector<1x96xf32> to vector<2x96xf32>
    %505 = arith.addf %503, %504 : vector<2x96xf32>
    %506 = vector.extract_strided_slice %422 {offsets = [0, 0], sizes = [2, 64], strides = [1, 1]} : vector<2x96xf32> to vector<2x64xf32>
    %507 = vector.extract_strided_slice %505 {offsets = [0, 0], sizes = [2, 64], strides = [1, 1]} : vector<2x96xf32> to vector<2x64xf32>
    %508 = arith.addf %506, %507 : vector<2x64xf32>
    %509 = arith.negf %508 : vector<2x64xf32>
    %510 = math.exp %509 : vector<2x64xf32>
    %cst_150 = arith.constant 1.000000e+00 : f32
    %511 = vector.broadcast %cst_150 : f32 to vector<2x64xf32>
    %512 = arith.addf %511, %510 : vector<2x64xf32>
    %513 = arith.divf %511, %512 : vector<2x64xf32>
    %514 = vector.extract_strided_slice %513 {offsets = [0, 0], sizes = [2, 32], strides = [1, 1]} : vector<2x64xf32> to vector<2x32xf32>
    %515 = vector.extract_strided_slice %513 {offsets = [0, 32], sizes = [2, 32], strides = [1, 1]} : vector<2x64xf32> to vector<2x32xf32>
    %516 = vector.extract_strided_slice %422 {offsets = [0, 64], sizes = [2, 32], strides = [1, 1]} : vector<2x96xf32> to vector<2x32xf32>
    %517 = vector.extract_strided_slice %505 {offsets = [0, 64], sizes = [2, 32], strides = [1, 1]} : vector<2x96xf32> to vector<2x32xf32>
    %518 = arith.mulf %514, %517 : vector<2x32xf32>
    %519 = arith.addf %516, %518 : vector<2x32xf32>
    %520 = math.tanh %519 : vector<2x32xf32>
    %cst_151 = arith.constant 1.000000e+00 : f32
    %521 = vector.broadcast %cst_151 : f32 to vector<2x32xf32>
    %522 = arith.subf %521, %515 : vector<2x32xf32>
    %523 = arith.mulf %522, %520 : vector<2x32xf32>
    %524 = arith.mulf %515, %499 : vector<2x32xf32>
    %525 = arith.addf %523, %524 : vector<2x32xf32>
    %c0_152 = arith.constant 0 : index
    %c2_153 = arith.constant 2 : index
    %c0_154 = arith.constant 0 : index
    %526 = vector.load %arg29[%c0_152, %c2_153, %c0_154] : memref<2x8x32xf32, #tpu.memory_space<vmem>>, vector<2x1x32xf32>
    %527 = vector.shape_cast %526 : vector<2x1x32xf32> to vector<2x32xf32>
    %528 = vector.shape_cast %525 : vector<2x32xf32> to vector<2x1x32xf32>
    tpu.vector_store %arg29[%c0_152, %c2_153, %c0_154], %528 {strides = array<i32>} : memref<2x8x32xf32, #tpu.memory_space<vmem>>, vector<2x1x32xf32>,
    %cst_155 = arith.constant dense<0.000000e+00> : vector<2x96xf32>
    %529 = tpu.matmul %525, %448, %cst_155 {dimension_numbers = #tpu.dot_dimension_numbers<[1], [0], [0], [1], [0, 0, 1, 1], [], []>} : vector<2x32xf32>, vector<32x96xf32>, vector<2x96xf32> -> vector<2x96xf32>
    %530 = vector.broadcast %449 : vector<1x96xf32> to vector<2x96xf32>
    %531 = arith.addf %529, %530 : vector<2x96xf32>
    %532 = vector.extract_strided_slice %427 {offsets = [0, 0], sizes = [2, 64], strides = [1, 1]} : vector<2x96xf32> to vector<2x64xf32>
    %533 = vector.extract_strided_slice %531 {offsets = [0, 0], sizes = [2, 64], strides = [1, 1]} : vector<2x96xf32> to vector<2x64xf32>
    %534 = arith.addf %532, %533 : vector<2x64xf32>
    %535 = arith.negf %534 : vector<2x64xf32>
    %536 = math.exp %535 : vector<2x64xf32>
    %cst_156 = arith.constant 1.000000e+00 : f32
    %537 = vector.broadcast %cst_156 : f32 to vector<2x64xf32>
    %538 = arith.addf %537, %536 : vector<2x64xf32>
    %539 = arith.divf %537, %538 : vector<2x64xf32>
    %540 = vector.extract_strided_slice %539 {offsets = [0, 0], sizes = [2, 32], strides = [1, 1]} : vector<2x64xf32> to vector<2x32xf32>
    %541 = vector.extract_strided_slice %539 {offsets = [0, 32], sizes = [2, 32], strides = [1, 1]} : vector<2x64xf32> to vector<2x32xf32>
    %542 = vector.extract_strided_slice %427 {offsets = [0, 64], sizes = [2, 32], strides = [1, 1]} : vector<2x96xf32> to vector<2x32xf32>
    %543 = vector.extract_strided_slice %531 {offsets = [0, 64], sizes = [2, 32], strides = [1, 1]} : vector<2x96xf32> to vector<2x32xf32>
    %544 = arith.mulf %540, %543 : vector<2x32xf32>
    %545 = arith.addf %542, %544 : vector<2x32xf32>
    %546 = math.tanh %545 : vector<2x32xf32>
    %cst_157 = arith.constant 1.000000e+00 : f32
    %547 = vector.broadcast %cst_157 : f32 to vector<2x32xf32>
    %548 = arith.subf %547, %541 : vector<2x32xf32>
    %549 = arith.mulf %548, %546 : vector<2x32xf32>
    %550 = arith.mulf %541, %525 : vector<2x32xf32>
    %551 = arith.addf %549, %550 : vector<2x32xf32>
    %c0_158 = arith.constant 0 : index
    %c3_159 = arith.constant 3 : index
    %c0_160 = arith.constant 0 : index
    %552 = vector.load %arg29[%c0_158, %c3_159, %c0_160] : memref<2x8x32xf32, #tpu.memory_space<vmem>>, vector<2x1x32xf32>
    %553 = vector.shape_cast %552 : vector<2x1x32xf32> to vector<2x32xf32>
    %554 = vector.shape_cast %551 : vector<2x32xf32> to vector<2x1x32xf32>
    tpu.vector_store %arg29[%c0_158, %c3_159, %c0_160], %554 {strides = array<i32>} : memref<2x8x32xf32, #tpu.memory_space<vmem>>, vector<2x1x32xf32>,
    %cst_161 = arith.constant dense<0.000000e+00> : vector<2x96xf32>
    %555 = tpu.matmul %551, %448, %cst_161 {dimension_numbers = #tpu.dot_dimension_numbers<[1], [0], [0], [1], [0, 0, 1, 1], [], []>} : vector<2x32xf32>, vector<32x96xf32>, vector<2x96xf32> -> vector<2x96xf32>
    %556 = vector.broadcast %449 : vector<1x96xf32> to vector<2x96xf32>
    %557 = arith.addf %555, %556 : vector<2x96xf32>
    %558 = vector.extract_strided_slice %432 {offsets = [0, 0], sizes = [2, 64], strides = [1, 1]} : vector<2x96xf32> to vector<2x64xf32>
    %559 = vector.extract_strided_slice %557 {offsets = [0, 0], sizes = [2, 64], strides = [1, 1]} : vector<2x96xf32> to vector<2x64xf32>
    %560 = arith.addf %558, %559 : vector<2x64xf32>
    %561 = arith.negf %560 : vector<2x64xf32>
    %562 = math.exp %561 : vector<2x64xf32>
    %cst_162 = arith.constant 1.000000e+00 : f32
    %563 = vector.broadcast %cst_162 : f32 to vector<2x64xf32>
    %564 = arith.addf %563, %562 : vector<2x64xf32>
    %565 = arith.divf %563, %564 : vector<2x64xf32>
    %566 = vector.extract_strided_slice %565 {offsets = [0, 0], sizes = [2, 32], strides = [1, 1]} : vector<2x64xf32> to vector<2x32xf32>
    %567 = vector.extract_strided_slice %565 {offsets = [0, 32], sizes = [2, 32], strides = [1, 1]} : vector<2x64xf32> to vector<2x32xf32>
    %568 = vector.extract_strided_slice %432 {offsets = [0, 64], sizes = [2, 32], strides = [1, 1]} : vector<2x96xf32> to vector<2x32xf32>
    %569 = vector.extract_strided_slice %557 {offsets = [0, 64], sizes = [2, 32], strides = [1, 1]} : vector<2x96xf32> to vector<2x32xf32>
    %570 = arith.mulf %566, %569 : vector<2x32xf32>
    %571 = arith.addf %568, %570 : vector<2x32xf32>
    %572 = math.tanh %571 : vector<2x32xf32>
    %cst_163 = arith.constant 1.000000e+00 : f32
    %573 = vector.broadcast %cst_163 : f32 to vector<2x32xf32>
    %574 = arith.subf %573, %567 : vector<2x32xf32>
    %575 = arith.mulf %574, %572 : vector<2x32xf32>
    %576 = arith.mulf %567, %551 : vector<2x32xf32>
    %577 = arith.addf %575, %576 : vector<2x32xf32>
    %c0_164 = arith.constant 0 : index
    %c4_165 = arith.constant 4 : index
    %c0_166 = arith.constant 0 : index
    %578 = vector.load %arg29[%c0_164, %c4_165, %c0_166] : memref<2x8x32xf32, #tpu.memory_space<vmem>>, vector<2x1x32xf32>
    %579 = vector.shape_cast %578 : vector<2x1x32xf32> to vector<2x32xf32>
    %580 = vector.shape_cast %577 : vector<2x32xf32> to vector<2x1x32xf32>
    tpu.vector_store %arg29[%c0_164, %c4_165, %c0_166], %580 {strides = array<i32>} : memref<2x8x32xf32, #tpu.memory_space<vmem>>, vector<2x1x32xf32>,
    %cst_167 = arith.constant dense<0.000000e+00> : vector<2x96xf32>
    %581 = tpu.matmul %577, %448, %cst_167 {dimension_numbers = #tpu.dot_dimension_numbers<[1], [0], [0], [1], [0, 0, 1, 1], [], []>} : vector<2x32xf32>, vector<32x96xf32>, vector<2x96xf32> -> vector<2x96xf32>
    %582 = vector.broadcast %449 : vector<1x96xf32> to vector<2x96xf32>
    %583 = arith.addf %581, %582 : vector<2x96xf32>
    %584 = vector.extract_strided_slice %437 {offsets = [0, 0], sizes = [2, 64], strides = [1, 1]} : vector<2x96xf32> to vector<2x64xf32>
    %585 = vector.extract_strided_slice %583 {offsets = [0, 0], sizes = [2, 64], strides = [1, 1]} : vector<2x96xf32> to vector<2x64xf32>
    %586 = arith.addf %584, %585 : vector<2x64xf32>
    %587 = arith.negf %586 : vector<2x64xf32>
    %588 = math.exp %587 : vector<2x64xf32>
    %cst_168 = arith.constant 1.000000e+00 : f32
    %589 = vector.broadcast %cst_168 : f32 to vector<2x64xf32>
    %590 = arith.addf %589, %588 : vector<2x64xf32>
    %591 = arith.divf %589, %590 : vector<2x64xf32>
    %592 = vector.extract_strided_slice %591 {offsets = [0, 0], sizes = [2, 32], strides = [1, 1]} : vector<2x64xf32> to vector<2x32xf32>
    %593 = vector.extract_strided_slice %591 {offsets = [0, 32], sizes = [2, 32], strides = [1, 1]} : vector<2x64xf32> to vector<2x32xf32>
    %594 = vector.extract_strided_slice %437 {offsets = [0, 64], sizes = [2, 32], strides = [1, 1]} : vector<2x96xf32> to vector<2x32xf32>
    %595 = vector.extract_strided_slice %583 {offsets = [0, 64], sizes = [2, 32], strides = [1, 1]} : vector<2x96xf32> to vector<2x32xf32>
    %596 = arith.mulf %592, %595 : vector<2x32xf32>
    %597 = arith.addf %594, %596 : vector<2x32xf32>
    %598 = math.tanh %597 : vector<2x32xf32>
    %cst_169 = arith.constant 1.000000e+00 : f32
    %599 = vector.broadcast %cst_169 : f32 to vector<2x32xf32>
    %600 = arith.subf %599, %593 : vector<2x32xf32>
    %601 = arith.mulf %600, %598 : vector<2x32xf32>
    %602 = arith.mulf %593, %577 : vector<2x32xf32>
    %603 = arith.addf %601, %602 : vector<2x32xf32>
    %c0_170 = arith.constant 0 : index
    %c5_171 = arith.constant 5 : index
    %c0_172 = arith.constant 0 : index
    %604 = vector.load %arg29[%c0_170, %c5_171, %c0_172] : memref<2x8x32xf32, #tpu.memory_space<vmem>>, vector<2x1x32xf32>
    %605 = vector.shape_cast %604 : vector<2x1x32xf32> to vector<2x32xf32>
    %606 = vector.shape_cast %603 : vector<2x32xf32> to vector<2x1x32xf32>
    tpu.vector_store %arg29[%c0_170, %c5_171, %c0_172], %606 {strides = array<i32>} : memref<2x8x32xf32, #tpu.memory_space<vmem>>, vector<2x1x32xf32>,
    %cst_173 = arith.constant dense<0.000000e+00> : vector<2x96xf32>
    %607 = tpu.matmul %603, %448, %cst_173 {dimension_numbers = #tpu.dot_dimension_numbers<[1], [0], [0], [1], [0, 0, 1, 1], [], []>} : vector<2x32xf32>, vector<32x96xf32>, vector<2x96xf32> -> vector<2x96xf32>
    %608 = vector.broadcast %449 : vector<1x96xf32> to vector<2x96xf32>
    %609 = arith.addf %607, %608 : vector<2x96xf32>
    %610 = vector.extract_strided_slice %442 {offsets = [0, 0], sizes = [2, 64], strides = [1, 1]} : vector<2x96xf32> to vector<2x64xf32>
    %611 = vector.extract_strided_slice %609 {offsets = [0, 0], sizes = [2, 64], strides = [1, 1]} : vector<2x96xf32> to vector<2x64xf32>
    %612 = arith.addf %610, %611 : vector<2x64xf32>
    %613 = arith.negf %612 : vector<2x64xf32>
    %614 = math.exp %613 : vector<2x64xf32>
    %cst_174 = arith.constant 1.000000e+00 : f32
    %615 = vector.broadcast %cst_174 : f32 to vector<2x64xf32>
    %616 = arith.addf %615, %614 : vector<2x64xf32>
    %617 = arith.divf %615, %616 : vector<2x64xf32>
    %618 = vector.extract_strided_slice %617 {offsets = [0, 0], sizes = [2, 32], strides = [1, 1]} : vector<2x64xf32> to vector<2x32xf32>
    %619 = vector.extract_strided_slice %617 {offsets = [0, 32], sizes = [2, 32], strides = [1, 1]} : vector<2x64xf32> to vector<2x32xf32>
    %620 = vector.extract_strided_slice %442 {offsets = [0, 64], sizes = [2, 32], strides = [1, 1]} : vector<2x96xf32> to vector<2x32xf32>
    %621 = vector.extract_strided_slice %609 {offsets = [0, 64], sizes = [2, 32], strides = [1, 1]} : vector<2x96xf32> to vector<2x32xf32>
    %622 = arith.mulf %618, %621 : vector<2x32xf32>
    %623 = arith.addf %620, %622 : vector<2x32xf32>
    %624 = math.tanh %623 : vector<2x32xf32>
    %cst_175 = arith.constant 1.000000e+00 : f32
    %625 = vector.broadcast %cst_175 : f32 to vector<2x32xf32>
    %626 = arith.subf %625, %619 : vector<2x32xf32>
    %627 = arith.mulf %626, %624 : vector<2x32xf32>
    %628 = arith.mulf %619, %603 : vector<2x32xf32>
    %629 = arith.addf %627, %628 : vector<2x32xf32>
    %c0_176 = arith.constant 0 : index
    %c6_177 = arith.constant 6 : index
    %c0_178 = arith.constant 0 : index
    %630 = vector.load %arg29[%c0_176, %c6_177, %c0_178] : memref<2x8x32xf32, #tpu.memory_space<vmem>>, vector<2x1x32xf32>
    %631 = vector.shape_cast %630 : vector<2x1x32xf32> to vector<2x32xf32>
    %632 = vector.shape_cast %629 : vector<2x32xf32> to vector<2x1x32xf32>
    tpu.vector_store %arg29[%c0_176, %c6_177, %c0_178], %632 {strides = array<i32>} : memref<2x8x32xf32, #tpu.memory_space<vmem>>, vector<2x1x32xf32>,
    %cst_179 = arith.constant dense<0.000000e+00> : vector<2x96xf32>
    %633 = tpu.matmul %629, %448, %cst_179 {dimension_numbers = #tpu.dot_dimension_numbers<[1], [0], [0], [1], [0, 0, 1, 1], [], []>} : vector<2x32xf32>, vector<32x96xf32>, vector<2x96xf32> -> vector<2x96xf32>
    %634 = vector.broadcast %449 : vector<1x96xf32> to vector<2x96xf32>
    %635 = arith.addf %633, %634 : vector<2x96xf32>
    %636 = vector.extract_strided_slice %447 {offsets = [0, 0], sizes = [2, 64], strides = [1, 1]} : vector<2x96xf32> to vector<2x64xf32>
    %637 = vector.extract_strided_slice %635 {offsets = [0, 0], sizes = [2, 64], strides = [1, 1]} : vector<2x96xf32> to vector<2x64xf32>
    %638 = arith.addf %636, %637 : vector<2x64xf32>
    %639 = arith.negf %638 : vector<2x64xf32>
    %640 = math.exp %639 : vector<2x64xf32>
    %cst_180 = arith.constant 1.000000e+00 : f32
    %641 = vector.broadcast %cst_180 : f32 to vector<2x64xf32>
    %642 = arith.addf %641, %640 : vector<2x64xf32>
    %643 = arith.divf %641, %642 : vector<2x64xf32>
    %644 = vector.extract_strided_slice %643 {offsets = [0, 0], sizes = [2, 32], strides = [1, 1]} : vector<2x64xf32> to vector<2x32xf32>
    %645 = vector.extract_strided_slice %643 {offsets = [0, 32], sizes = [2, 32], strides = [1, 1]} : vector<2x64xf32> to vector<2x32xf32>
    %646 = vector.extract_strided_slice %447 {offsets = [0, 64], sizes = [2, 32], strides = [1, 1]} : vector<2x96xf32> to vector<2x32xf32>
    %647 = vector.extract_strided_slice %635 {offsets = [0, 64], sizes = [2, 32], strides = [1, 1]} : vector<2x96xf32> to vector<2x32xf32>
    %648 = arith.mulf %644, %647 : vector<2x32xf32>
    %649 = arith.addf %646, %648 : vector<2x32xf32>
    %650 = math.tanh %649 : vector<2x32xf32>
    %cst_181 = arith.constant 1.000000e+00 : f32
    %651 = vector.broadcast %cst_181 : f32 to vector<2x32xf32>
    %652 = arith.subf %651, %645 : vector<2x32xf32>
    %653 = arith.mulf %652, %650 : vector<2x32xf32>
    %654 = arith.mulf %645, %629 : vector<2x32xf32>
    %655 = arith.addf %653, %654 : vector<2x32xf32>
    %c0_182 = arith.constant 0 : index
    %c7_183 = arith.constant 7 : index
    %c0_184 = arith.constant 0 : index
    %656 = vector.load %arg29[%c0_182, %c7_183, %c0_184] : memref<2x8x32xf32, #tpu.memory_space<vmem>>, vector<2x1x32xf32>
    %657 = vector.shape_cast %656 : vector<2x1x32xf32> to vector<2x32xf32>
    %658 = vector.shape_cast %655 : vector<2x32xf32> to vector<2x1x32xf32>
    tpu.vector_store %arg29[%c0_182, %c7_183, %c0_184], %658 {strides = array<i32>} : memref<2x8x32xf32, #tpu.memory_space<vmem>>, vector<2x1x32xf32>,
    %c0_185 = arith.constant 0 : index
    %c0_186 = arith.constant 0 : index
    %c0_187 = arith.constant 0 : index
    %659 = vector.load %arg29[%c0_185, %c0_186, %c0_187] : memref<2x8x32xf32, #tpu.memory_space<vmem>>, vector<2x8x32xf32>
    %660 = vector.shape_cast %659 : vector<2x8x32xf32> to vector<16x32xf32>
    %c0_188 = arith.constant 0 : index
    %c0_189 = arith.constant 0 : index
    %661 = vector.load %arg25[%c0_188, %c0_189] : memref<32x4xf32, #tpu.memory_space<vmem>>, vector<32x4xf32>
    %cst_190 = arith.constant dense<0.000000e+00> : vector<16x4xf32>
    %662 = tpu.matmul %660, %661, %cst_190 {dimension_numbers = #tpu.dot_dimension_numbers<[1], [0], [0], [1], [0, 0, 1, 1], [], []>} : vector<16x32xf32>, vector<32x4xf32>, vector<16x4xf32> -> vector<16x4xf32>
    %c0_191 = arith.constant 0 : index
    %c0_192 = arith.constant 0 : index
    %663 = vector.load %arg26[%c0_191, %c0_192] : memref<1x4xf32, #tpu.memory_space<vmem>>, vector<1x4xf32>
    %664 = vector.broadcast %663 : vector<1x4xf32> to vector<16x4xf32>
    %665 = arith.addf %662, %664 : vector<16x4xf32>
    %666 = vector.shape_cast %665 : vector<16x4xf32> to vector<2x8x4xf32>
    %c0_193 = arith.constant 0 : index
    %c0_194 = arith.constant 0 : index
    %c0_195 = arith.constant 0 : index
    %667 = vector.load %arg28[%c0_193, %c0_194, %c0_195] : memref<2x8x4xf32, #tpu.memory_space<vmem>>, vector<2x8x4xf32>
    tpu.vector_store %arg28[%c0_193, %c0_194, %c0_195], %666 {strides = array<i32>} : memref<2x8x4xf32, #tpu.memory_space<vmem>>, vector<2x8x4xf32>,
    return
  }
}

</mosaic_0001>

<bundles_post_ra>
// kernel: _lambda_.1
= control target key start
LH: loop header
LB: loop body
LE: loop exit
PB: predicated region body
PF: predicated region fallthrough
CT: control target
= control target key end

     0   :  { %s8473_s0 = inlined_call_operand.vmem [shape: f32[16,28], index: 0, kind: input, shape index: {}]   ;;  %s8474_s1 = inlined_call_operand.vmem [shape: f32[28,4], index: 1, kind: input, shape index: {}]   ;;  %s8475_s2 = inlined_call_operand.vmem [shape: f32[1,4], index: 2, kind: input, shape index: {}]   ;;  %s8476_s3 = inlined_call_operand.vmem [shape: f32[8,32], index: 3, kind: input, shape index: {}]   ;;  %s8477_s4 = inlined_call_operand.vmem [shape: f32[1,16], index: 4, kind: input, shape index: {}]   ;;  %s8478_s5 = inlined_call_operand.vmem [shape: f32[1,16], index: 5, kind: input, shape index: {}]   ;;  %s8479_s6 = inlined_call_operand.vmem [shape: f32[4,4], index: 6, kind: input, shape index: {}]   ;;  %s8480_s7 = inlined_call_operand.vmem [shape: f32[4,16], index: 7, kind: input, shape index: {}]   ;;  %s8481_s8 = inlined_call_operand.vmem [shape: f32[1,8], index: 8, kind: input, shape index: {}]   ;;  %s8482_s9 = inlined_call_operand.vmem [shape: f32[1,8], index: 9, kind: input, shape index: {}]   ;;  %s8483_s10 = inlined_call_operand.vmem [shape: f32[8,8], index: 10, kind: input, shape index: {}]   ;;  %s8484_s11 = inlined_call_operand.vmem [shape: f32[4,96], index: 11, kind: input, shape index: {}]   ;;  %s8485_s12 = inlined_call_operand.vmem [shape: f32[4,96], index: 12, kind: input, shape index: {}]   ;;  %s8486_s13 = inlined_call_operand.vmem [shape: f32[4,96], index: 13, kind: input, shape index: {}]   ;;  %s8487_s14 = inlined_call_operand.vmem [shape: f32[32,96], index: 14, kind: input, shape index: {}]   ;;  %s8488_s15 = inlined_call_operand.vmem [shape: f32[1,96], index: 15, kind: input, shape index: {}]   ;;  %s8489_s16 = inlined_call_operand.vmem [shape: f32[1,96], index: 16, kind: input, shape index: {}]   ;;  %s8490_s17 = inlined_call_operand.vmem [shape: f32[32,32], index: 17, kind: input, shape index: {}]   ;;  %s8491_s18 = inlined_call_operand.vmem [shape: f32[1,32], index: 18, kind: input, shape index: {}]   ;;  %s8492_s19 = inlined_call_operand.vmem [shape: f32[32,4], index: 19, kind: input, shape index: {}]   ;;  %s8493_s20 = inlined_call_operand.vmem [shape: f32[1,4], index: 20, kind: input, shape index: {}]   ;;  %s8494_s21 = inlined_call_operand.vmem [shape: f32[8,32,96], index: 21, kind: input, shape index: {}]   ;;  %s8495_s22 = inlined_call_operand.vmem [shape: f32[32,96], index: 22, kind: input, shape index: {}]   ;;  %s8496_s23 = inlined_call_operand.vmem [shape: f32[1,96], index: 23, kind: input, shape index: {}]   ;;  %s8497_s24 = inlined_call_operand.vmem [shape: f32[1,96], index: 24, kind: input, shape index: {}]   ;;  %s8498_s25 = inlined_call_operand.vmem [shape: f32[32,4], index: 25, kind: input, shape index: {}]   ;;  %s8499_s26 = inlined_call_operand.vmem [shape: f32[1,4], index: 26, kind: input, shape index: {}]   ;;  %s8500_s27 = inlined_call_operand.hbm [shape: f32[2,4], index: 27, kind: output, shape index: {0}]   ;;  %s8501_s28 = inlined_call_operand.vmem [shape: f32[2,8,4], index: 28, kind: output, shape index: {1}]  }
   0x1   :  { %8504 = sst [smem:[#allocation6_spill]] %s8473_s0 }
   0x2   :  { %8505 = sst [smem:[#allocation7_spill]] %s8474_s1 }
   0x3   :  { %8506 = sst [smem:[#allocation8_spill]] %s8475_s2 }
   0x4   :  { %8507 = sst [smem:[#allocation9_spill]] %s8476_s3 }
   0x5   :  { %8508 = sst [smem:[#allocation10_spill]] %s8477_s4 }
   0x6   :  { %8509 = sst [smem:[#allocation11_spill]] %s8478_s5 }
   0x7   :  { %8510 = sst [smem:[#allocation12_spill]] %s8479_s6 }
   0x8   :  { %8511 = sst [smem:[#allocation13_spill]] %s8480_s7 }
   0x9   :  { %8512 = sst [smem:[#allocation14_spill]] %s8481_s8 }
   0xa   :  { %8513 = sst [smem:[#allocation15_spill]] %s8482_s9 }
   0xb   :  { %8514 = sst [smem:[#allocation16_spill]] %s8483_s10 }
   0xc   :  { %8515 = sst [smem:[#allocation17_spill]] %s8484_s11 }
   0xd   :  { %8516 = sst [smem:[#allocation18_spill]] %s8485_s12 }
   0xe   :  { %s8517_s9 = sld [smem:[#allocation7_spill]]  ;;  %vm109_vm0 = vcmask 1043456   ;;  %vm102_vm1 = vcmask 228352  }
   0xf   :  { %s8518_s0 = sld [smem:[#allocation6_spill]] }
  0x14   :  { %v94_v0 = vld [vmem:[%s8517_s9 + $0x18] sm:$0xf]  ;;  %v93_v1 = vld [vmem:[%s8517_s9 + $0x10] sm:$0xff]  ;;  %v92_v3 = vld [vmem:[%s8517_s9 + $0x8] sm:$0xff] }
  0x15   :  { %6136 = vmatprep.subr.msk.mxu0 %vm109_vm0, %v94_v0  ;;  %v89_v2 = vld [vmem:[%s8518_s0] sm:$0xff] }
  0x16   :  { %6137 = vmatpush3.msk.msra.mxu0 %vm109_vm0, %v94_v0  ;;  %6144 = vmatprep.mubr.msk.f32.mxu0 %vm102_vm1, %v89_v2 }
  0x17   :  { %34 = vsyncpa [#allocation4], 0  ;;  %6138 = vmatprep.subr.mxu0 %v93_v1  ;;  %v91_v4 = vld [vmem:[%s8517_s9] sm:$0xff]  ;;  %v90_v5 = vld [vmem:[%s8518_s0 + $0x8] sm:$0xff]  ;;  %v6738_v6 = vmov 0.0   ;;  %s8519_s5 = sld [smem:[#allocation8_spill]]  ;;  %v429_v16 = vlaneseq }
  0x18   :  { %6139 = vmatpush3.msra.mxu0 %v93_v1  ;;  %6147 = vmatprep.subr.mxu1 %v6738_v6  ;;  %s8520_s3 = sld [smem:[#allocation9_spill]]  ;;  %vm6739_vm2 = vmmov 0   ;;  %vm259_vm3 = vcmask 64512   ;;  %vm334_vm4 = vcmask 31744   ;;  %s6740_s7 = smov 112   ;;  %vm509_vm5 = vcmask 125952  }
  0x19   :  { %6140 = vmatprep.subr.mxu0 %v92_v3  ;;  %6149 = vmatprep.mubr.msk.f32.mxu1 %vm6739_vm2, %v6738_v6  ;;  %s8521_s0 = sld [smem:[#allocation13_spill]]  ;;  %v6936_v17 = vshrl.u32 %v429_v16, 7  ;;  %s6741_s12 = smov 120   ;;  %v6742_v40 = vmov 1966171168  }
  0x1a   :  { %6141 = vmatpush3.msra.mxu0 %v92_v3  ;;  %s8522_s2 = sld [smem:[#allocation16_spill]]  ;;  %v427_v41 = vunpack.c.l.s4 %v6742_v40 }
  0x1b   :  { %6142 = vmatprep.subr.mxu0 %v91_v4  ;;  %v6944_v19 = vsub.s32 1, %v6936_v17  ;;  %v6947_v20 = vsub.s32 2, %v6936_v17  ;;  %v6954_v23 = vsub.s32 3, %v6936_v17  ;;  %v6959_v25 = vsub.s32 5, %v6936_v17  ;;  %s8523_s8 = sld [smem:[#allocation10_spill]] }
  0x1c   :  { %6143 = vmatpush3.msra.mxu0 %v91_v4  ;;  %v6964_v27 = vsub.s32 0, %v6936_v17  ;;  %v6969_v29 = vsub.s32 4, %v6936_v17  ;;  %v428_v42 = vunpack.c.0.s8 %v427_v41  ;;  %s8524_s30 = sld [smem:[#allocation11_spill]] }
  0x1d   :  { %6145 = vmatmul.mubr.msk.f32.vlgmr.msra.gmra.mxu0 %vm102_vm1, %v90_v5  ;;  %6172 = vmatprep.subr.mxu0 %v6738_v6  ;;  %v5856_v7 = vld [vmem:[%s8519_s5] ss:$0 sm:$0xff]  ;;  %s8525_s10 = sld [smem:[#allocation14_spill]] }
  0x1e   :  { %v258_v13 = vld [vmem:[%s8520_s3] sm:$0xff]  ;;  %6174 = vmatprep.mubr.msk.f32.mxu0 %vm6739_vm2, %v6738_v6  ;;  %v6992_v44 = vsub.s32 %v428_v42, %v6936_v17  ;;  %s8526_s29 = sld [smem:[#allocation15_spill]] }
  0x1f   :  { %6148 = vmatpush3.msra.mxu1 %v258_v13  ;;  %v333_v15 = vld [vmem:[%s8521_s0] sm:$0xf]  ;;  %s8529_s0 = sld [smem:[#allocation18_spill]] }
  0x20   :  { %6152 = vmatprep.subr.msk.mxu1 %vm109_vm0, %v333_v15  ;;  %v6941_v18 = vld [vmem:[%s8522_s2] sm:$0xff] }
  0x21   :  { %v1037_v21 = vrot.slane %v6941_v18, %v6944_v19  ;;  %v1044_v22 = vrot.slane %v6941_v18, %v6947_v20  ;;  %v1051_v24 = vrot.slane %v6941_v18, %v6954_v23  ;;  %v1065_v26 = vrot.slane %v6941_v18, %v6959_v25 }
  0x22   :  { %v1030_v28 = vrot.slane %v6941_v18, %v6964_v27  ;;  %v1058_v30 = vrot.slane %v6941_v18, %v6969_v29 }
  0x23   :  { %1039 = vbcast.lane.b32.xlu1 %v1037_v21, 256 }
  0x27   :  { %1046 = vbcast.lane.b32.xlu1 %v1044_v22, 256 }
  0x2b   :  { %1053 = vbcast.lane.b32.xlu1 %v1051_v24, 256 }
  0x2f   :  { %1067 = vbcast.lane.b32.xlu1 %v1065_v26, 256 }
  0x95   :  { %v6989_v43 = vpop.permute.xlu1 %1039 }
  0x99   :  { %v6994_v45 = vpop.permute.xlu1 %1046 }
  0x9d   :  { %v6998_v50 = vpop.permute.xlu1 %1053 }
  0xa1   :  { %v7009_v60 = vpop.permute.xlu1 %1067 }
  0xdd   :  { %v6146_v8 = vpop.f32.mrf.mxu0 }
  0xde   :  { %v185_v9 = vadd.f32 %v6146_v8, %v5856_v7 }
  0xdf   :  { %v179_v10 = vpop.f32.mrf.mxu0 }
  0xe0   :  { %v6917_v11 = vmax.f32 %v185_v9, 0.0  ;;  %v180_v12 = vadd.f32 %v5856_v7, %v179_v10 }
  0xe2   :  { %222 = vxpose.xlu0.b32.start.end [1/1] (short) (narrow) %v6917_v11, 8  ;;  %6173 = vmatpush3.msra.mxu0 %v6917_v11  ;;  %v6926_v14 = vmax.f32 %v180_v12, 0.0 }
  0xe6   :  { %190 = vxpose.xlu0.b32.start.end [1/1] (short) (narrow) %v6926_v14, 8 }
 0x10f   :  { %1032 = vbcast.lane.b32.xlu0 %v1030_v28, 256 }
 0x113   :  { %1060 = vbcast.lane.b32.xlu0 %v1058_v30, 256 }
 0x15e   :  { %v238_v31 = vpop.trf.xlu0 }
 0x15f   :  { %v255_v32 = vrot.slane %v238_v31, 4 }
 0x162   :  { %v206_v33 = vpop.trf.xlu0 }
 0x163   :  { %v6974_v34 = vsel %vm109_vm0, %v206_v33, %v255_v32 }
 0x164   :  { %6150 = vmatmul.mubr.msk.f32.vlgmr.msra.gmra.mxu1 %vm259_vm3, %v6974_v34 }
 0x165   :  { %6154 = vmatprep.mubr.msk.f32.mxu1 %vm334_vm4, %v6926_v14  ;;  %6153 = vmatpush3.msk.msra.mxu1 %vm109_vm0, %v333_v15 }
 0x166   :  { %6157 = vmatprep.subr.mxu1 %v6738_v6 }
 0x168   :  { %6155 = vmatmul.mubr.msk.f32.vlgmr.msra.gmra.mxu1 %vm334_vm4, %v6917_v11 }
 0x169   :  { %6158 = vmatpush3.msk.msra.mxu1 %vm109_vm0, %v6974_v34  ;;  %6159 = vmatprep.mubr.msk.f32.mxu1 %vm6739_vm2, %v6738_v6 }
 0x16a   :  { %6162 = vmatprep.subr.mxu1 %v6738_v6 }
 0x181   :  { %v7000_v51 = vpop.permute.xlu0 %1032 }
 0x185   :  { %v7018_v2 = vpop.permute.xlu0 %1060 }
 0x224   :  { %v329_v35 = vpop.f32.mrf.mxu1 }
 0x225   :  { %470 = vrot.lane.b32.xlu1 %v329_v35, %s6740_s7  ;;  %v1562_v36 = vrot.slane %v329_v35, 4  ;;  %v432_v46 = vrot.slane %v329_v35, %v6992_v44  ;;  %v1517_v47 = vcombine.high %v329_v35, %v329_v35  ;;  %v7044_v35 = vld [vmem:[%s8523_s8] ss:$0 sm:$0xff]  ;;  %s8528_s8 = sld [smem:[#allocation17_spill]] }
 0x226   :  { %v6151_v37 = vpop.f32.mrf.mxu1 }
 0x227   :  { %1563 = vrot.lane.b32.xlu0 %v1562_v36, %s6740_s7  ;;  %v433_v48 = vcombine.high %v432_v46, %v432_v46  ;;  %v1524_v49 = vrot.slane %v1517_v47, %v6992_v44  ;;  %v440_v52 = vrot.slane %v432_v46, %v6992_v44 }
 0x228   :  { %v6156_v38 = vpop.f32.mrf.mxu1 }
 0x229   :  { %1981 = vrot.lane.b32.xlu1 %v6156_v38, %s6741_s12  ;;  %v447_v53 = vrot.slane %v433_v48, %v6992_v44  ;;  %v1892_v54 = vcombine.high %v6156_v38, %v6156_v38  ;;  %v1525_v55 = vcombine.high %v1524_v49, %v1524_v49  ;;  %v7006_v57 = vrot.slane %v1524_v49, %v6992_v44 }
 0x22a   :  { %v410_v39 = vpop.f32.mrf.mxu1  ;;  %v1899_v58 = vrot.slane %v6156_v38, %v6992_v44  ;;  %v448_v61 = vcombine.high %v440_v52, %v440_v52  ;;  %v453_v3 = vrot.slane %v440_v52, %v6964_v27 }
 0x22b   :  { %v857_v56 = vrot.slane %v410_v39, %v6992_v44  ;;  %v850_v59 = vcombine.high %v410_v39, %v410_v39  ;;  %v449_v62 = vcombine.high %v447_v53, %v447_v53  ;;  %v1906_v63 = vrot.slane %v1892_v54, %v6992_v44 }
 0x22c   :  { %v7013_v0 = vrot.slane %v1525_v55, %v6992_v44  ;;  %v1540_v4 = vcombine.high %v7006_v57, %v7006_v57  ;;  %v1907_v5 = vcombine.high %v1899_v58, %v1899_v58  ;;  %v7024_v7 = vrot.slane %v1899_v58, %v6992_v44 }
 0x22d   :  { %939 = vrot.lane.b32.xlu1 %v410_v39, %s6741_s12  ;;  %v7016_v1 = vrot.slane %v857_v56, %v6992_v44  ;;  %v7027_v8 = vrot.slane %v850_v59, %v6992_v44  ;;  %v865_v9 = vcombine.high %v857_v56, %v857_v56  ;;  %v1908_v10 = vcombine.high %v1906_v63, %v1906_v63  ;;  %s8527_s12 = sld [smem:[#allocation12_spill]] }
 0x22e   :  { %v457_v12 = vrot.slane %v447_v53, %v6964_v27  ;;  %v461_v13 = vrot.slane %v448_v61, %v6964_v27  ;;  %v465_v15 = vrot.slane %v449_v62, %v6964_v27  ;;  %v7033_v21 = vrot.slane %v1906_v63, %v6992_v44 }
 0x22f   :  { %v895_v22 = vcombine.high %v7016_v1, %v7016_v1  ;;  %v1545_v26 = vrot.slane %v7006_v57, %v6964_v27  ;;  %v1549_v28 = vrot.slane %v7013_v0, %v6964_v27  ;;  %v7047_v36 = vrot.slane %v1907_v5, %v6992_v44  ;;  %v7079_v57 = vld [vmem:[%s8524_s30] ss:$0 sm:$0xff] }
 0x230   :  { %v1944_v37 = vrot.slane %v7024_v7, %v6964_v27  ;;  %v866_v38 = vcombine.high %v7027_v8, %v7027_v8  ;;  %v7055_v39 = vrot.slane %v7027_v8, %v6992_v44  ;;  %v7060_v41 = vrot.slane %v1908_v10, %v6992_v44 }
 0x231   :  { %v7063_v42 = vrot.slane %v865_v9, %v6992_v44  ;;  %v902_v55 = vrot.slane %v7016_v1, %v6964_v27  ;;  %v910_v56 = vrot.slane %v895_v22, %v6964_v27 }
 0x233   :  { %v906_v22 = vrot.slane %v7063_v42, %v6964_v27 }
 0x297   :  { %v471_v24 = vpop.permute.xlu1 %470 }
 0x298   :  { %v473_v30 = vadd.f32 %v471_v24, %v453_v3  ;;  %v474_v31 = vadd.f32 %v471_v24, %v457_v12  ;;  %v475_v32 = vadd.f32 %v471_v24, %v461_v13  ;;  %v476_v33 = vadd.f32 %v471_v24, %v465_v15 }
 0x299   :  { %v7057_v40 = vpop.permute.xlu0 %1563  ;;  %v1553_v24 = vrot.slane %v1540_v4, %v6964_v27 }
 0x29a   :  { %v1566_v46 = vadd.f32 %v7057_v40, %v1545_v26  ;;  %v1567_v47 = vadd.f32 %v7057_v40, %v1549_v28  ;;  %v485_v49 = vadd.f32 %v7044_v35, %v475_v32  ;;  %v483_v52 = vadd.f32 %v7044_v35, %v473_v30 }
 0x29b   :  { %v7067_v48 = vpop.permute.xlu1 %1981  ;;  %v484_v53 = vadd.f32 %v7044_v35, %v474_v31  ;;  %v486_v54 = vadd.f32 %v7044_v35, %v476_v33 }
 0x29c   :  { %v1570_v58 = vadd.f32 %v7044_v35, %v1566_v46  ;;  %v1571_v59 = vadd.f32 %v7044_v35, %v1567_v47  ;;  %vm489_vm6 = vcmp.ge.f32.partialorder %v485_v49, 0.0  ;;  %v493_v61 = vmul.f32 0.2, %v485_v49  ;;  %v7098_v46 = vld [vmem:[%s8525_s10] ss:$0 sm:$0xff] }
 0x29d   :  { %vm487_vm7 = vcmp.ge.f32.partialorder %v483_v52, 0.0  ;;  %v491_v62 = vmul.f32 0.2, %v483_v52  ;;  %vm488_vm8 = vcmp.ge.f32.partialorder %v484_v53, 0.0  ;;  %v492_v63 = vmul.f32 0.2, %v484_v53 }
 0x29e   :  { %vm1574_vm9 = vcmp.ge.f32.partialorder %v1570_v58, 0.0  ;;  %v1578_v3 = vmul.f32 0.2, %v1570_v58  ;;  %v497_v5 = vsel %vm489_vm6, %v485_v49, %v493_v61  ;;  %vm490_vm10 = vcmp.ge.f32.partialorder %v486_v54, 0.0 }
 0x29f   :  { %v7083_v1 = vpop.permute.xlu1 %939  ;;  %v495_v8 = vsel %vm487_vm7, %v483_v52, %v491_v62  ;;  %v494_v9 = vmul.f32 0.2, %v486_v54  ;;  %v507_v10 = vmul.f32 %v7079_v57, %v497_v5  ;;  %v496_v13 = vsel %vm488_vm8, %v484_v53, %v492_v63 }
 0x2a0   :  { %v505_v12 = vmul.f32 %v7079_v57, %v495_v8  ;;  %v1582_v15 = vsel %vm1574_vm9, %v1570_v58, %v1578_v3  ;;  %v506_v26 = vmul.f32 %v7079_v57, %v496_v13  ;;  %v944_v28 = vadd.f32 %v7083_v1, %v910_v56 }
 0x2a1   :  { %v516_v30 = vsel %vm509_vm5, %v507_v10, 0.0  ;;  %v1586_v32 = vmul.f32 %v7079_v57, %v1582_v15  ;;  %v498_v33 = vsel %vm490_vm10, %v486_v54, %v494_v9  ;;  %v1938_v47 = vcombine.high %v7033_v21, %v7033_v21  ;;  %v7121_v10 = vld [vmem:[%s8526_s29] ss:$0 sm:$0xff] }
 0x2a2   :  { %v510_v31 = vsel %vm509_vm5, %v505_v12, 0.0  ;;  %517 = vadd.xlane.f32.xlu0 %v516_v30  ;;  %v958_v4 = vadd.f32 %v7098_v46, %v944_v28  ;;  %vm1575_vm11 = vcmp.ge.f32.partialorder %v1571_v59, 0.0  ;;  %v1579_v49 = vmul.f32 0.2, %v1571_v59 }
 0x2a3   :  { %511 = vadd.xlane.f32.xlu1 %v510_v31  ;;  %v1939_v52 = vcombine.high %v7047_v36, %v7047_v36  ;;  %v1568_v53 = vadd.f32 %v7057_v40, %v1553_v24  ;;  %v942_v54 = vadd.f32 %v7083_v1, %v902_v55  ;;  %v943_v56 = vadd.f32 %v7083_v1, %v906_v22 }
 0x2a4   :  { %v513_v58 = vsel %vm509_vm5, %v506_v26, 0.0  ;;  %v508_v61 = vmul.f32 %v7079_v57, %v498_v33  ;;  %vm966_vm12 = vcmp.ge.f32.partialorder %v958_v4, 0.0  ;;  %v974_v62 = vmul.f32 0.2, %v958_v4 }
 0x2a5   :  { %v1590_v63 = vsel %vm509_vm5, %v1586_v32, 0.0  ;;  %v1583_v3 = vsel %vm1575_vm11, %v1571_v59, %v1579_v49  ;;  %v956_v5 = vadd.f32 %v7098_v46, %v942_v54  ;;  %v957_v8 = vadd.f32 %v7098_v46, %v943_v56 }
 0x2a6   :  { %v7114_v9 = vrot.slane %v866_v38, %v6992_v44  ;;  %v897_v55 = vcombine.high %v7063_v42, %v7063_v42  ;;  %1591 = vadd.xlane.f32.xlu0 %v1590_v63  ;;  %v982_v12 = vsel %vm966_vm12, %v958_v4, %v974_v62  ;;  %v1572_v15 = vadd.f32 %v7044_v35, %v1568_v53 }
 0x2a7   :  { %514 = vadd.xlane.f32.xlu1 %v513_v58  ;;  %v996_v59 = vmul.f32 %v7121_v10, %v982_v12  ;;  %vm964_vm13 = vcmp.ge.f32.partialorder %v956_v5, 0.0  ;;  %v972_v13 = vmul.f32 0.2, %v956_v5  ;;  %v1940_v38 = vcombine.high %v7060_v41, %v7060_v41 }
 0x2a8   :  { %v1956_v22 = vrot.slane %v1939_v52, %v6964_v27  ;;  %v1960_v42 = vrot.slane %v7033_v21, %v6964_v27  ;;  %v1587_v24 = vmul.f32 %v7079_v57, %v1583_v3  ;;  %v1964_v26 = vrot.slane %v7060_v41, %v6964_v27 }
 0x2a9   :  { %v519_v28 = vsel %vm509_vm5, %v508_v61, 0.0  ;;  %v1008_v30 = vsel %vm259_vm3, %v996_v59, 0.0  ;;  %v973_v31 = vmul.f32 0.2, %v957_v8  ;;  %v1968_v32 = vrot.slane %v1938_v47, %v6964_v27 }
 0x2aa   :  { %v896_v33 = vcombine.high %v7055_v39, %v7055_v39  ;;  %1009 = vadd.xlane.f32.xlu0 %v1008_v30  ;;  %v980_v4 = vsel %vm964_vm13, %v956_v5, %v972_v13  ;;  %vm965_vm14 = vcmp.ge.f32.partialorder %v957_v8, 0.0  ;;  %v898_v21 = vcombine.high %v7114_v9, %v7114_v9 }
 0x2ab   :  { %520 = vadd.xlane.f32.xlu1 %v519_v28  ;;  %v914_v49 = vrot.slane %v897_v55, %v6964_v27  ;;  %v918_v41 = vrot.slane %v7055_v39, %v6964_v27  ;;  %vm1576_vm15 = vcmp.ge.f32.partialorder %v1572_v15, 0.0  ;;  %v1593_v52 = vsel %vm509_vm5, %v1587_v24, 0.0 }
 0x2ac   :  { %v1580_v53 = vmul.f32 0.2, %v1572_v15  ;;  %v1987_v47 = vadd.f32 %v7067_v48, %v1956_v22  ;;  %v1988_v54 = vadd.f32 %v7067_v48, %v1960_v42  ;;  %v994_v56 = vmul.f32 %v7121_v10, %v980_v4 }
 0x2ad   :  { %v981_v58 = vsel %vm965_vm14, %v957_v8, %v973_v31  ;;  %v1989_v61 = vadd.f32 %v7067_v48, %v1964_v26  ;;  %v1990_v62 = vadd.f32 %v7067_v48, %v1968_v32  ;;  %v922_v63 = vrot.slane %v7114_v9, %v6964_v27 }
 0x2ae   :  { %v926_v39 = vrot.slane %v896_v33, %v6964_v27  ;;  %v1995_v3 = vadd.f32 %v7098_v46, %v1987_v47  ;;  %v1972_v5 = vrot.slane %v1940_v38, %v6964_v27  ;;  %v1996_v55 = vadd.f32 %v7098_v46, %v1988_v54 }
 0x2af   :  { %1594 = vadd.xlane.f32.xlu1 %v1593_v52  ;;  %v1997_v12 = vadd.f32 %v7098_v46, %v1989_v61  ;;  %v1998_v8 = vadd.f32 %v7098_v46, %v1990_v62  ;;  %v945_v59 = vadd.f32 %v7083_v1, %v914_v49  ;;  %v995_v13 = vmul.f32 %v7121_v10, %v981_v58 }
 0x2b0   :  { %v1584_v22 = vsel %vm1576_vm15, %v1572_v15, %v1580_v53  ;;  %vm2003_vm1 = vcmp.ge.f32.partialorder %v1995_v3, 0.0  ;;  %v2011_v9 = vmul.f32 0.2, %v1995_v3  ;;  %v1002_v42 = vsel %vm259_vm3, %v994_v56, 0.0 }
 0x2b1   :  { %vm2004_vm6 = vcmp.ge.f32.partialorder %v1996_v55, 0.0  ;;  %v2012_v24 = vmul.f32 0.2, %v1996_v55  ;;  %vm2005_vm7 = vcmp.ge.f32.partialorder %v1997_v12, 0.0  ;;  %v2013_v26 = vmul.f32 0.2, %v1997_v12 }
 0x2b2   :  { %v2019_v38 = vsel %vm2003_vm1, %v1995_v3, %v2011_v9  ;;  %vm2006_vm8 = vcmp.ge.f32.partialorder %v1998_v8, 0.0  ;;  %v2014_v28 = vmul.f32 0.2, %v1998_v8  ;;  %v1588_v30 = vmul.f32 %v7079_v57, %v1584_v22 }
 0x2b3   :  { %1003 = vadd.xlane.f32.xlu1 %v1002_v42  ;;  %v7163_v31 = vmul.f32 %v7121_v10, %v2019_v38  ;;  %v2020_v32 = vsel %vm2004_vm6, %v1996_v55, %v2012_v24  ;;  %v959_v15 = vadd.f32 %v7098_v46, %v945_v59  ;;  %v2021_v4 = vsel %vm2005_vm7, %v1997_v12, %v2013_v26 }
 0x2b4   :  { %v7167_v33 = vmul.f32 %v7121_v10, %v2020_v32  ;;  %v2022_v49 = vsel %vm2006_vm8, %v1998_v8, %v2014_v28  ;;  %v1991_v52 = vadd.f32 %v7067_v48, %v1972_v5  ;;  %v1005_v53 = vsel %vm259_vm3, %v995_v13, 0.0 }
 0x2b5   :  { %v7172_v47 = vmul.f32 %v7121_v10, %v2021_v4  ;;  %v7175_v54 = vmul.f32 %v7121_v10, %v2022_v49  ;;  %vm967_vm9 = vcmp.ge.f32.partialorder %v959_v15, 0.0  ;;  %v7178_v56 = vsub.s32 6, %v6936_v17 }
 0x2b6   :  { %v975_v58 = vmul.f32 0.2, %v959_v15  ;;  %v1999_v61 = vadd.f32 %v7098_v46, %v1991_v52  ;;  %v946_v62 = vadd.f32 %v7083_v1, %v918_v41  ;;  %v1596_v3 = vsel %vm509_vm5, %v1588_v30, 0.0 }
 0x2b7   :  { %1006 = vadd.xlane.f32.xlu1 %v1005_v53  ;;  %v947_v5 = vadd.f32 %v7083_v1, %v922_v63  ;;  %v948_v55 = vadd.f32 %v7083_v1, %v926_v39  ;;  %v930_v12 = vrot.slane %v898_v21, %v6964_v27  ;;  %v1072_v63 = vrot.slane %v6941_v18, %v7178_v56 }
 0x2b8   :  { %v983_v8 = vsel %vm967_vm9, %v959_v15, %v975_v58  ;;  %vm2007_vm10 = vcmp.ge.f32.partialorder %v1999_v61, 0.0  ;;  %v2015_v59 = vmul.f32 0.2, %v1999_v61  ;;  %v960_v13 = vadd.f32 %v7098_v46, %v946_v62 }
 0x2b9   :  { %v7188_v22 = vmul.f32 %v7121_v10, %v983_v8  ;;  %v961_v9 = vadd.f32 %v7098_v46, %v947_v5  ;;  %v962_v41 = vadd.f32 %v7098_v46, %v948_v55  ;;  %v949_v42 = vadd.f32 %v7083_v1, %v930_v12 }
 0x2ba   :  { %v2023_v39 = vsel %vm2007_vm10, %v1999_v61, %v2015_v59  ;;  %vm968_vm11 = vcmp.ge.f32.partialorder %v960_v13, 0.0  ;;  %v976_v21 = vmul.f32 0.2, %v960_v13  ;;  %v1984_v26 = vadd.f32 %v7067_v48, %v1944_v37 }
 0x2bb   :  { %1597 = vadd.xlane.f32.xlu1 %v1596_v3  ;;  %v7196_v24 = vmul.f32 %v7121_v10, %v2023_v39  ;;  %vm969_vm12 = vcmp.ge.f32.partialorder %v961_v9, 0.0  ;;  %v977_v38 = vmul.f32 0.2, %v961_v9  ;;  %vm970_vm13 = vcmp.ge.f32.partialorder %v962_v41, 0.0 }
 0x2bc   :  { %v984_v28 = vsel %vm968_vm11, %v960_v13, %v976_v21  ;;  %v978_v1 = vmul.f32 0.2, %v962_v41  ;;  %v963_v30 = vadd.f32 %v7098_v46, %v949_v42  ;;  %v6743_v53 = vmov 0   ;;  %v421_v13 = vld [vmem:[%s8527_s12] sm:$0xf] }
 0x2bd   :  { %v7204_v32 = vmul.f32 %v7121_v10, %v984_v28  ;;  %v985_v15 = vsel %vm969_vm12, %v961_v9, %v977_v38  ;;  %6498 = vset.pattern.permute.xlu0 %v6743_v53  ;;  %6499 = vset.pattern.permute.xlu1 %v6743_v53  ;;  %v1992_v58 = vadd.f32 %v7098_v46, %v1984_v26  ;;  %v7215_v5 = vsub.s32 7, %v6936_v17 }
 0x2be   :  { %v7207_v4 = vmul.f32 %v7121_v10, %v985_v15  ;;  %v986_v49 = vsel %vm970_vm13, %v962_v41, %v978_v1  ;;  %vm971_vm14 = vcmp.ge.f32.partialorder %v963_v30, 0.0  ;;  %v979_v52 = vmul.f32 0.2, %v963_v30 }
 0x2bf   :  { %v7210_v37 = vmul.f32 %v7121_v10, %v986_v49  ;;  %vm2000_vm15 = vcmp.ge.f32.partialorder %v1992_v58, 0.0  ;;  %v2008_v3 = vmul.f32 0.2, %v1992_v58  ;;  %v1541_v8 = vcombine.high %v7013_v0, %v7013_v0 }
 0x2c0   :  { %1074 = vbcast.lane.b32.xlu0 %v1072_v63, 256  ;;  %v987_v61 = vsel %vm971_vm14, %v963_v30, %v979_v52  ;;  %v1079_v59 = vrot.slane %v6941_v18, %v7215_v5  ;;  %v526_v42 = vrot.slane %v421_v13, %v6964_v27  ;;  %v1937_v63 = vcombine.high %v7024_v7, %v7024_v7 }
 0x2c1   :  { %v1001_v62 = vmul.f32 %v7121_v10, %v987_v61  ;;  %v2016_v55 = vsel %vm2000_vm15, %v1992_v58, %v2008_v3  ;;  %v1557_v9 = vrot.slane %v1541_v8, %v6964_v27  ;;  %v1948_v0 = vrot.slane %v7047_v36, %v6964_v27 }
 0x2c2   :  { %v7218_v12 = vmul.f32 %v7121_v10, %v2016_v55  ;;  %v533_v18 = vrot.slane %v421_v13, %v6944_v19  ;;  %v1952_v38 = vrot.slane %v1937_v63, %v6964_v27  ;;  %v2047_v55 = vsel %vm259_vm3, %v7172_v47, 0.0 }
 0x2c3   :  { %v1569_v41 = vadd.f32 %v7057_v40, %v1557_v9  ;;  %v1985_v21 = vadd.f32 %v7067_v48, %v1948_v0  ;;  %v540_v40 = vrot.slane %v421_v13, %v6947_v20  ;;  %v2050_v8 = vsel %vm259_vm3, %v7175_v54, 0.0 }
 0x2c4   :  { %v1986_v7 = vadd.f32 %v7067_v48, %v1952_v38  ;;  %v1020_v47 = vsel %vm259_vm3, %v7210_v37, 0.0  ;;  %v1023_v54 = vsel %vm259_vm3, %v1001_v62, 0.0  ;;  %v2032_v37 = vsel %vm259_vm3, %v7218_v12, 0.0 }
 0x2c5   :  { %v1573_v39 = vadd.f32 %v7044_v35, %v1569_v41  ;;  %v1993_v28 = vadd.f32 %v7098_v46, %v1985_v21  ;;  %vm593_vm8 = vcmask 1041409   ;;  %vm597_vm9 = vcmask 1043459  }
 0x2c6   :  { %v1994_v30 = vadd.f32 %v7098_v46, %v1986_v7  ;;  %v2044_v46 = vsel %vm259_vm3, %v7167_v33, 0.0  ;;  %v1017_v33 = vsel %vm259_vm3, %v7207_v4, 0.0  ;;  %vm1166_vm10 = vcmask 1044484  }
 0x2c7   :  { %v1581_v26 = vmul.f32 0.2, %v1573_v39  ;;  %vm1577_vm1 = vcmp.ge.f32.partialorder %v1573_v39, 0.0  ;;  %v2009_v1 = vmul.f32 0.2, %v1993_v28  ;;  %vm2001_vm6 = vcmp.ge.f32.partialorder %v1993_v28, 0.0 }
 0x2c8   :  { %v2010_v49 = vmul.f32 0.2, %v1994_v30  ;;  %vm2002_vm7 = vcmp.ge.f32.partialorder %v1994_v30, 0.0  ;;  %vm1168_vm11 = vcmask 1045509   ;;  %vm1170_vm12 = vcmask 1046534  }
 0x2c9   :  { %v1585_v36 = vsel %vm1577_vm1, %v1573_v39, %v1581_v26  ;;  %v2017_v15 = vsel %vm2001_vm6, %v1993_v28, %v2009_v1  ;;  %vm1172_vm13 = vcmask 1047559   ;;  %vm600_vm14 = vcmask 27648  }
 0x2ca   :  { %v1589_v35 = vmul.f32 %v7079_v57, %v1585_v36  ;;  %v2025_v53 = vmul.f32 %v7121_v10, %v2017_v15  ;;  %v2018_v58 = vsel %vm2002_vm7, %v1994_v30, %v2010_v49  ;;  %v2041_v57 = vsel %vm259_vm3, %v7163_v31, 0.0 }
 0x2cb   :  { %v2026_v61 = vmul.f32 %v7121_v10, %v2018_v58  ;;  %v1011_v10 = vsel %vm259_vm3, %v7188_v22, 0.0  ;;  %v1014_v31 = vsel %vm259_vm3, %v7204_v32, 0.0  ;;  %v547_v22 = vrot.slane %v421_v13, %v6954_v23 }
 0x2cc   :  { %1081 = vbcast.lane.b32.xlu1 %v1079_v59, 256  ;;  %v1599_v52 = vsel %vm509_vm5, %v1589_v35, 0.0  ;;  %v2035_v48 = vsel %vm259_vm3, %v2025_v53, 0.0  ;;  %v2053_v59 = vsel %vm259_vm3, %v7196_v24, 0.0  ;;  %vm595_vm5 = vcmask 1042434  }
 0x2cd   :  { %v2038_v3 = vsel %vm259_vm3, %v2026_v61, 0.0 }
 0x2d0   :  { %528 = vbcast.lane.b32.xlu1 %v526_v42, 256 }
 0x2d4   :  { %535 = vbcast.lane.b32.xlu1 %v533_v18, 256 }
 0x2d8   :  { %542 = vbcast.lane.b32.xlu1 %v540_v40, 256 }
 0x2df   :  { %1600 = vadd.xlane.f32.xlu0 %v1599_v52 }
 0x2e3   :  { %2036 = vadd.xlane.f32.xlu0 %v2035_v48 }
 0x2e7   :  { %2039 = vadd.xlane.f32.xlu0 %v2038_v3 }
 0x2eb   :  { %2042 = vadd.xlane.f32.xlu0 %v2041_v57 }
 0x2ef   :  { %2045 = vadd.xlane.f32.xlu0 %v2044_v46 }
 0x2f3   :  { %2048 = vadd.xlane.f32.xlu0 %v2047_v55 }
 0x2f7   :  { %2051 = vadd.xlane.f32.xlu0 %v2050_v8 }
 0x2fb   :  { %2054 = vadd.xlane.f32.xlu0 %v2053_v59 }
 0x2fc   :  { %1012 = vadd.xlane.f32.xlu1 %v1011_v10 }
 0x300   :  { %1015 = vadd.xlane.f32.xlu1 %v1014_v31 }
 0x304   :  { %1018 = vadd.xlane.f32.xlu1 %v1017_v33 }
 0x308   :  { %1021 = vadd.xlane.f32.xlu1 %v1020_v47 }
 0x30c   :  { %1024 = vadd.xlane.f32.xlu1 %v1023_v54 }
 0x31d   :  { %549 = vbcast.lane.b32.xlu1 %v547_v22, 256 }
 0x32b   :  { %v518_v18 = vpop.xlane.xlu0 %517 }
 0x32c   :  { %v512_v24 = vpop.xlane.xlu1 %511 }
 0x32f   :  { %v1592_v39 = vpop.xlane.xlu0 %1591 }
 0x330   :  { %v515_v9 = vpop.xlane.xlu1 %514 }
 0x333   :  { %v1010_v28 = vpop.xlane.xlu0 %1009 }
 0x334   :  { %v521_v41 = vpop.xlane.xlu1 %520  ;;  %v7285_v12 = vadd.f32 %v6994_v45, %v1010_v28 }
 0x337   :  { %v1075_v7 = vpop.permute.xlu0 %1074 }
 0x338   :  { %v1595_v42 = vpop.xlane.xlu1 %1594 }
 0x33c   :  { %v1004_v32 = vpop.xlane.xlu1 %1003 }
 0x33d   :  { %v7269_v63 = vadd.f32 %v7000_v51, %v1004_v32 }
 0x33f   :  { %1108 = vperm.xlu0 %6498, %v7269_v63  }
 0x340   :  { %v1007_v4 = vpop.xlane.xlu1 %1006 }
 0x341   :  { %2033 = vadd.xlane.f32.xlu1 %v2032_v37  ;;  %v7281_v26 = vadd.f32 %v6989_v43, %v1007_v4 }
 0x344   :  { %v1598_v62 = vpop.xlane.xlu1 %1597 }
 0x348   :  { %v1082_v0 = vpop.permute.xlu1 %1081 }
 0x34c   :  { %v529_v13 = vpop.permute.xlu1 %528 }
 0x34d   :  { %v7274_v21 = vadd.f32 %v529_v13, %v512_v24  ;;  %v7312_v33 = vadd.f32 %v1592_v39, %v529_v13 }
 0x350   :  { %v536_v38 = vpop.permute.xlu1 %535 }
 0x351   :  { %v7276_v40 = vadd.f32 %v536_v38, %v515_v9  ;;  %v7314_v47 = vadd.f32 %v1595_v42, %v536_v38  ;;  %v576_v38 = vand.u32 127, %v429_v16 }
 0x352   :  { %564 = vperm.xlu1 %6499, %v7274_v21  }
 0x353   :  { %567 = vperm.xlu0 %6498, %v7276_v40  }
 0x354   :  { %v543_v36 = vpop.permute.xlu1 %542 }
 0x355   :  { %v7306_v10 = vadd.f32 %v543_v36, %v518_v18  ;;  %v7318_v54 = vadd.f32 %v1598_v62, %v543_v36 }
 0x356   :  { %1111 = vperm.xlu1 %6499, %v7281_v26  }
 0x35a   :  { %1114 = vperm.xlu1 %6499, %v7285_v12  }
 0x368   :  { %v1601_v1 = vpop.xlane.xlu0 %1600 }
 0x36c   :  { %v2037_v52 = vpop.xlane.xlu0 %2036 }
 0x36d   :  { %v7325_v9 = vadd.f32 %v2037_v52, %v6989_v43 }
 0x370   :  { %v2040_v48 = vpop.xlane.xlu0 %2039 }
 0x374   :  { %v2043_v55 = vpop.xlane.xlu0 %2042 }
 0x375   :  { %v7329_v42 = vadd.f32 %v2043_v55, %v6998_v50 }
 0x378   :  { %v2046_v31 = vpop.xlane.xlu0 %2045 }
 0x37c   :  { %v2049_v24 = vpop.xlane.xlu0 %2048 }
 0x37d   :  { %v7333_v32 = vadd.f32 %v2049_v24, %v7009_v60 }
 0x385   :  { %v1013_v30 = vpop.xlane.xlu1 %1012 }
 0x386   :  { %v7289_v35 = vadd.f32 %v6998_v50, %v1013_v30  ;;  %v7344_v50 = vadd.f32 %v2040_v48, %v6994_v45  ;;  %v7356_v45 = vsub.s32 %v576_v38, %v6936_v17 }
 0x388   :  { %1117 = vperm.xlu1 %6499, %v7289_v35  }
 0x389   :  { %v1016_v15 = vpop.xlane.xlu1 %1015 }
 0x38a   :  { %v7293_v49 = vadd.f32 %v7018_v2, %v1016_v15 }
 0x38c   :  { %1120 = vperm.xlu1 %6499, %v7293_v49  }
 0x38d   :  { %v1019_v53 = vpop.xlane.xlu1 %1018 }
 0x38e   :  { %v7297_v58 = vadd.f32 %v7009_v60, %v1019_v53  ;;  %v7348_v60 = vadd.f32 %v2046_v31, %v7018_v2 }
 0x390   :  { %1123 = vperm.xlu1 %6499, %v7297_v58  }
 0x391   :  { %v1022_v61 = vpop.xlane.xlu1 %1021 }
 0x392   :  { %v7300_v3 = vadd.f32 %v1075_v7, %v1022_v61 }
 0x394   :  { %1126 = vperm.xlu1 %6499, %v7300_v3  }
 0x395   :  { %v1025_v57 = vpop.xlane.xlu1 %1024 }
 0x396   :  { %v7303_v46 = vadd.f32 %v1082_v0, %v1025_v57 }
 0x398   :  { %1129 = vperm.xlu1 %6499, %v7303_v46  }
 0x399   :  { %v550_v8 = vpop.permute.xlu1 %549 }
 0x39a   :  { %v7308_v59 = vadd.f32 %v550_v8, %v521_v41  ;;  %v7320_v22 = vadd.f32 %v1601_v1, %v550_v8  ;;  %v2052_v41 = vpop.xlane.xlu0 %2051 }
 0x39c   :  { %573 = vperm.xlu0 %6498, %v7308_v59   ;;  %570 = vperm.xlu1 %6499, %v7306_v10  }
 0x39e   :  { %v2055_v4 = vpop.xlane.xlu0 %2054 }
 0x39f   :  { %v7336_v37 = vadd.f32 %v2055_v4, %v1082_v0  ;;  %v7351_v0 = vadd.f32 %v2052_v41, %v1075_v7 }
 0x3a0   :  { %1614 = vperm.xlu0 %6498, %v7314_v47   ;;  %1611 = vperm.xlu1 %6499, %v7312_v33  }
 0x3a4   :  { %1617 = vperm.xlu1 %6499, %v7318_v54   ;;  %1620 = vperm.xlu0 %6498, %v7320_v22  }
 0x3a8   :  { %2076 = vperm.xlu0 %6498, %v7325_v9  }
 0x3ac   :  { %2082 = vperm.xlu0 %6498, %v7329_v42  }
 0x3b0   :  { %2088 = vperm.xlu0 %6498, %v7333_v32  }
 0x3b4   :  { %2094 = vperm.xlu0 %6498, %v7336_v37  }
 0x3ba   :  { %v1109_v36 = vpop.permute.xlu0 %1108 }
 0x3bb   :  { %v1134_v7 = vrot.slane %v1109_v36, %v7356_v45 }
 0x3ca   :  { %v2034_v43 = vpop.xlane.xlu1 %2033 }
 0x3cb   :  { %v7340_v62 = vadd.f32 %v2034_v43, %v7000_v51 }
 0x3cd   :  { %2073 = vperm.xlu1 %6499, %v7340_v62  }
 0x3ce   :  { %v565_v18 = vpop.permute.xlu1 %564  ;;  %v568_v57 = vpop.permute.xlu0 %567 }
 0x3cf   :  { %v580_v4 = vrot.slane %v565_v18, %v7356_v45  ;;  %v584_v43 = vrot.slane %v568_v57, %v7356_v45 }
 0x3d1   :  { %2079 = vperm.xlu1 %6499, %v7344_v50  }
 0x3d2   :  { %v1112_v13 = vpop.permute.xlu1 %1111 }
 0x3d3   :  { %v1138_v2 = vrot.slane %v1112_v13, %v7356_v45 }
 0x3d5   :  { %2085 = vperm.xlu1 %6499, %v7348_v60   ;;  %v1163_v53 = vsel %vm593_vm8, %v1138_v2, %v1134_v7  ;;  %v594_v2 = vsel %vm593_vm8, %v584_v43, %v580_v4 }
 0x3d6   :  { %v1115_v51 = vpop.permute.xlu1 %1114 }
 0x3d7   :  { %v1142_v30 = vrot.slane %v1115_v51, %v7356_v45 }
 0x3d9   :  { %2091 = vperm.xlu1 %6499, %v7351_v0   ;;  %v1164_v48 = vsel %vm595_vm5, %v1142_v30, %v1163_v53 }
 0x403   :  { %v1118_v39 = vpop.permute.xlu1 %1117 }
 0x404   :  { %v1146_v15 = vrot.slane %v1118_v39, %v7356_v45 }
 0x406   :  { %v1165_v55 = vsel %vm597_vm9, %v1146_v15, %v1164_v48 }
 0x407   :  { %v1121_v28 = vpop.permute.xlu1 %1120 }
 0x408   :  { %v1150_v52 = vrot.slane %v1121_v28, %v7356_v45 }
 0x40a   :  { %v1167_v8 = vsel %vm1166_vm10, %v1150_v52, %v1165_v55 }
 0x40b   :  { %v1124_v1 = vpop.permute.xlu1 %1123 }
 0x40c   :  { %v1154_v17 = vrot.slane %v1124_v1, %v7356_v45 }
 0x40e   :  { %v1169_v41 = vsel %vm1168_vm11, %v1154_v17, %v1167_v8 }
 0x40f   :  { %v1127_v16 = vpop.permute.xlu1 %1126 }
 0x410   :  { %v1158_v61 = vrot.slane %v1127_v16, %v7356_v45 }
 0x412   :  { %v1171_v13 = vsel %vm1170_vm12, %v1158_v61, %v1169_v41 }
 0x413   :  { %v1130_v31 = vpop.permute.xlu1 %1129 }
 0x414   :  { %v1162_v24 = vrot.slane %v1130_v31, %v7356_v45 }
 0x416   :  { %v1173_v51 = vsel %vm1172_vm13, %v1162_v24, %v1171_v13 }
 0x417   :  { %v571_v39 = vpop.permute.xlu1 %570  ;;  %v574_v38 = vpop.permute.xlu0 %573  ;;  %v1175_v28 = vsel %vm259_vm3, %v1173_v51, -inf }
 0x418   :  { %v588_v36 = vrot.slane %v571_v39, %v7356_v45  ;;  %v592_v1 = vrot.slane %v574_v38, %v7356_v45  ;;  %1176 = vmax.xlane.f32.xlu1 %v1175_v28 }
 0x41a   :  { %v596_v18 = vsel %vm595_vm5, %v588_v36, %v594_v2 }
 0x41b   :  { %v1612_v30 = vpop.permute.xlu1 %1611  ;;  %v1615_v7 = vpop.permute.xlu0 %1614  ;;  %v598_v15 = vsel %vm597_vm9, %v592_v1, %v596_v18 }
 0x41c   :  { %v601_v52 = vsel %vm600_vm14, %v598_v15, -inf  ;;  %v1625_v16 = vrot.slane %v1612_v30, %v7356_v45  ;;  %v1629_v53 = vrot.slane %v1615_v7, %v7356_v45 }
 0x41d   :  { %602 = vmax.xlane.f32.xlu0 %v601_v52 }
 0x41e   :  { %v1638_v55 = vsel %vm593_vm8, %v1629_v53, %v1625_v16 }
 0x41f   :  { %v1618_v17 = vpop.permute.xlu1 %1617  ;;  %v1621_v48 = vpop.permute.xlu0 %1620 }
 0x420   :  { %v1633_v61 = vrot.slane %v1618_v17, %v7356_v45  ;;  %v1637_v57 = vrot.slane %v1621_v48, %v7356_v45 }
 0x422   :  { %v1639_v8 = vsel %vm595_vm5, %v1633_v61, %v1638_v55 }
 0x423   :  { %v1640_v31 = vsel %vm597_vm9, %v1637_v57, %v1639_v8  ;;  %v2077_v41 = vpop.permute.xlu0 %2076 }
 0x424   :  { %v1642_v24 = vsel %vm600_vm14, %v1640_v31, -inf  ;;  %v2103_v51 = vrot.slane %v2077_v41, %v7356_v45 }
 0x425   :  { %1643 = vmax.xlane.f32.xlu0 %v1642_v24 }
 0x427   :  { %v2083_v4 = vpop.permute.xlu0 %2082 }
 0x428   :  { %v2111_v2 = vrot.slane %v2083_v4, %v7356_v45 }
 0x42b   :  { %v2089_v38 = vpop.permute.xlu0 %2088 }
 0x42c   :  { %v2119_v16 = vrot.slane %v2089_v38, %v7356_v45 }
 0x42f   :  { %v2095_v15 = vpop.permute.xlu0 %2094 }
 0x430   :  { %v2127_v48 = vrot.slane %v2095_v15, %v7356_v45 }
 0x448   :  { %v2074_v43 = vpop.permute.xlu1 %2073 }
 0x449   :  { %v2099_v13 = vrot.slane %v2074_v43, %v7356_v45 }
 0x44b   :  { %v2128_v36 = vsel %vm593_vm8, %v2103_v51, %v2099_v13 }
 0x44c   :  { %v2080_v39 = vpop.permute.xlu1 %2079 }
 0x44d   :  { %v2107_v28 = vrot.slane %v2080_v39, %v7356_v45 }
 0x44f   :  { %v2129_v1 = vsel %vm595_vm5, %v2107_v28, %v2128_v36 }
 0x450   :  { %v2086_v18 = vpop.permute.xlu1 %2085  ;;  %v2130_v7 = vsel %vm597_vm9, %v2111_v2, %v2129_v1 }
 0x451   :  { %v2115_v30 = vrot.slane %v2086_v18, %v7356_v45 }
 0x453   :  { %v2131_v52 = vsel %vm1166_vm10, %v2115_v30, %v2130_v7 }
 0x454   :  { %v2092_v53 = vpop.permute.xlu1 %2091  ;;  %v2132_v61 = vsel %vm1168_vm11, %v2119_v16, %v2131_v52 }
 0x455   :  { %v2123_v17 = vrot.slane %v2092_v53, %v7356_v45 }
 0x457   :  { %v2133_v57 = vsel %vm1170_vm12, %v2123_v17, %v2132_v61 }
 0x458   :  { %v2134_v55 = vsel %vm1172_vm13, %v2127_v48, %v2133_v57 }
 0x459   :  { %v2136_v8 = vsel %vm259_vm3, %v2134_v55, -inf }
 0x45a   :  { %2137 = vmax.xlane.f32.xlu1 %v2136_v8 }
 0x4a1   :  { %v1177_v31 = vpop.xlane.xlu1 %1176 }
 0x4a2   :  { %v1182_v4 = vrot.slane %v1177_v31, %v6964_v27  ;;  %v1194_v38 = vrot.slane %v1177_v31, %v6954_v23  ;;  %v1186_v1 = vrot.slane %v1177_v31, %v6944_v19  ;;  %v1202_v30 = vrot.slane %v1177_v31, %v6959_v25 }
 0x4a4   :  { %v1219_v28 = vsub.f32 %v7269_v63, %v1182_v4  ;;  %v1222_v7 = vsub.f32 %v7289_v35, %v1194_v38  ;;  %v1206_v63 = vrot.slane %v1177_v31, %v7178_v56  ;;  %v1224_v16 = vsub.f32 %v7297_v58, %v1202_v30 }
 0x4a5   :  { %v1210_v35 = vrot.slane %v1177_v31, %v7215_v5 }
 0x4a6   :  { %v603_v24 = vpop.xlane.xlu0 %602  ;;  %v1227_v15 = vmul.f32 1.442695, %v1219_v28  ;;  %v1233_v53 = vmul.f32 1.442695, %v1222_v7  ;;  %v1225_v61 = vsub.f32 %v7300_v3, %v1206_v63 }
 0x4a7   :  { %v608_v41 = vrot.slane %v603_v24, %v6964_v27  ;;  %v612_v43 = vrot.slane %v603_v24, %v6944_v19  ;;  %v616_v13 = vrot.slane %v603_v24, %v6947_v20  ;;  %v620_v58 = vrot.slane %v603_v24, %v6954_v23 }
 0x4a8   :  { %v1239_v4 = vmul.f32 1.442695, %v1225_v61 }
 0x4a9   :  { %v625_v51 = vsub.f32 %v7274_v21, %v608_v41  ;;  %v626_v39 = vsub.f32 %v7276_v40, %v612_v43  ;;  %v627_v2 = vsub.f32 %v7306_v10, %v616_v13  ;;  %v1190_v21 = vrot.slane %v1177_v31, %v6947_v20 }
 0x4aa   :  { %v1220_v40 = vsub.f32 %v7281_v26, %v1186_v1  ;;  %v1198_v10 = vrot.slane %v1177_v31, %v6969_v29  ;;  %v1237_v26 = vmul.f32 1.442695, %v1224_v16  ;;  %v1226_v41 = vsub.f32 %v7303_v46, %v1210_v35 }
 0x4ab   :  { %v629_v36 = vmul.f32 1.442695, %v625_v51  ;;  %v631_v18 = vmul.f32 1.442695, %v626_v39  ;;  %v633_v52 = vmul.f32 1.442695, %v627_v2  ;;  %v1221_v17 = vsub.f32 %v7285_v12, %v1190_v21 }
 0x4ac   :  { %v1229_v48 = vmul.f32 1.442695, %v1220_v40  ;;  %v1223_v57 = vsub.f32 %v7293_v49, %v1198_v10  ;;  %v628_v3 = vsub.f32 %v7308_v59, %v620_v58  ;;  %v1241_v46 = vmul.f32 1.442695, %v1226_v41 }
 0x4ad   :  { %6500 = vpow2.f32 %v629_v36  ;;  %v1231_v55 = vmul.f32 1.442695, %v1221_v17 }
 0x4ae   :  { %6502 = vpow2.f32 %v631_v18  ;;  %v1644_v8 = vpop.xlane.xlu0 %1643  ;;  %v1235_v31 = vmul.f32 1.442695, %v1223_v57  ;;  %v635_v38 = vmul.f32 1.442695, %v628_v3 }
 0x4af   :  { %6504 = vpow2.f32 %v1227_v15  ;;  %v1653_v12 = vrot.slane %v1644_v8, %v6944_v19  ;;  %v1649_v13 = vrot.slane %v1644_v8, %v6964_v27  ;;  %v1661_v24 = vrot.slane %v1644_v8, %v6954_v23 }
 0x4b0   :  { %6506 = vpow2.f32 %v633_v52  ;;  %v1657_v59 = vrot.slane %v1644_v8, %v6947_v20 }
 0x4b1   :  { %6508 = vpow2.f32 %v1233_v53  ;;  %v1667_v51 = vsub.f32 %v7314_v47, %v1653_v12  ;;  %v1666_v28 = vsub.f32 %v7312_v33, %v1649_v13  ;;  %v1669_v1 = vsub.f32 %v7320_v22, %v1661_v24 }
 0x4b2   :  { %6510 = vpow2.f32 %v1229_v48  ;;  %v1668_v47 = vsub.f32 %v7318_v54, %v1657_v59 }
 0x4b3   :  { %6512 = vpow2.f32 %v1237_v26  ;;  %v1672_v2 = vmul.f32 1.442695, %v1667_v51  ;;  %v1670_v30 = vmul.f32 1.442695, %v1666_v28  ;;  %v1676_v33 = vmul.f32 1.442695, %v1669_v1 }
 0x4b4   :  { %6514 = vpow2.f32 %v1231_v55  ;;  %v1674_v21 = vmul.f32 1.442695, %v1668_v47 }
 0x4b5   :  { %6516 = vpow2.f32 %v1239_v4 }
 0x4b6   :  { %6518 = vpow2.f32 %v1235_v31 }
 0x4b7   :  { %6520 = vpow2.f32 %v1241_v46 }
 0x4b8   :  { %6522 = vpow2.f32 %v635_v38 }
 0x4b9   :  { %6524 = vpow2.f32 %v1672_v2 }
 0x4ba   :  { %v7430_v43 = vpop.eup %6500  ;;  %6526 = vpow2.f32 %v1670_v30 }
 0x4bb   :  { %v7434_v49 = vpop.eup %6502  ;;  %642 = vperm.xlu0 %6498, %v7430_v43   ;;  %6528 = vpow2.f32 %v1676_v33 }
 0x4bc   :  { %645 = vperm.xlu1 %6499, %v7434_v49   ;;  %v7440_v39 = vpop.eup %6504  ;;  %6530 = vpow2.f32 %v1674_v21 }
 0x4bd   :  { %v7444_v36 = vpop.eup %6506 }
 0x4be   :  { %v7449_v18 = vpop.eup %6508 }
 0x4bf   :  { %1252 = vperm.xlu0 %6498, %v7440_v39   ;;  %v7452_v7 = vpop.eup %6510 }
 0x4c0   :  { %648 = vperm.xlu1 %6499, %v7444_v36   ;;  %v7456_v15 = vpop.eup %6512 }
 0x4c1   :  { %v7458_v22 = vpop.eup %6514 }
 0x4c2   :  { %v7462_v54 = vpop.eup %6516 }
 0x4c3   :  { %1261 = vperm.xlu0 %6498, %v7449_v18   ;;  %v7464_v40 = vpop.eup %6518 }
 0x4c4   :  { %1255 = vperm.xlu1 %6499, %v7452_v7   ;;  %v7468_v52 = vpop.eup %6520 }
 0x4c5   :  { %v7470_v63 = vpop.eup %6522 }
 0x4c6   :  { %v7474_v16 = vpop.eup %6524 }
 0x4c7   :  { %1267 = vperm.xlu0 %6498, %v7456_v15   ;;  %v7476_v53 = vpop.eup %6526 }
 0x4c8   :  { %1258 = vperm.xlu1 %6499, %v7458_v22   ;;  %v7480_v10 = vpop.eup %6528 }
 0x4c9   :  { %v7482_v17 = vpop.eup %6530 }
 0x4cb   :  { %1270 = vperm.xlu0 %6498, %v7462_v54  }
 0x4cc   :  { %1264 = vperm.xlu1 %6499, %v7464_v40  }
 0x4cf   :  { %1273 = vperm.xlu0 %6498, %v7468_v52  }
 0x4d0   :  { %651 = vperm.xlu1 %6499, %v7470_v63  }
 0x4d3   :  { %1686 = vperm.xlu0 %6498, %v7474_v16  }
 0x4d4   :  { %1683 = vperm.xlu1 %6499, %v7476_v53  }
 0x4d7   :  { %1692 = vperm.xlu0 %6498, %v7480_v10  }
 0x4d8   :  { %1689 = vperm.xlu1 %6499, %v7482_v17  }
 0x4e3   :  { %v2138_v48 = vpop.xlane.xlu1 %2137 }
 0x4e4   :  { %v2143_v35 = vrot.slane %v2138_v48, %v6964_v27  ;;  %v2147_v61 = vrot.slane %v2138_v48, %v6944_v19  ;;  %v2151_v26 = vrot.slane %v2138_v48, %v6947_v20  ;;  %v2155_v57 = vrot.slane %v2138_v48, %v6954_v23 }
 0x4e5   :  { %v2159_v55 = vrot.slane %v2138_v48, %v6969_v29  ;;  %v2163_v4 = vrot.slane %v2138_v48, %v6959_v25  ;;  %v2167_v13 = vrot.slane %v2138_v48, %v7178_v56  ;;  %v2171_v51 = vrot.slane %v2138_v48, %v7215_v5 }
 0x4e6   :  { %v2180_v58 = vsub.f32 %v7340_v62, %v2143_v35  ;;  %v2181_v8 = vsub.f32 %v7325_v9, %v2147_v61  ;;  %v2182_v41 = vsub.f32 %v7344_v50, %v2151_v26  ;;  %v2183_v12 = vsub.f32 %v7329_v42, %v2155_v57 }
 0x4e7   :  { %v2184_v46 = vsub.f32 %v7348_v60, %v2159_v55  ;;  %v2185_v62 = vsub.f32 %v7333_v32, %v2163_v4  ;;  %v2186_v50 = vsub.f32 %v7351_v0, %v2167_v13  ;;  %v2187_v42 = vsub.f32 %v7336_v37, %v2171_v51 }
 0x4e8   :  { %v2188_v31 = vmul.f32 1.442695, %v2180_v58  ;;  %v2190_v3 = vmul.f32 1.442695, %v2181_v8  ;;  %v2192_v24 = vmul.f32 1.442695, %v2182_v41 }
 0x4e9   :  { %v2194_v9 = vmul.f32 1.442695, %v2183_v12  ;;  %v2196_v38 = vmul.f32 1.442695, %v2184_v46  ;;  %v2198_v59 = vmul.f32 1.442695, %v2185_v62 }
 0x4ea   :  { %6532 = vpow2.f32 %v2188_v31  ;;  %v2200_v28 = vmul.f32 1.442695, %v2186_v50  ;;  %v2202_v60 = vmul.f32 1.442695, %v2187_v42 }
 0x4eb   :  { %6534 = vpow2.f32 %v2190_v3 }
 0x4ec   :  { %6536 = vpow2.f32 %v2192_v24 }
 0x4ed   :  { %6538 = vpow2.f32 %v2194_v9 }
 0x4ee   :  { %6540 = vpow2.f32 %v2196_v38 }
 0x4ef   :  { %6542 = vpow2.f32 %v2198_v59 }
 0x4f0   :  { %6544 = vpow2.f32 %v2200_v28 }
 0x4f1   :  { %6546 = vpow2.f32 %v2202_v60 }
 0x4f7   :  { %v7502_v1 = vpop.eup %6532 }
 0x4f8   :  { %v7504_v2 = vpop.eup %6534  ;;  %2213 = vperm.xlu1 %6499, %v7502_v1  }
 0x4f9   :  { %2216 = vperm.xlu0 %6498, %v7504_v2   ;;  %v7508_v32 = vpop.eup %6536 }
 0x4fa   :  { %v7510_v0 = vpop.eup %6538 }
 0x4fb   :  { %v7514_v37 = vpop.eup %6540 }
 0x4fc   :  { %2219 = vperm.xlu1 %6499, %v7508_v32   ;;  %v7516_v47 = vpop.eup %6542 }
 0x4fd   :  { %2222 = vperm.xlu0 %6498, %v7510_v0   ;;  %v7520_v30 = vpop.eup %6544 }
 0x4fe   :  { %v7522_v33 = vpop.eup %6546 }
 0x500   :  { %2225 = vperm.xlu1 %6499, %v7514_v37  }
 0x501   :  { %2228 = vperm.xlu0 %6498, %v7516_v47  }
 0x504   :  { %2231 = vperm.xlu1 %6499, %v7520_v30  }
 0x505   :  { %2234 = vperm.xlu0 %6498, %v7522_v33  }
 0x536   :  { %v643_v21 = vpop.permute.xlu0 %642 }
 0x537   :  { %v646_v48 = vpop.permute.xlu1 %645  ;;  %v656_v51 = vrot.slane %v643_v21, %v7356_v45 }
 0x538   :  { %v660_v24 = vrot.slane %v646_v48, %v7356_v45 }
 0x53a   :  { %v1253_v35 = vpop.permute.xlu0 %1252  ;;  %v669_v21 = vsel %vm593_vm8, %v660_v24, %v656_v51 }
 0x53b   :  { %v649_v61 = vpop.permute.xlu1 %648  ;;  %v1278_v8 = vrot.slane %v1253_v35, %v7356_v45 }
 0x53c   :  { %v664_v9 = vrot.slane %v649_v61, %v7356_v45 }
 0x53e   :  { %v1262_v26 = vpop.permute.xlu0 %1261 }
 0x53f   :  { %v1256_v57 = vpop.permute.xlu1 %1255  ;;  %v1290_v13 = vrot.slane %v1262_v26, %v7356_v45 }
 0x540   :  { %v1282_v55 = vrot.slane %v1256_v57, %v7356_v45  ;;  %v670_v57 = vsel %vm595_vm5, %v664_v9, %v669_v21 }
 0x542   :  { %v1268_v58 = vpop.permute.xlu0 %1267  ;;  %v1307_v12 = vsel %vm593_vm8, %v1282_v55, %v1278_v8 }
 0x543   :  { %v1259_v41 = vpop.permute.xlu1 %1258  ;;  %v1298_v50 = vrot.slane %v1268_v58, %v7356_v45 }
 0x544   :  { %v1286_v4 = vrot.slane %v1259_v41, %v7356_v45 }
 0x546   :  { %v1308_v31 = vsel %vm595_vm5, %v1286_v4, %v1307_v12  ;;  %v1271_v3 = vpop.permute.xlu0 %1270 }
 0x547   :  { %v1265_v46 = vpop.permute.xlu1 %1264  ;;  %v1309_v38 = vsel %vm597_vm9, %v1290_v13, %v1308_v31  ;;  %v1302_v59 = vrot.slane %v1271_v3, %v7356_v45 }
 0x548   :  { %v1294_v62 = vrot.slane %v1265_v46, %v7356_v45 }
 0x54a   :  { %v1310_v42 = vsel %vm1166_vm10, %v1294_v62, %v1309_v38  ;;  %v1274_v28 = vpop.permute.xlu0 %1273 }
 0x54b   :  { %v652_v60 = vpop.permute.xlu1 %651  ;;  %v1306_v35 = vrot.slane %v1274_v28, %v7356_v45  ;;  %v1311_v48 = vsel %vm1168_vm11, %v1298_v50, %v1310_v42 }
 0x54c   :  { %v668_v26 = vrot.slane %v652_v60, %v7356_v45  ;;  %v1312_v61 = vsel %vm1170_vm12, %v1302_v59, %v1311_v48 }
 0x54d   :  { %v1313_v55 = vsel %vm1172_vm13, %v1306_v35, %v1312_v61 }
 0x54e   :  { %v1687_v58 = vpop.permute.xlu0 %1686  ;;  %v671_v8 = vsel %vm597_vm9, %v668_v26, %v670_v57  ;;  %v1315_v41 = vsel %vm259_vm3, %v1313_v55, 0.0 }
 0x54f   :  { %v1684_v4 = vpop.permute.xlu1 %1683  ;;  %v673_v12 = vsel %vm600_vm14, %v671_v8, 0.0  ;;  %1316 = vadd.xlane.f32.xlu0 %v1315_v41  ;;  %v1701_v3 = vrot.slane %v1687_v58, %v7356_v45 }
 0x550   :  { %674 = vadd.xlane.f32.xlu1 %v673_v12  ;;  %v1697_v31 = vrot.slane %v1684_v4, %v7356_v45 }
 0x552   :  { %v1693_v13 = vpop.permute.xlu0 %1692  ;;  %v1710_v62 = vsel %vm593_vm8, %v1701_v3, %v1697_v31 }
 0x553   :  { %v1690_v46 = vpop.permute.xlu1 %1689  ;;  %v1709_v24 = vrot.slane %v1693_v13, %v7356_v45 }
 0x554   :  { %v1705_v51 = vrot.slane %v1690_v46, %v7356_v45 }
 0x556   :  { %v1711_v9 = vsel %vm595_vm5, %v1705_v51, %v1710_v62 }
 0x557   :  { %v1712_v50 = vsel %vm597_vm9, %v1709_v24, %v1711_v9 }
 0x558   :  { %v1714_v38 = vsel %vm600_vm14, %v1712_v50, 0.0 }
 0x559   :  { %1715 = vadd.xlane.f32.xlu0 %v1714_v38 }
 0x573   :  { %v2214_v42 = vpop.permute.xlu1 %2213 }
 0x574   :  { %v2217_v59 = vpop.permute.xlu0 %2216  ;;  %v2239_v28 = vrot.slane %v2214_v42, %v7356_v45 }
 0x575   :  { %v2243_v60 = vrot.slane %v2217_v59, %v7356_v45 }
 0x577   :  { %v2220_v35 = vpop.permute.xlu1 %2219  ;;  %v2268_v26 = vsel %vm593_vm8, %v2243_v60, %v2239_v28 }
 0x578   :  { %v2247_v48 = vrot.slane %v2220_v35, %v7356_v45  ;;  %v2223_v21 = vpop.permute.xlu0 %2222 }
 0x579   :  { %v2251_v61 = vrot.slane %v2223_v21, %v7356_v45 }
 0x57a   :  { %v2269_v57 = vsel %vm595_vm5, %v2247_v48, %v2268_v26 }
 0x57b   :  { %v2226_v55 = vpop.permute.xlu1 %2225  ;;  %v2270_v41 = vsel %vm597_vm9, %v2251_v61, %v2269_v57 }
 0x57c   :  { %v2255_v58 = vrot.slane %v2226_v55, %v7356_v45  ;;  %v2229_v8 = vpop.permute.xlu0 %2228 }
 0x57d   :  { %v2259_v4 = vrot.slane %v2229_v8, %v7356_v45 }
 0x57e   :  { %v2271_v12 = vsel %vm1166_vm10, %v2255_v58, %v2270_v41 }
 0x57f   :  { %v2232_v31 = vpop.permute.xlu1 %2231  ;;  %v2272_v46 = vsel %vm1168_vm11, %v2259_v4, %v2271_v12 }
 0x580   :  { %v2263_v3 = vrot.slane %v2232_v31, %v7356_v45  ;;  %v2235_v13 = vpop.permute.xlu0 %2234 }
 0x581   :  { %v2267_v24 = vrot.slane %v2235_v13, %v7356_v45 }
 0x582   :  { %v2273_v51 = vsel %vm1170_vm12, %v2263_v3, %v2272_v46 }
 0x583   :  { %v2274_v62 = vsel %vm1172_vm13, %v2267_v24, %v2273_v51 }
 0x584   :  { %v2276_v9 = vsel %vm259_vm3, %v2274_v62, 0.0 }
 0x585   :  { %2277 = vadd.xlane.f32.xlu1 %v2276_v9 }
 0x5d8   :  { %v1317_v38 = vpop.xlane.xlu0 %1316 }
 0x5d9   :  { %v675_v50 = vpop.xlane.xlu1 %674 }
 0x5da   :  { %6548 = vrcp.f32 %v675_v50 }
 0x5db   :  { %6550 = vrcp.f32 %v1317_v38 }
 0x5e2   :  { %v1716_v42 = vpop.xlane.xlu0 %1715 }
 0x5e3   :  { %6552 = vrcp.f32 %v1716_v42 }
 0x5e7   :  { %v6549_v59 = vpop.eup %6548 }
 0x5e8   :  { %v681_v28 = vrot.slane %v6549_v59, %v6964_v27  ;;  %v685_v60 = vrot.slane %v6549_v59, %v6944_v19  ;;  %v689_v21 = vrot.slane %v6549_v59, %v6947_v20  ;;  %v693_v61 = vrot.slane %v6549_v59, %v6954_v23  ;;  %v6551_v57 = vpop.eup %6550 }
 0x5e9   :  { %v1331_v31 = vrot.slane %v6551_v57, %v6947_v20  ;;  %v1339_v3 = vrot.slane %v6551_v57, %v6969_v29  ;;  %v1335_v13 = vrot.slane %v6551_v57, %v6954_v23  ;;  %v1347_v46 = vrot.slane %v6551_v57, %v7178_v56 }
 0x5ea   :  { %v698_v35 = vmul.f32 %v7430_v43, %v681_v28  ;;  %v699_v48 = vmul.f32 %v7434_v49, %v685_v60  ;;  %v700_v26 = vmul.f32 %v7444_v36, %v689_v21  ;;  %v701_v8 = vmul.f32 %v7470_v63, %v693_v61 }
 0x5eb   :  { %v1327_v49 = vrot.slane %v6551_v57, %v6944_v19  ;;  %v1323_v36 = vrot.slane %v6551_v57, %v6964_v27  ;;  %v1343_v24 = vrot.slane %v6551_v57, %v6959_v25  ;;  %v1351_v62 = vrot.slane %v6551_v57, %v7215_v5 }
 0x5ec   :  { %707 = vperm.xlu0 %6498, %v698_v35   ;;  %710 = vperm.xlu1 %6499, %v699_v48  }
 0x5ed   :  { %v1361_v12 = vmul.f32 %v7452_v7, %v1327_v49  ;;  %v1360_v63 = vmul.f32 %v7440_v39, %v1323_v36  ;;  %v1363_v7 = vmul.f32 %v7449_v18, %v1335_v13  ;;  %v1366_v39 = vmul.f32 %v7462_v54, %v1347_v46 }
 0x5ee   :  { %v1367_v9 = vmul.f32 %v7468_v52, %v1351_v62 }
 0x5f0   :  { %v6553_v55 = vpop.eup %6552  ;;  %713 = vperm.xlu1 %6499, %v700_v26  }
 0x5f1   :  { %v1726_v58 = vrot.slane %v6553_v55, %v6944_v19  ;;  %v1722_v41 = vrot.slane %v6553_v55, %v6964_v27  ;;  %v1730_v51 = vrot.slane %v6553_v55, %v6947_v20  ;;  %v1734_v18 = vrot.slane %v6553_v55, %v6954_v23 }
 0x5f3   :  { %v1740_v43 = vmul.f32 %v7474_v16, %v1726_v58  ;;  %v1739_v4 = vmul.f32 %v7476_v53, %v1722_v41  ;;  %v1362_v16 = vmul.f32 %v7458_v22, %v1331_v31  ;;  %v1364_v53 = vmul.f32 %v7464_v40, %v1339_v3 }
 0x5f4   :  { %716 = vperm.xlu1 %6499, %v701_v8   ;;  %v1365_v22 = vmul.f32 %v7456_v15, %v1343_v24  ;;  %v1741_v40 = vmul.f32 %v7482_v17, %v1730_v51  ;;  %v1742_v50 = vmul.f32 %v7480_v10, %v1734_v18 }
 0x5f5   :  { %1751 = vperm.xlu0 %6498, %v1740_v43  }
 0x5f8   :  { %1748 = vperm.xlu1 %6499, %v1739_v4  }
 0x5f9   :  { %1380 = vperm.xlu0 %6498, %v1361_v12  }
 0x5fc   :  { %1377 = vperm.xlu1 %6499, %v1360_v63  }
 0x5fd   :  { %1383 = vperm.xlu0 %6498, %v1362_v16  }
 0x600   :  { %1389 = vperm.xlu1 %6499, %v1364_v53  }
 0x601   :  { %1386 = vperm.xlu0 %6498, %v1363_v7  }
 0x604   :  { %1395 = vperm.xlu1 %6499, %v1366_v39  }
 0x605   :  { %1392 = vperm.xlu0 %6498, %v1365_v22  }
 0x608   :  { %1754 = vperm.xlu1 %6499, %v1741_v40  }
 0x609   :  { %1398 = vperm.xlu0 %6498, %v1367_v9  }
 0x60d   :  { %1757 = vperm.xlu0 %6498, %v1742_v50  }
 0x60e   :  { %v2278_v38 = vpop.xlane.xlu1 %2277 }
 0x60f   :  { %6554 = vrcp.f32 %v2278_v38  ;;  %v1778_v38 = vrot.slane %v6974_v34, 4 }
 0x61c   :  { %v6555_v54 = vpop.eup %6554 }
 0x61d   :  { %v2288_v15 = vrot.slane %v6555_v54, %v6944_v19  ;;  %v2284_v42 = vrot.slane %v6555_v54, %v6964_v27  ;;  %v2296_v52 = vrot.slane %v6555_v54, %v6954_v23  ;;  %v2292_v28 = vrot.slane %v6555_v54, %v6947_v20 }
 0x61e   :  { %v2304_v35 = vrot.slane %v6555_v54, %v6959_v25  ;;  %v2300_v19 = vrot.slane %v6555_v54, %v6969_v29  ;;  %v2312_v23 = vrot.slane %v6555_v54, %v7215_v5  ;;  %v2308_v20 = vrot.slane %v6555_v54, %v7178_v56  ;;  %v7625_v25 = vld [vmem:[%s8528_s8] sm:$0xf] }
 0x61f   :  { %v2322_v59 = vmul.f32 %v7504_v2, %v2288_v15  ;;  %v2321_v17 = vmul.f32 %v7502_v1, %v2284_v42  ;;  %v2324_v10 = vmul.f32 %v7510_v0, %v2296_v52  ;;  %v2323_v60 = vmul.f32 %v7508_v32, %v2292_v28  ;;  %6182 = vmatprep.subr.msk.mxu0 %vm109_vm0, %v7625_v25 }
 0x620   :  { %v2326_v2 = vmul.f32 %v7516_v47, %v2304_v35  ;;  %v2325_v1 = vmul.f32 %v7514_v37, %v2300_v19  ;;  %v2328_v0 = vmul.f32 %v7522_v33, %v2312_v23  ;;  %v2327_v32 = vmul.f32 %v7520_v30, %v2308_v20 }
 0x621   :  { %2341 = vperm.xlu0 %6498, %v2322_v59   ;;  %2338 = vperm.xlu1 %6499, %v2321_v17  }
 0x625   :  { %2347 = vperm.xlu0 %6498, %v2324_v10   ;;  %2344 = vperm.xlu1 %6499, %v2323_v60  }
 0x629   :  { %2353 = vperm.xlu0 %6498, %v2326_v2   ;;  %2350 = vperm.xlu1 %6499, %v2325_v1  }
 0x62d   :  { %2359 = vperm.xlu0 %6498, %v2328_v0   ;;  %2356 = vperm.xlu1 %6499, %v2327_v32  }
 0x667   :  { %v711_v29 = vpop.permute.xlu1 %710  ;;  %v708_v5 = vpop.permute.xlu0 %707 }
 0x668   :  { %v725_v56 = vrot.slane %v711_v29, %v7356_v45  ;;  %v721_v47 = vrot.slane %v708_v5, %v7356_v45 }
 0x66a   :  { %v734_v48 = vsel %vm593_vm8, %v725_v56, %v721_v47 }
 0x66b   :  { %v714_v37 = vpop.permute.xlu1 %713 }
 0x66c   :  { %v729_v33 = vrot.slane %v714_v37, %v7356_v45 }
 0x66e   :  { %v735_v61 = vsel %vm595_vm5, %v729_v33, %v734_v48 }
 0x66f   :  { %v717_v30 = vpop.permute.xlu1 %716 }
 0x670   :  { %v733_v21 = vrot.slane %v717_v30, %v7356_v45  ;;  %v1752_v26 = vpop.permute.xlu0 %1751 }
 0x671   :  { %v1766_v54 = vrot.slane %v1752_v26, %v7356_v45 }
 0x672   :  { %v736_v57 = vsel %vm597_vm9, %v733_v21, %v735_v61 }
 0x673   :  { %v1749_v55 = vpop.permute.xlu1 %1748  ;;  %6160 = vmatmul.mubr.msk.f32.vlgmr.msra.gmra.mxu1 %vm334_vm4, %v736_v57 }
 0x674   :  { %6163 = vmatpush3.msra.mxu1 %v6926_v14  ;;  %v1381_v58 = vpop.permute.xlu0 %1380  ;;  %6164 = vmatprep.mubr.msk.f32.mxu1 %vm6739_vm2, %v6738_v6  ;;  %v1762_v40 = vrot.slane %v1749_v55, %v7356_v45  ;;  %v7721_v55 = vld [vmem:[%s8487_s14] sm:$0xff] }
 0x675   :  { %6167 = vmatprep.subr.mxu1 %v6738_v6  ;;  %v1407_v49 = vrot.slane %v1381_v58, %v7356_v45 }
 0x676   :  { %v1775_v59 = vsel %vm593_vm8, %v1766_v54, %v1762_v40 }
 0x677   :  { %v1378_v8 = vpop.permute.xlu1 %1377 }
 0x678   :  { %v1403_v41 = vrot.slane %v1378_v8, %v7356_v45  ;;  %v1384_v43 = vpop.permute.xlu0 %1383 }
 0x679   :  { %v1411_v4 = vrot.slane %v1384_v43, %v7356_v45 }
 0x67a   :  { %v1432_v36 = vsel %vm593_vm8, %v1407_v49, %v1403_v41 }
 0x67b   :  { %v1390_v12 = vpop.permute.xlu1 %1389  ;;  %v1433_v3 = vsel %vm595_vm5, %v1411_v4, %v1432_v36 }
 0x67c   :  { %v1387_v31 = vpop.permute.xlu0 %1386  ;;  %v1419_v53 = vrot.slane %v1390_v12, %v7356_v45 }
 0x67d   :  { %v1415_v63 = vrot.slane %v1387_v31, %v7356_v45 }
 0x67f   :  { %v1434_v16 = vsel %vm597_vm9, %v1415_v63, %v1433_v3  ;;  %v1396_v13 = vpop.permute.xlu1 %1395  ;;  %v2642_v3 = vld [vmem:[%s8486_s13] sm:$0xf]  ;;  %s6744_s13 = smov 64  }
 0x680   :  { %v1393_v46 = vpop.permute.xlu0 %1392  ;;  %v1435_v24 = vsel %vm1166_vm10, %v1419_v53, %v1434_v16  ;;  %v1427_v22 = vrot.slane %v1396_v13, %v7356_v45 }
 0x681   :  { %v1423_v7 = vrot.slane %v1393_v46, %v7356_v45 }
 0x683   :  { %v1436_v39 = vsel %vm1168_vm11, %v1423_v7, %v1435_v24  ;;  %v1755_v51 = vpop.permute.xlu1 %1754 }
 0x684   :  { %v1399_v62 = vpop.permute.xlu0 %1398  ;;  %v1770_v18 = vrot.slane %v1755_v51, %v7356_v45  ;;  %v1437_v50 = vsel %vm1170_vm12, %v1427_v22, %v1436_v39  ;;  %v7745_v22 = vld [vmem:[%s8489_s16] ss:$0 sm:$0xff] }
 0x685   :  { %v1431_v9 = vrot.slane %v1399_v62, %v7356_v45 }
 0x686   :  { %v1776_v52 = vsel %vm595_vm5, %v1770_v18, %v1775_v59 }
 0x687   :  { %v1438_v15 = vsel %vm1172_vm13, %v1431_v9, %v1437_v50 }
 0x688   :  { %6165 = vmatmul.mubr.msk.f32.vlgmr.msra.gmra.mxu1 %vm259_vm3, %v1438_v15  ;;  %v1758_v42 = vpop.permute.xlu0 %1757 }
 0x689   :  { %6168 = vmatpush3.msk.msra.mxu1 %vm109_vm0, %v1778_v38  ;;  %v1774_v17 = vrot.slane %v1758_v42, %v7356_v45  ;;  %6169 = vmatprep.mubr.msk.f32.mxu1 %vm6739_vm2, %v6738_v6 }
 0x68b   :  { %v1777_v34 = vsel %vm597_vm9, %v1774_v17, %v1776_v52 }
 0x68c   :  { %6170 = vmatmul.mubr.msk.f32.vlgmr.msra.gmra.mxu1 %vm334_vm4, %v1777_v34 }
 0x69c   :  { %v2339_v28 = vpop.permute.xlu1 %2338  ;;  %v2342_v10 = vpop.permute.xlu0 %2341 }
 0x69d   :  { %v2364_v60 = vrot.slane %v2339_v28, %v7356_v45  ;;  %v2368_v35 = vrot.slane %v2342_v10, %v7356_v45 }
 0x69f   :  { %v2393_v23 = vsel %vm593_vm8, %v2368_v35, %v2364_v60 }
 0x6a0   :  { %v2345_v19 = vpop.permute.xlu1 %2344  ;;  %v2348_v2 = vpop.permute.xlu0 %2347 }
 0x6a1   :  { %v2372_v1 = vrot.slane %v2345_v19, %v7356_v45  ;;  %v2376_v20 = vrot.slane %v2348_v2, %v7356_v45  ;;  %v5887_v2 = vld [vmem:[%s8488_s15] ss:$0 sm:$0xff]  ;;  %s6745_s15 = smov 96  }
 0x6a3   :  { %v2394_v0 = vsel %vm595_vm5, %v2372_v1, %v2393_v23 }
 0x6a4   :  { %v2351_v32 = vpop.permute.xlu1 %2350  ;;  %v2354_v29 = vpop.permute.xlu0 %2353  ;;  %v2395_v37 = vsel %vm597_vm9, %v2376_v20, %v2394_v0 }
 0x6a5   :  { %v2380_v5 = vrot.slane %v2351_v32, %v7356_v45  ;;  %v2384_v56 = vrot.slane %v2354_v29, %v7356_v45 }
 0x6a7   :  { %v2396_v47 = vsel %vm1166_vm10, %v2380_v5, %v2395_v37 }
 0x6a8   :  { %v2357_v33 = vpop.permute.xlu1 %2356  ;;  %v2360_v30 = vpop.permute.xlu0 %2359  ;;  %v2397_v26 = vsel %vm1168_vm11, %v2384_v56, %v2396_v47 }
 0x6a9   :  { %v2388_v48 = vrot.slane %v2357_v33, %v7356_v45  ;;  %v2392_v21 = vrot.slane %v2360_v30, %v7356_v45  ;;  %v7697_v45 = vld [vmem:[%s8487_s14 + $0x18] sm:$0xff] }
 0x6ab   :  { %v2398_v61 = vsel %vm1170_vm12, %v2388_v48, %v2397_v26 }
 0x6ac   :  { %v2399_v57 = vsel %vm1172_vm13, %v2392_v21, %v2398_v61 }
 0x6ad   :  { %6175 = vmatmul.mubr.msk.f32.vlgmr.msra.gmra.mxu0 %vm259_vm3, %v2399_v57  ;;  %vm4014_vm3 = vcmask 25600  }
 0x6ae   :  { %6184 = vmatprep.mubr.msk.f32.mxu0 %vm334_vm4, %v6926_v14  ;;  %6183 = vmatpush3.msk.msra.mxu0 %vm109_vm0, %v7625_v25  ;;  %v7702_v14 = vld [vmem:[%s8487_s14 + $0x10] sm:$0xff]  ;;  %v2479_v25 = vld [vmem:[%s8529_s0] sm:$0xf] }
 0x6af   :  { %6192 = vmatprep.subr.mxu0 %v6738_v6  ;;  %6177 = vmatprep.subr.msk.mxu1 %vm109_vm0, %v2479_v25 }
 0x6b0   :  { %6178 = vmatpush3.msk.msra.mxu1 %vm109_vm0, %v2479_v25 }
 0x6b1   :  { %6185 = vmatmul.mubr.msk.f32.vlgmr.msra.gmra.mxu0 %vm334_vm4, %v6917_v11  ;;  %v7712_v11 = vld [vmem:[%s8487_s14 + $0x8] sm:$0xff]  ;;  %6187 = vmatprep.subr.msk.mxu1 %vm109_vm0, %v2642_v3 }
 0x6b2   :  { %6200 = vmatprep.mubr.msk.f32.mxu0 %vm6739_vm2, %v6738_v6  ;;  %6193 = vmatpush3.msra.mxu0 %v7697_v45 }
 0x6b3   :  { %6194 = vmatprep.subr.mxu0 %v6738_v6 }
 0x6b4   :  { %6195 = vmatpush3.msra.mxu0 %v7702_v14 }
 0x6b5   :  { %6196 = vmatprep.subr.mxu0 %v6738_v6 }
 0x6b6   :  { %6197 = vmatpush3.msra.mxu0 %v7712_v11 }
 0x6b7   :  { %6198 = vmatprep.subr.mxu0 %v6738_v6 }
 0x6b8   :  { %6199 = vmatpush3.msra.mxu0 %v7721_v55 }
 0x6b9   :  { %6201 = vmatmul.mubr.f32.vlgmr.msra.gmra.mxu0 %v6738_v6  ;;  %6214 = vmatprep.subr.mxu0 %v6738_v6 }
 0x6ba   :  { %6215 = vmatpush3.msra.mxu0 %v7697_v45  ;;  %6222 = vmatprep.mubr.msk.f32.mxu0 %vm6739_vm2, %v6738_v6 }
 0x6bb   :  { %6216 = vmatprep.subr.mxu0 %v6738_v6 }
 0x6bc   :  { %6217 = vmatpush3.msra.mxu0 %v7702_v14 }
 0x6bd   :  { %6218 = vmatprep.subr.mxu0 %v6738_v6 }
 0x6be   :  { %6219 = vmatpush3.msra.mxu0 %v7712_v11 }
 0x6bf   :  { %6220 = vmatprep.subr.mxu0 %v6738_v6 }
 0x6c0   :  { %6221 = vmatpush3.msra.mxu0 %v7721_v55 }
 0x6c1   :  { %6236 = vmatprep.subr.mxu0 %v6738_v6 }
 0x733   :  { %v807_v58 = vpop.f32.mrf.mxu1 }
 0x734   :  { %v5868_v8 = vmul.f32 -1.442695, %v807_v58 }
 0x735   :  { %v6161_v41 = vpop.f32.mrf.mxu1 }
 0x736   :  { %6556 = vpow2.f32 %v5868_v8 }
 0x743   :  { %v6557_v43 = vpop.eup %6556 }
 0x744   :  { %v814_v49 = vadd.f32 1.0, %v6557_v43 }
 0x746   :  { %6558 = vrcp.f32 %v814_v49 }
 0x748   :  { %v1507_v4 = vpop.f32.mrf.mxu1 }
 0x749   :  { %v5872_v62 = vmul.f32 -1.442695, %v1507_v4 }
 0x74a   :  { %v6166_v36 = vpop.f32.mrf.mxu1 }
 0x74c   :  { %v1849_v12 = vpop.f32.mrf.mxu1 }
 0x74d   :  { %v5875_v31 = vmul.f32 -1.442695, %v1849_v12 }
 0x74e   :  { %v6171_v63 = vpop.f32.mrf.mxu1 }
 0x74f   :  { %6560 = vpow2.f32 %v5875_v31 }
 0x753   :  { %v6559_v16 = vpop.eup %6558 }
 0x754   :  { %817 = vxpose.xlu1.b32.start.end [1/1] (short) (narrow) %v6559_v16, 8 }
 0x75c   :  { %v6561_v13 = vpop.eup %6560 }
 0x75d   :  { %v1856_v53 = vadd.f32 1.0, %v6561_v13 }
 0x75f   :  { %6562 = vrcp.f32 %v1856_v53 }
 0x760   :  { %6564 = vpow2.f32 %v5872_v62 }
 0x76c   :  { %v6563_v7 = vpop.eup %6562 }
 0x76d   :  { %v2468_v46 = vpop.f32.mrf.mxu0  ;;  %1859 = vxpose.xlu0.b32.start.end [1/1] (short) (narrow) %v6563_v7, 8  ;;  %v6565_v15 = vpop.eup %6564 }
 0x76e   :  { %v5877_v50 = vmul.f32 -1.442695, %v2468_v46  ;;  %v1514_v59 = vadd.f32 1.0, %v6565_v15 }
 0x76f   :  { %v6176_v24 = vpop.f32.mrf.mxu0 }
 0x770   :  { %6566 = vpow2.f32 %v5877_v50 }
 0x771   :  { %v6186_v39 = vpop.f32.mrf.mxu0  ;;  %6568 = vrcp.f32 %v1514_v59 }
 0x773   :  { %v2633_v51 = vpop.f32.mrf.mxu0 }
 0x779   :  { %v2819_v40 = vpop.f32.mrf.mxu0 }
 0x77a   :  { %v2820_v9 = vadd.f32 %v7745_v22, %v2819_v40 }
 0x77b   :  { %v6202_v18 = vpop.f32.mrf.mxu0 }
 0x77c   :  { %v2824_v38 = vrot.slane %v2820_v9, 1  ;;  %2841 = vrot.lane.b32.xlu1 %v2820_v9, %s6744_s13 }
 0x77d   :  { %v6567_v42 = vpop.eup %6566 }
 0x77e   :  { %v2475_v17 = vadd.f32 1.0, %v6567_v42  ;;  %v6569_v34 = vpop.eup %6568 }
 0x780   :  { %6570 = vrcp.f32 %v2475_v17 }
 0x78d   :  { %v6571_v28 = vpop.eup %6570 }
 0x796   :  { %2843 = vrot.lane.b32.xlu0 %v2824_v38, %s6744_s13 }
 0x7d0   :  { %v833_v54 = vpop.trf.xlu1 }
 0x7d1   :  { %6179 = vmatprep.mubr.msk.f32.mxu1 %vm334_vm4, %v833_v54 }
 0x7e9   :  { %v1875_v52 = vpop.trf.xlu0 }
 0x7ea   :  { %6180 = vmatmul.mubr.msk.f32.vlgmr.msra.gmra.mxu1 %vm334_vm4, %v1875_v52 }
 0x7eb   :  { %6188 = vmatpush3.msk.msra.mxu1 %vm109_vm0, %v2642_v3  ;;  %6189 = vmatprep.mubr.msk.f32.mxu1 %vm334_vm4, %v6569_v34  ;;  %vm2749_vm0 = vcmask 261120  }
 0x7ec   :  { %6203 = vmatprep.subr.mxu1 %v6738_v6 }
 0x7ee   :  { %6190 = vmatmul.mubr.msk.f32.vlgmr.msra.gmra.mxu1 %vm334_vm4, %v6571_v28  ;;  %v2842_v58 = vpop.permute.xlu1 %2841 }
 0x7ef   :  { %6204 = vmatpush3.msra.mxu1 %v7697_v45  ;;  %6211 = vmatprep.mubr.msk.f32.mxu1 %vm6739_vm2, %v6738_v6 }
 0x7f0   :  { %6205 = vmatprep.subr.mxu1 %v6738_v6 }
 0x7f1   :  { %6206 = vmatpush3.msra.mxu1 %v7702_v14 }
 0x7f2   :  { %6207 = vmatprep.subr.mxu1 %v6738_v6 }
 0x7f3   :  { %6208 = vmatpush3.msra.mxu1 %v7712_v11 }
 0x7f4   :  { %6209 = vmatprep.subr.mxu1 %v6738_v6 }
 0x7f5   :  { %6210 = vmatpush3.msra.mxu1 %v7721_v55 }
 0x7f6   :  { %6225 = vmatprep.subr.mxu1 %v6738_v6 }
 0x808   :  { %v2844_v26 = vpop.permute.xlu0 %2843 }
 0x8aa   :  { %v6181_v10 = vpop.f32.mrf.mxu1 }
 0x8ab   :  { %v2639_v35 = vadd.f32 %v6186_v39, %v6181_v10 }
 0x8ac   :  { %v2555_v60 = vpop.f32.mrf.mxu1 }
 0x8ad   :  { %v2634_v1 = vadd.f32 %v2633_v51, %v2555_v60 }
 0x8ae   :  { %v6191_v19 = vpop.f32.mrf.mxu1 }
 0x8af   :  { %v2728_v23 = vadd.f32 %v6191_v19, %v2639_v35 }
 0x8b0   :  { %v2718_v20 = vpop.f32.mrf.mxu1 }
 0x8b1   :  { %v7769_v0 = vadd.f32 %v5887_v2, %v2728_v23  ;;  %v2727_v32 = vadd.f32 %v2718_v20, %v2634_v1 }
 0x8b3   :  { %v7771_v29 = vadd.f32 %v5887_v2, %v2727_v32  ;;  %v2828_v5 = vadd.f32 %v2824_v38, %v7769_v0 }
 0x8b5   :  { %v2827_v37 = vadd.f32 %v2820_v9, %v7771_v29  ;;  %v5890_v56 = vmul.f32 -1.442695, %v2828_v5 }
 0x8b7   :  { %v5889_v47 = vmul.f32 -1.442695, %v2827_v37  ;;  %6572 = vpow2.f32 %v5890_v56 }
 0x8b9   :  { %6574 = vpow2.f32 %v5889_v47 }
 0x8c4   :  { %v6573_v33 = vpop.eup %6572 }
 0x8c5   :  { %v2836_v30 = vadd.f32 1.0, %v6573_v33 }
 0x8c6   :  { %v6575_v48 = vpop.eup %6574 }
 0x8c7   :  { %v2835_v21 = vadd.f32 1.0, %v6575_v48  ;;  %6576 = vrcp.f32 %v2836_v30 }
 0x8c9   :  { %6578 = vrcp.f32 %v2835_v21 }
 0x8d4   :  { %v6577_v61 = vpop.eup %6576 }
 0x8d5   :  { %v2848_v57 = vmul.f32 %v6577_v61, %v2844_v26  ;;  %v2862_v31 = vsub.f32 1.0, %v6577_v61  ;;  %v2874_v3 = vmul.f32 0.0, %v6577_v61 }
 0x8d6   :  { %v6579_v25 = vpop.eup %6578 }
 0x8d7   :  { %v2847_v8 = vmul.f32 %v6579_v25, %v2842_v58  ;;  %2853 = vrot.lane.b32.xlu1 %v2848_v57, %s6744_s13  ;;  %v2861_v13 = vsub.f32 1.0, %v6579_v25  ;;  %v2873_v7 = vmul.f32 0.0, %v6579_v25 }
 0x8d9   :  { %2851 = vrot.lane.b32.xlu0 %v2847_v8, %s6744_s13 }
 0x949   :  { %v2854_v41 = vpop.permute.xlu1 %2853 }
 0x94a   :  { %v2858_v43 = vadd.f32 %v2854_v41, %v7769_v0 }
 0x94b   :  { %v2852_v49 = vpop.permute.xlu0 %2851 }
 0x94c   :  { %6580 = vtanh.f32 %v2858_v43  ;;  %v2857_v4 = vadd.f32 %v2852_v49, %v7771_v29 }
 0x94e   :  { %6582 = vtanh.f32 %v2857_v4 }
 0x959   :  { %v6581_v36 = vpop.eup %6580 }
 0x95a   :  { %2867 = vrot.lane.b32.xlu1 %v6581_v36, %s6745_s15 }
 0x95b   :  { %v6583_v12 = vpop.eup %6582 }
 0x95c   :  { %2865 = vrot.lane.b32.xlu0 %v6583_v12, %s6745_s15 }
 0x9cc   :  { %v2868_v63 = vpop.permute.xlu1 %2867 }
 0x9cd   :  { %v2872_v16 = vmul.f32 %v2868_v63, %v2862_v31 }
 0x9ce   :  { %v2866_v53 = vpop.permute.xlu0 %2865 }
 0x9cf   :  { %v7781_v46 = vadd.f32 %v2874_v3, %v2872_v16  ;;  %v2871_v24 = vmul.f32 %v2866_v53, %v2861_v13 }
 0x9d1   :  { %v2879_v39 = vrot.slane %v7781_v46, 7  ;;  %v2875_v51 = vadd.f32 %v2873_v7, %v2871_v24 }
 0x9d3   :  { %v2880_v62 = vsel %vm593_vm8, %v2879_v39, %v2875_v51  ;;  %v3005_v33 = vrot.slane %v2875_v51, 7 }
 0x9d4   :  { %2881 = vrot.lane.b32.xlu1 %v2880_v62, %s6745_s15 }
 0xa46   :  { %v2882_v40 = vpop.permute.xlu1 %2881 }
 0xa47   :  { %6212 = vmatmul.mubr.msk.f32.vlgmr.msra.gmra.mxu1 %vm2749_vm0, %v2882_v40 }
 0xa48   :  { %6226 = vmatpush3.msra.mxu1 %v7697_v45  ;;  %6233 = vmatprep.mubr.msk.f32.mxu1 %vm6739_vm2, %v6738_v6 }
 0xa49   :  { %6227 = vmatprep.subr.mxu1 %v6738_v6 }
 0xa4a   :  { %6228 = vmatpush3.msra.mxu1 %v7702_v14 }
 0xa4b   :  { %6229 = vmatprep.subr.mxu1 %v6738_v6 }
 0xa4c   :  { %6230 = vmatpush3.msra.mxu1 %v7712_v11 }
 0xa4d   :  { %6231 = vmatprep.subr.mxu1 %v6738_v6 }
 0xa4e   :  { %6232 = vmatpush3.msra.mxu1 %v7721_v55 }
 0xa4f   :  { %6247 = vmatprep.subr.mxu1 %v6738_v6 }
 0xb07   :  { %v2951_v9 = vpop.f32.mrf.mxu1 }
 0xb08   :  { %v2952_v18 = vadd.f32 %v7745_v22, %v2951_v9 }
 0xb09   :  { %v6213_v50 = vpop.f32.mrf.mxu1 }
 0xb0a   :  { %v2956_v38 = vrot.slane %v2952_v18, 7  ;;  %2975 = vrot.lane.b32.xlu1 %v2952_v18, %s6744_s13  ;;  %v2960_v54 = vadd.f32 %v2952_v18, %v7769_v0 }
 0xb0c   :  { %2973 = vrot.lane.b32.xlu0 %v2956_v38, %s6744_s13  ;;  %v2959_v15 = vadd.f32 %v2956_v38, %v7771_v29  ;;  %v5893_v42 = vmul.f32 -1.442695, %v2960_v54 }
 0xb0e   :  { %v5892_v59 = vmul.f32 -1.442695, %v2959_v15  ;;  %6584 = vpow2.f32 %v5893_v42 }
 0xb10   :  { %6586 = vpow2.f32 %v5892_v59 }
 0xb1b   :  { %v6585_v17 = vpop.eup %6584 }
 0xb1c   :  { %v2968_v34 = vadd.f32 1.0, %v6585_v17 }
 0xb1d   :  { %v6587_v52 = vpop.eup %6586 }
 0xb1e   :  { %v2967_v28 = vadd.f32 1.0, %v6587_v52  ;;  %6588 = vrcp.f32 %v2968_v34 }
 0xb20   :  { %6590 = vrcp.f32 %v2967_v28 }
 0xb2b   :  { %v6589_v10 = vpop.eup %6588 }
 0xb2c   :  { %v2994_v30 = vsub.f32 1.0, %v6589_v10  ;;  %v3009_v25 = vmul.f32 %v6589_v10, %v2879_v39 }
 0xb2d   :  { %v6591_v19 = vpop.eup %6590 }
 0xb2e   :  { %v2993_v48 = vsub.f32 1.0, %v6591_v19  ;;  %v3008_v61 = vmul.f32 %v6591_v19, %v3005_v33 }
 0xb7c   :  { %v2976_v60 = vpop.permute.xlu1 %2975 }
 0xb7d   :  { %v2980_v35 = vmul.f32 %v6589_v10, %v2976_v60 }
 0xb7e   :  { %v2974_v2 = vpop.permute.xlu0 %2973 }
 0xb7f   :  { %v2979_v1 = vmul.f32 %v6591_v19, %v2974_v2  ;;  %2985 = vrot.lane.b32.xlu1 %v2980_v35, %s6744_s13 }
 0xb81   :  { %2983 = vrot.lane.b32.xlu0 %v2979_v1, %s6744_s13 }
 0xbf1   :  { %v2986_v23 = vpop.permute.xlu1 %2985 }
 0xbf2   :  { %v2990_v20 = vadd.f32 %v2986_v23, %v7769_v0 }
 0xbf3   :  { %v2984_v32 = vpop.permute.xlu0 %2983 }
 0xbf4   :  { %6592 = vtanh.f32 %v2990_v20  ;;  %v2989_v5 = vadd.f32 %v2984_v32, %v7771_v29 }
 0xbf6   :  { %6594 = vtanh.f32 %v2989_v5 }
 0xc01   :  { %v6593_v37 = vpop.eup %6592 }
 0xc02   :  { %2999 = vrot.lane.b32.xlu1 %v6593_v37, %s6745_s15 }
 0xc03   :  { %v6595_v56 = vpop.eup %6594 }
 0xc04   :  { %2997 = vrot.lane.b32.xlu0 %v6595_v56, %s6745_s15 }
 0xc74   :  { %v3000_v47 = vpop.permute.xlu1 %2999 }
 0xc75   :  { %v3004_v26 = vmul.f32 %v3000_v47, %v2994_v30 }
 0xc76   :  { %v2998_v21 = vpop.permute.xlu0 %2997 }
 0xc77   :  { %v3003_v57 = vmul.f32 %v2998_v21, %v2993_v48  ;;  %v3011_v8 = vadd.f32 %v3009_v25, %v3004_v26 }
 0xc79   :  { %v3010_v58 = vadd.f32 %v3008_v61, %v3003_v57  ;;  %v3142_v52 = vrot.slane %v3011_v8, 7 }
 0xc7b   :  { %v3014_v41 = vrot.slane %v3010_v58, 1  ;;  %v3141_v28 = vrot.slane %v3010_v58, 7 }
 0xc7d   :  { %v3015_v43 = vsel %vm593_vm8, %v3011_v8, %v3014_v41 }
 0xc7e   :  { %3016 = vrot.lane.b32.xlu0 %v3015_v43, %s6745_s15 }
 0xcf0   :  { %v3017_v49 = vpop.permute.xlu0 %3016 }
 0xcf1   :  { %6223 = vmatmul.mubr.msk.f32.vlgmr.msra.gmra.mxu0 %vm2749_vm0, %v3017_v49 }
 0xcf2   :  { %6237 = vmatpush3.msra.mxu0 %v7697_v45  ;;  %6244 = vmatprep.mubr.msk.f32.mxu0 %vm6739_vm2, %v6738_v6 }
 0xcf3   :  { %6238 = vmatprep.subr.mxu0 %v6738_v6 }
 0xcf4   :  { %6239 = vmatpush3.msra.mxu0 %v7702_v14 }
 0xcf5   :  { %6240 = vmatprep.subr.mxu0 %v6738_v6 }
 0xcf6   :  { %6241 = vmatpush3.msra.mxu0 %v7712_v11 }
 0xcf7   :  { %6242 = vmatprep.subr.mxu0 %v6738_v6 }
 0xcf8   :  { %6243 = vmatpush3.msra.mxu0 %v7721_v55 }
 0xcf9   :  { %6258 = vmatprep.subr.mxu0 %v6738_v6 }
 0xdb1   :  { %v3086_v4 = vpop.f32.mrf.mxu0 }
 0xdb2   :  { %v3087_v36 = vadd.f32 %v7745_v22, %v3086_v4 }
 0xdb3   :  { %v6224_v12 = vpop.f32.mrf.mxu0 }
 0xdb4   :  { %v3091_v31 = vrot.slane %v3087_v36, 6  ;;  %v3092_v63 = vrot.slane %v3087_v36, 7 }
 0xdb6   :  { %3111 = vrot.lane.b32.xlu0 %v3092_v63, %s6744_s13  ;;  %3109 = vrot.lane.b32.xlu1 %v3091_v31, %s6744_s13  ;;  %v3095_v3 = vadd.f32 %v3091_v31, %v7771_v29  ;;  %v3096_v16 = vadd.f32 %v3092_v63, %v7769_v0 }
 0xdb8   :  { %v5895_v13 = vmul.f32 -1.442695, %v3095_v3  ;;  %v5896_v53 = vmul.f32 -1.442695, %v3096_v16 }
 0xdba   :  { %6596 = vpow2.f32 %v5895_v13 }
 0xdbb   :  { %6598 = vpow2.f32 %v5896_v53 }
 0xdc7   :  { %v6597_v46 = vpop.eup %6596 }
 0xdc8   :  { %v6599_v7 = vpop.eup %6598  ;;  %v3103_v24 = vadd.f32 1.0, %v6597_v46 }
 0xdc9   :  { %v3104_v39 = vadd.f32 1.0, %v6599_v7 }
 0xdca   :  { %6600 = vrcp.f32 %v3103_v24 }
 0xdcb   :  { %6602 = vrcp.f32 %v3104_v39 }
 0xdd7   :  { %v6601_v51 = vpop.eup %6600 }
 0xdd8   :  { %v6603_v62 = vpop.eup %6602  ;;  %v3129_v60 = vsub.f32 1.0, %v6601_v51  ;;  %v3145_v1 = vmul.f32 %v6601_v51, %v3141_v28 }
 0xdd9   :  { %v3130_v34 = vsub.f32 1.0, %v6603_v62  ;;  %v3146_v35 = vmul.f32 %v6603_v62, %v3142_v52 }
 0xe28   :  { %v3112_v40 = vpop.permute.xlu0 %3111  ;;  %v3110_v9 = vpop.permute.xlu1 %3109 }
 0xe29   :  { %v3116_v18 = vmul.f32 %v6603_v62, %v3112_v40  ;;  %v3115_v50 = vmul.f32 %v6601_v51, %v3110_v9 }
 0xe2b   :  { %3121 = vrot.lane.b32.xlu0 %v3116_v18, %s6744_s13  ;;  %3119 = vrot.lane.b32.xlu1 %v3115_v50, %s6744_s13 }
 0xe9d   :  { %v3122_v38 = vpop.permute.xlu0 %3121  ;;  %v3120_v54 = vpop.permute.xlu1 %3119 }
 0xe9e   :  { %v3126_v15 = vadd.f32 %v3122_v38, %v7769_v0  ;;  %v3125_v42 = vadd.f32 %v3120_v54, %v7771_v29 }
 0xea0   :  { %6604 = vtanh.f32 %v3126_v15 }
 0xea1   :  { %6606 = vtanh.f32 %v3125_v42 }
 0xead   :  { %v6605_v59 = vpop.eup %6604 }
 0xeae   :  { %v6607_v17 = vpop.eup %6606  ;;  %3135 = vrot.lane.b32.xlu0 %v6605_v59, %s6745_s15 }
 0xeaf   :  { %3133 = vrot.lane.b32.xlu1 %v6607_v17, %s6745_s15 }
 0xf20   :  { %v3136_v10 = vpop.permute.xlu0 %3135 }
 0xf21   :  { %v3140_v19 = vmul.f32 %v3136_v10, %v3130_v34  ;;  %v3134_v2 = vpop.permute.xlu1 %3133 }
 0xf22   :  { %v3139_v23 = vmul.f32 %v3134_v2, %v3129_v60 }
 0xf23   :  { %v3148_v20 = vadd.f32 %v3146_v35, %v3140_v19 }
 0xf24   :  { %v3147_v32 = vadd.f32 %v3145_v1, %v3139_v23 }
 0xf25   :  { %v3152_v5 = vrot.slane %v3148_v20, 1  ;;  %v3280_v39 = vrot.slane %v3148_v20, 7 }
 0xf26   :  { %v3151_v37 = vrot.slane %v3147_v32, 2  ;;  %v3279_v62 = vrot.slane %v3147_v32, 7 }
 0xf28   :  { %v3153_v56 = vsel %vm593_vm8, %v3152_v5, %v3151_v37 }
 0xf29   :  { %3154 = vrot.lane.b32.xlu1 %v3153_v56, %s6745_s15 }
 0xf9b   :  { %v3155_v47 = vpop.permute.xlu1 %3154 }
 0xf9c   :  { %6234 = vmatmul.mubr.msk.f32.vlgmr.msra.gmra.mxu1 %vm2749_vm0, %v3155_v47 }
 0xf9d   :  { %6248 = vmatpush3.msra.mxu1 %v7697_v45  ;;  %6255 = vmatprep.mubr.msk.f32.mxu1 %vm6739_vm2, %v6738_v6 }
 0xf9e   :  { %6249 = vmatprep.subr.mxu1 %v6738_v6 }
 0xf9f   :  { %6250 = vmatpush3.msra.mxu1 %v7702_v14 }
 0xfa0   :  { %6251 = vmatprep.subr.mxu1 %v6738_v6 }
 0xfa1   :  { %6252 = vmatpush3.msra.mxu1 %v7712_v11 }
 0xfa2   :  { %6253 = vmatprep.subr.mxu1 %v6738_v6 }
 0xfa3   :  { %6254 = vmatpush3.msra.mxu1 %v7721_v55 }
 0xfa4   :  { %6269 = vmatprep.subr.mxu1 %v6738_v6 }
0x105c   :  { %v3224_v33 = vpop.f32.mrf.mxu1 }
0x105d   :  { %v3225_v30 = vadd.f32 %v7745_v22, %v3224_v33 }
0x105e   :  { %v6235_v48 = vpop.f32.mrf.mxu1 }
0x105f   :  { %v3229_v21 = vrot.slane %v3225_v30, 5  ;;  %v3230_v26 = vrot.slane %v3225_v30, 6 }
0x1061   :  { %3249 = vrot.lane.b32.xlu1 %v3230_v26, %s6744_s13  ;;  %3247 = vrot.lane.b32.xlu0 %v3229_v21, %s6744_s13  ;;  %v3233_v61 = vadd.f32 %v3229_v21, %v7771_v29  ;;  %v3234_v57 = vadd.f32 %v3230_v26, %v7769_v0 }
0x1063   :  { %v5898_v25 = vmul.f32 -1.442695, %v3233_v61  ;;  %v5899_v58 = vmul.f32 -1.442695, %v3234_v57 }
0x1065   :  { %6608 = vpow2.f32 %v5898_v25 }
0x1066   :  { %6610 = vpow2.f32 %v5899_v58 }
0x1072   :  { %v6609_v8 = vpop.eup %6608 }
0x1073   :  { %v6611_v41 = vpop.eup %6610  ;;  %v3241_v43 = vadd.f32 1.0, %v6609_v8 }
0x1074   :  { %v3242_v49 = vadd.f32 1.0, %v6611_v41 }
0x1075   :  { %6612 = vrcp.f32 %v3241_v43 }
0x1076   :  { %6614 = vrcp.f32 %v3242_v49 }
0x1082   :  { %v6613_v4 = vpop.eup %6612 }
0x1083   :  { %v6615_v36 = vpop.eup %6614  ;;  %v3267_v9 = vsub.f32 1.0, %v6613_v4  ;;  %v3283_v54 = vmul.f32 %v6613_v4, %v3279_v62 }
0x1084   :  { %v3268_v51 = vsub.f32 1.0, %v6615_v36  ;;  %v3284_v18 = vmul.f32 %v6615_v36, %v3280_v39 }
0x10d3   :  { %v3250_v12 = vpop.permute.xlu1 %3249  ;;  %v3248_v31 = vpop.permute.xlu0 %3247 }
0x10d4   :  { %v3254_v63 = vmul.f32 %v6615_v36, %v3250_v12  ;;  %v3253_v3 = vmul.f32 %v6613_v4, %v3248_v31 }
0x10d6   :  { %3259 = vrot.lane.b32.xlu1 %v3254_v63, %s6744_s13  ;;  %3257 = vrot.lane.b32.xlu0 %v3253_v3, %s6744_s13 }
0x1148   :  { %v3260_v16 = vpop.permute.xlu1 %3259  ;;  %v3258_v13 = vpop.permute.xlu0 %3257 }
0x1149   :  { %v3264_v53 = vadd.f32 %v3260_v16, %v7769_v0  ;;  %v3263_v46 = vadd.f32 %v3258_v13, %v7771_v29 }
0x114b   :  { %6616 = vtanh.f32 %v3264_v53 }
0x114c   :  { %6618 = vtanh.f32 %v3263_v46 }
0x1158   :  { %v6617_v7 = vpop.eup %6616 }
0x1159   :  { %v6619_v24 = vpop.eup %6618  ;;  %3273 = vrot.lane.b32.xlu1 %v6617_v7, %s6745_s15 }
0x115a   :  { %3271 = vrot.lane.b32.xlu0 %v6619_v24, %s6745_s15 }
0x11cb   :  { %v3274_v40 = vpop.permute.xlu1 %3273 }
0x11cc   :  { %v3278_v50 = vmul.f32 %v3274_v40, %v3268_v51  ;;  %v3272_v38 = vpop.permute.xlu0 %3271 }
0x11cd   :  { %v3277_v15 = vmul.f32 %v3272_v38, %v3267_v9 }
0x11ce   :  { %v3286_v42 = vadd.f32 %v3284_v18, %v3278_v50 }
0x11cf   :  { %v3285_v59 = vadd.f32 %v3283_v54, %v3277_v15 }
0x11d0   :  { %v3290_v17 = vrot.slane %v3286_v42, 2  ;;  %v3418_v49 = vrot.slane %v3286_v42, 7 }
0x11d1   :  { %v3289_v52 = vrot.slane %v3285_v59, 3  ;;  %v3417_v36 = vrot.slane %v3285_v59, 7 }
0x11d3   :  { %v3291_v34 = vsel %vm593_vm8, %v3290_v17, %v3289_v52 }
0x11d4   :  { %3292 = vrot.lane.b32.xlu0 %v3291_v34, %s6745_s15 }
0x1246   :  { %v3293_v28 = vpop.permute.xlu0 %3292 }
0x1247   :  { %6245 = vmatmul.mubr.msk.f32.vlgmr.msra.gmra.mxu0 %vm2749_vm0, %v3293_v28 }
0x1248   :  { %6259 = vmatpush3.msra.mxu0 %v7697_v45  ;;  %6266 = vmatprep.mubr.msk.f32.mxu0 %vm6739_vm2, %v6738_v6 }
0x1249   :  { %6260 = vmatprep.subr.mxu0 %v6738_v6 }
0x124a   :  { %6261 = vmatpush3.msra.mxu0 %v7702_v14 }
0x124b   :  { %6262 = vmatprep.subr.mxu0 %v6738_v6 }
0x124c   :  { %6263 = vmatpush3.msra.mxu0 %v7712_v11 }
0x124d   :  { %6264 = vmatprep.subr.mxu0 %v6738_v6 }
0x124e   :  { %6265 = vmatpush3.msra.mxu0 %v7721_v55 }
0x124f   :  { %6280 = vmatprep.subr.mxu0 %v6738_v6 }
0x1307   :  { %v3362_v10 = vpop.f32.mrf.mxu0 }
0x1308   :  { %v3363_v60 = vadd.f32 %v7745_v22, %v3362_v10 }
0x1309   :  { %v6246_v35 = vpop.f32.mrf.mxu0 }
0x130a   :  { %v3367_v19 = vrot.slane %v3363_v60, 4  ;;  %v3368_v2 = vrot.slane %v3363_v60, 5 }
0x130c   :  { %3387 = vrot.lane.b32.xlu0 %v3368_v2, %s6744_s13  ;;  %3385 = vrot.lane.b32.xlu1 %v3367_v19, %s6744_s13  ;;  %v3371_v1 = vadd.f32 %v3367_v19, %v7771_v29  ;;  %v3372_v23 = vadd.f32 %v3368_v2, %v7769_v0 }
0x130e   :  { %v5901_v20 = vmul.f32 -1.442695, %v3371_v1  ;;  %v5902_v32 = vmul.f32 -1.442695, %v3372_v23 }
0x1310   :  { %6620 = vpow2.f32 %v5901_v20 }
0x1311   :  { %6622 = vpow2.f32 %v5902_v32 }
0x131d   :  { %v6621_v5 = vpop.eup %6620 }
0x131e   :  { %v6623_v37 = vpop.eup %6622  ;;  %v3379_v56 = vadd.f32 1.0, %v6621_v5 }
0x131f   :  { %v3380_v47 = vadd.f32 1.0, %v6623_v37 }
0x1320   :  { %6624 = vrcp.f32 %v3379_v56 }
0x1321   :  { %6626 = vrcp.f32 %v3380_v47 }
0x132d   :  { %v6625_v33 = vpop.eup %6624 }
0x132e   :  { %v6627_v30 = vpop.eup %6626  ;;  %v3405_v31 = vsub.f32 1.0, %v6625_v33  ;;  %v3421_v13 = vmul.f32 %v6625_v33, %v3417_v36 }
0x132f   :  { %v3406_v4 = vsub.f32 1.0, %v6627_v30  ;;  %v3422_v63 = vmul.f32 %v6627_v30, %v3418_v49 }
0x137e   :  { %v3388_v48 = vpop.permute.xlu0 %3387  ;;  %v3386_v21 = vpop.permute.xlu1 %3385 }
0x137f   :  { %v3392_v26 = vmul.f32 %v6627_v30, %v3388_v48  ;;  %v3391_v61 = vmul.f32 %v6625_v33, %v3386_v21 }
0x1381   :  { %3397 = vrot.lane.b32.xlu0 %v3392_v26, %s6744_s13  ;;  %3395 = vrot.lane.b32.xlu1 %v3391_v61, %s6744_s13 }
0x13f3   :  { %v3398_v57 = vpop.permute.xlu0 %3397  ;;  %v3396_v25 = vpop.permute.xlu1 %3395 }
0x13f4   :  { %v3402_v58 = vadd.f32 %v3398_v57, %v7769_v0  ;;  %v3401_v8 = vadd.f32 %v3396_v25, %v7771_v29 }
0x13f6   :  { %6628 = vtanh.f32 %v3402_v58 }
0x13f7   :  { %6630 = vtanh.f32 %v3401_v8 }
0x1403   :  { %v6629_v41 = vpop.eup %6628 }
0x1404   :  { %v6631_v43 = vpop.eup %6630  ;;  %3411 = vrot.lane.b32.xlu0 %v6629_v41, %s6745_s15 }
0x1405   :  { %3409 = vrot.lane.b32.xlu1 %v6631_v43, %s6745_s15 }
0x1476   :  { %v3412_v12 = vpop.permute.xlu0 %3411 }
0x1477   :  { %v3416_v3 = vmul.f32 %v3412_v12, %v3406_v4  ;;  %v3410_v16 = vpop.permute.xlu1 %3409 }
0x1478   :  { %v3415_v53 = vmul.f32 %v3410_v16, %v3405_v31 }
0x1479   :  { %v3424_v46 = vadd.f32 %v3422_v63, %v3416_v3 }
0x147a   :  { %v3423_v7 = vadd.f32 %v3421_v13, %v3415_v53 }
0x147b   :  { %v3428_v24 = vrot.slane %v3424_v46, 3  ;;  %v3556_v32 = vrot.slane %v3424_v46, 7 }
0x147c   :  { %v3427_v39 = vrot.slane %v3423_v7, 4  ;;  %v3555_v37 = vrot.slane %v3423_v7, 7 }
0x147e   :  { %v3429_v51 = vsel %vm593_vm8, %v3428_v24, %v3427_v39 }
0x147f   :  { %3430 = vrot.lane.b32.xlu1 %v3429_v51, %s6745_s15 }
0x14f1   :  { %v3431_v62 = vpop.permute.xlu1 %3430 }
0x14f2   :  { %6256 = vmatmul.mubr.msk.f32.vlgmr.msra.gmra.mxu1 %vm2749_vm0, %v3431_v62 }
0x14f3   :  { %6270 = vmatpush3.msra.mxu1 %v7697_v45  ;;  %6277 = vmatprep.mubr.msk.f32.mxu1 %vm6739_vm2, %v6738_v6 }
0x14f4   :  { %6271 = vmatprep.subr.mxu1 %v6738_v6 }
0x14f5   :  { %6272 = vmatpush3.msra.mxu1 %v7702_v14 }
0x14f6   :  { %6273 = vmatprep.subr.mxu1 %v6738_v6 }
0x14f7   :  { %6274 = vmatpush3.msra.mxu1 %v7712_v11 }
0x14f8   :  { %6275 = vmatprep.subr.mxu1 %v6738_v6 }
0x14f9   :  { %6276 = vmatpush3.msra.mxu1 %v7721_v55 }
0x14fa   :  { %6291 = vmatprep.subr.mxu1 %v6738_v6 }
0x15b2   :  { %v3500_v40 = vpop.f32.mrf.mxu1 }
0x15b3   :  { %v3501_v45 = vadd.f32 %v7745_v22, %v3500_v40 }
0x15b4   :  { %v6257_v9 = vpop.f32.mrf.mxu1 }
0x15b5   :  { %v3505_v18 = vrot.slane %v3501_v45, 3  ;;  %v3506_v50 = vrot.slane %v3501_v45, 4 }
0x15b7   :  { %3525 = vrot.lane.b32.xlu1 %v3506_v50, %s6744_s13  ;;  %3523 = vrot.lane.b32.xlu0 %v3505_v18, %s6744_s13  ;;  %v3509_v14 = vadd.f32 %v3505_v18, %v7771_v29  ;;  %v3510_v11 = vadd.f32 %v3506_v50, %v7769_v0 }
0x15b9   :  { %v5904_v38 = vmul.f32 -1.442695, %v3509_v14  ;;  %v5905_v54 = vmul.f32 -1.442695, %v3510_v11 }
0x15bb   :  { %6632 = vpow2.f32 %v5904_v38 }
0x15bc   :  { %6634 = vpow2.f32 %v5905_v54 }
0x15c8   :  { %v6633_v55 = vpop.eup %6632 }
0x15c9   :  { %v6635_v15 = vpop.eup %6634  ;;  %v3517_v42 = vadd.f32 1.0, %v6633_v55 }
0x15ca   :  { %v3518_v59 = vadd.f32 1.0, %v6635_v15 }
0x15cb   :  { %6636 = vrcp.f32 %v3517_v42 }
0x15cc   :  { %6638 = vrcp.f32 %v3518_v59 }
0x15d8   :  { %v6637_v17 = vpop.eup %6636 }
0x15d9   :  { %v6639_v52 = vpop.eup %6638  ;;  %v3543_v47 = vsub.f32 1.0, %v6637_v17  ;;  %v3559_v21 = vmul.f32 %v6637_v17, %v3555_v37 }
0x15da   :  { %v3544_v5 = vsub.f32 1.0, %v6639_v52  ;;  %v3560_v33 = vmul.f32 %v6639_v52, %v3556_v32 }
0x1629   :  { %v3526_v34 = vpop.permute.xlu1 %3525  ;;  %v3524_v28 = vpop.permute.xlu0 %3523 }
0x162a   :  { %v3530_v10 = vmul.f32 %v6639_v52, %v3526_v34  ;;  %v3529_v60 = vmul.f32 %v6637_v17, %v3524_v28 }
0x162c   :  { %3535 = vrot.lane.b32.xlu1 %v3530_v10, %s6744_s13  ;;  %3533 = vrot.lane.b32.xlu0 %v3529_v60, %s6744_s13 }
0x169e   :  { %v3536_v35 = vpop.permute.xlu1 %3535  ;;  %v3534_v19 = vpop.permute.xlu0 %3533 }
0x169f   :  { %v3540_v2 = vadd.f32 %v3536_v35, %v7769_v0  ;;  %v3539_v1 = vadd.f32 %v3534_v19, %v7771_v29 }
0x16a1   :  { %6640 = vtanh.f32 %v3540_v2 }
0x16a2   :  { %6642 = vtanh.f32 %v3539_v1 }
0x16ae   :  { %v6641_v23 = vpop.eup %6640 }
0x16af   :  { %v6643_v20 = vpop.eup %6642  ;;  %3549 = vrot.lane.b32.xlu1 %v6641_v23, %s6745_s15 }
0x16b0   :  { %3547 = vrot.lane.b32.xlu0 %v6643_v20, %s6745_s15 }
0x1721   :  { %v3550_v56 = vpop.permute.xlu1 %3549 }
0x1722   :  { %v3554_v30 = vmul.f32 %v3550_v56, %v3544_v5  ;;  %v3548_v48 = vpop.permute.xlu0 %3547 }
0x1723   :  { %v3553_v26 = vmul.f32 %v3548_v48, %v3543_v47 }
0x1724   :  { %v3562_v61 = vadd.f32 %v3560_v33, %v3554_v30 }
0x1725   :  { %v3561_v57 = vadd.f32 %v3559_v21, %v3553_v26 }
0x1726   :  { %v3566_v25 = vrot.slane %v3562_v61, 4  ;;  %v3694_v54 = vrot.slane %v3562_v61, 7 }
0x1727   :  { %v3565_v58 = vrot.slane %v3561_v57, 5  ;;  %v3693_v15 = vrot.slane %v3561_v57, 7 }
0x1729   :  { %v3567_v8 = vsel %vm593_vm8, %v3566_v25, %v3565_v58 }
0x172a   :  { %3568 = vrot.lane.b32.xlu0 %v3567_v8, %s6745_s15 }
0x179c   :  { %v3569_v41 = vpop.permute.xlu0 %3568 }
0x179d   :  { %6267 = vmatmul.mubr.msk.f32.vlgmr.msra.gmra.mxu0 %vm2749_vm0, %v3569_v41 }
0x179e   :  { %6288 = vmatprep.mubr.msk.f32.mxu0 %vm6739_vm2, %v6738_v6 }
0x185d   :  { %v3638_v43 = vpop.f32.mrf.mxu0 }
0x185e   :  { %v3639_v49 = vadd.f32 %v7745_v22, %v3638_v43 }
0x185f   :  { %v6268_v4 = vpop.f32.mrf.mxu0 }
0x1860   :  { %v3643_v36 = vrot.slane %v3639_v49, 2  ;;  %v3644_v12 = vrot.slane %v3639_v49, 3 }
0x1862   :  { %3663 = vrot.lane.b32.xlu0 %v3644_v12, %s6744_s13  ;;  %3661 = vrot.lane.b32.xlu1 %v3643_v36, %s6744_s13  ;;  %v3647_v31 = vadd.f32 %v3643_v36, %v7771_v29  ;;  %v3648_v63 = vadd.f32 %v3644_v12, %v7769_v0 }
0x1864   :  { %v5907_v3 = vmul.f32 -1.442695, %v3647_v31  ;;  %v5908_v16 = vmul.f32 -1.442695, %v3648_v63  ;;  %v3842_v31 = vld [vmem:[%s8490_s17 + $0x18] sm:$0xff]  ;;  %v3841_v63 = vld [vmem:[%s8490_s17 + $0x10] sm:$0xff] }
0x1865   :  { %6281 = vmatpush3.msra.mxu0 %v3842_v31  ;;  %v5928_v31 = vld [vmem:[%s8494_s21 + $0x60] sm:$0xff] }
0x1866   :  { %6644 = vpow2.f32 %v5907_v3  ;;  %6282 = vmatprep.subr.mxu0 %v6738_v6  ;;  %v3840_v3 = vld [vmem:[%s8490_s17 + $0x8] sm:$0xff] }
0x1867   :  { %6646 = vpow2.f32 %v5908_v16  ;;  %6283 = vmatpush3.msra.mxu0 %v3841_v63 }
0x1868   :  { %6284 = vmatprep.subr.mxu0 %v6738_v6 }
0x1869   :  { %6285 = vmatpush3.msra.mxu0 %v3840_v3  ;;  %v5941_v3 = vld [vmem:[%s8494_s21 + $0xb8] sm:$0xff] }
0x186a   :  { %6286 = vmatprep.subr.mxu0 %v6738_v6 }
0x1873   :  { %v6645_v13 = vpop.eup %6644 }
0x1874   :  { %v6647_v53 = vpop.eup %6646  ;;  %v3655_v46 = vadd.f32 1.0, %v6645_v13 }
0x1875   :  { %v3656_v7 = vadd.f32 1.0, %v6647_v53 }
0x1876   :  { %6648 = vrcp.f32 %v3655_v46 }
0x1877   :  { %6650 = vrcp.f32 %v3656_v7 }
0x1883   :  { %v6649_v24 = vpop.eup %6648 }
0x1884   :  { %v6651_v39 = vpop.eup %6650  ;;  %v3681_v59 = vsub.f32 1.0, %v6649_v24  ;;  %v3697_v28 = vmul.f32 %v6649_v24, %v3693_v15 }
0x1885   :  { %v3682_v55 = vsub.f32 1.0, %v6651_v39  ;;  %v3698_v17 = vmul.f32 %v6651_v39, %v3694_v54  ;;  %v3932_v54 = vld [vmem:[%s8492_s19 + $0x10] sm:$0xff] }
0x18d4   :  { %v3664_v51 = vpop.permute.xlu0 %3663  ;;  %v3662_v62 = vpop.permute.xlu1 %3661 }
0x18d5   :  { %v3668_v40 = vmul.f32 %v6651_v39, %v3664_v51  ;;  %v3667_v45 = vmul.f32 %v6649_v24, %v3662_v62 }
0x18d7   :  { %3673 = vrot.lane.b32.xlu0 %v3668_v40, %s6744_s13  ;;  %3671 = vrot.lane.b32.xlu1 %v3667_v45, %s6744_s13 }
0x1949   :  { %v3674_v9 = vpop.permute.xlu0 %3673  ;;  %v3672_v18 = vpop.permute.xlu1 %3671 }
0x194a   :  { %v3678_v50 = vadd.f32 %v3674_v9, %v7769_v0  ;;  %v3677_v14 = vadd.f32 %v3672_v18, %v7771_v29 }
0x194c   :  { %6652 = vtanh.f32 %v3678_v50 }
0x194d   :  { %6654 = vtanh.f32 %v3677_v14 }
0x1959   :  { %v6653_v11 = vpop.eup %6652 }
0x195a   :  { %v6655_v38 = vpop.eup %6654  ;;  %3687 = vrot.lane.b32.xlu0 %v6653_v11, %s6745_s15 }
0x195b   :  { %3685 = vrot.lane.b32.xlu1 %v6655_v38, %s6745_s15  ;;  %v3933_v38 = vld [vmem:[%s8492_s19 + $0x18] sm:$0xff] }
0x19cc   :  { %v3688_v42 = vpop.permute.xlu0 %3687 }
0x19cd   :  { %v3692_v52 = vmul.f32 %v3688_v42, %v3682_v55  ;;  %v3686_v34 = vpop.permute.xlu1 %3685  ;;  %v4020_v55 = vld [vmem:[%s8494_s21 + $0x18] sm:$0xff]  ;;  %v4019_v42 = vld [vmem:[%s8494_s21 + $0x10] sm:$0xff] }
0x19ce   :  { %v3691_v10 = vmul.f32 %v3686_v34, %v3681_v59  ;;  %v4018_v59 = vld [vmem:[%s8494_s21 + $0x8] sm:$0xff]  ;;  %v5925_v34 = vld [vmem:[%s8494_s21 + $0x50] sm:$0xff] }
0x19cf   :  { %v7920_v60 = vadd.f32 %v3698_v17, %v3692_v52  ;;  %v4017_v17 = vld [vmem:[%s8494_s21] sm:$0xff]  ;;  %v5926_v52 = vld [vmem:[%s8494_s21 + $0x58] sm:$0xff] }
0x19d0   :  { %v7922_v35 = vadd.f32 %v3697_v28, %v3691_v10  ;;  %v5924_v28 = vld [vmem:[%s8494_s21 + $0x48] sm:$0xff]  ;;  %v5923_v10 = vld [vmem:[%s8494_s21 + $0x40] sm:$0xff] }
0x19d1   :  { %v3704_v19 = vrot.slane %v7920_v60, 5  ;;  %v3832_v13 = vrot.slane %v7920_v60, 7  ;;  %v5936_v60 = vld [vmem:[%s8494_s21 + $0x98] sm:$0xff] }
0x19d2   :  { %v3703_v2 = vrot.slane %v7922_v35, 6  ;;  %v3831_v46 = vrot.slane %v7922_v35, 7  ;;  %v5935_v35 = vld [vmem:[%s8494_s21 + $0x90] sm:$0xff] }
0x19d4   :  { %v3705_v1 = vsel %vm593_vm8, %v3704_v19, %v3703_v2  ;;  %v5934_v19 = vld [vmem:[%s8494_s21 + $0x88] sm:$0xff]  ;;  %v5933_v2 = vld [vmem:[%s8494_s21 + $0x80] sm:$0xff] }
0x19d5   :  { %3706 = vrot.lane.b32.xlu1 %v3705_v1, %s6745_s15  ;;  %v5946_v1 = vld [vmem:[%s8494_s21 + $0xd8] sm:$0xff] }
0x1a47   :  { %v3707_v23 = vpop.permute.xlu1 %3706 }
0x1a48   :  { %6278 = vmatmul.mubr.msk.f32.vlgmr.msra.gmra.mxu1 %vm2749_vm0, %v3707_v23  ;;  %v5945_v23 = vld [vmem:[%s8494_s21 + $0xd0] sm:$0xff] }
0x1a49   :  { %6299 = vmatprep.mubr.msk.f32.mxu1 %vm6739_vm2, %v6738_v6  ;;  %6292 = vmatpush3.msra.mxu1 %v3933_v38 }
0x1a4a   :  { %6293 = vmatprep.subr.mxu1 %v6738_v6 }
0x1a4b   :  { %6294 = vmatpush3.msra.mxu1 %v3932_v54 }
0x1a4c   :  { %6295 = vmatprep.subr.mxu1 %v6738_v6 }
0x1b08   :  { %v3776_v20 = vpop.f32.mrf.mxu1 }
0x1b09   :  { %v3777_v32 = vadd.f32 %v7745_v22, %v3776_v20  ;;  %v5944_v20 = vld [vmem:[%s8494_s21 + $0xc8] sm:$0xff] }
0x1b0a   :  { %v6279_v5 = vpop.f32.mrf.mxu1 }
0x1b0b   :  { %v3781_v37 = vrot.slane %v3777_v32, 1  ;;  %v3782_v56 = vrot.slane %v3777_v32, 2  ;;  %v5943_v32 = vld [vmem:[%s8494_s21 + $0xc0] sm:$0xff]  ;;  %v8054_v5 = vld [vmem:[%s8495_s22 + $0x18] sm:$0xff] }
0x1b0d   :  { %3801 = vrot.lane.b32.xlu1 %v3782_v56, %s6744_s13  ;;  %3799 = vrot.lane.b32.xlu0 %v3781_v37, %s6744_s13  ;;  %v3785_v47 = vadd.f32 %v3781_v37, %v7771_v29  ;;  %v3786_v33 = vadd.f32 %v3782_v56, %v7769_v0  ;;  %v8062_v37 = vld [vmem:[%s8495_s22 + $0x10] sm:$0xff]  ;;  %v8071_v56 = vld [vmem:[%s8495_s22 + $0x8] sm:$0xff] }
0x1b0f   :  { %v5910_v30 = vmul.f32 -1.442695, %v3785_v47  ;;  %v5911_v48 = vmul.f32 -1.442695, %v3786_v33  ;;  %v8078_v47 = vld [vmem:[%s8495_s22] sm:$0xff]  ;;  %v3931_v33 = vld [vmem:[%s8492_s19 + $0x8] sm:$0xff] }
0x1b10   :  { %6296 = vmatpush3.msra.mxu1 %v3931_v33 }
0x1b11   :  { %6656 = vpow2.f32 %v5910_v30  ;;  %v3930_v30 = vld [vmem:[%s8492_s19] sm:$0xff]  ;;  %6297 = vmatprep.subr.mxu1 %v6738_v6 }
0x1b12   :  { %6658 = vpow2.f32 %v5911_v48  ;;  %6298 = vmatpush3.msra.mxu1 %v3930_v30  ;;  %v5912_v48 = vld [vmem:[%s8491_s18] ss:$0 sm:$0xff] }
0x1b13   :  { %6313 = vmatprep.subr.mxu1 %v6738_v6 }
0x1b1e   :  { %v6657_v21 = vpop.eup %6656 }
0x1b1f   :  { %v6659_v26 = vpop.eup %6658  ;;  %v3793_v61 = vadd.f32 1.0, %v6657_v21 }
0x1b20   :  { %v3794_v57 = vadd.f32 1.0, %v6659_v26 }
0x1b21   :  { %6660 = vrcp.f32 %v3793_v61 }
0x1b22   :  { %6662 = vrcp.f32 %v3794_v57 }
0x1b2e   :  { %v6661_v22 = vpop.eup %6660 }
0x1b2f   :  { %v6663_v25 = vpop.eup %6662  ;;  %v3819_v24 = vsub.f32 1.0, %v6661_v22  ;;  %v3835_v40 = vmul.f32 %v6661_v22, %v3831_v46  ;;  %v5951_v46 = vld [vmem:[%s8494_s21 + $0xf8] sm:$0xff] }
0x1b30   :  { %v3820_v53 = vsub.f32 1.0, %v6663_v25  ;;  %v3836_v39 = vmul.f32 %v6663_v25, %v3832_v13  ;;  %v5938_v13 = vld [vmem:[%s8494_s21 + $0xa0] sm:$0xff] }
0x1b7f   :  { %v3802_v58 = vpop.permute.xlu1 %3801  ;;  %v3800_v8 = vpop.permute.xlu0 %3799 }
0x1b80   :  { %v3806_v41 = vmul.f32 %v6663_v25, %v3802_v58  ;;  %v3805_v43 = vmul.f32 %v6661_v22, %v3800_v8  ;;  %v5921_v22 = vld [vmem:[%s8494_s21 + $0x38] sm:$0xff]  ;;  %v5920_v25 = vld [vmem:[%s8494_s21 + $0x30] sm:$0xff]  ;;  %v5919_v58 = vld [vmem:[%s8494_s21 + $0x28] sm:$0xff] }
0x1b82   :  { %3811 = vrot.lane.b32.xlu1 %v3806_v41, %s6744_s13  ;;  %3809 = vrot.lane.b32.xlu0 %v3805_v43, %s6744_s13  ;;  %v5918_v41 = vld [vmem:[%s8494_s21 + $0x20] sm:$0xff] }
0x1bf4   :  { %v3812_v49 = vpop.permute.xlu1 %3811  ;;  %v3810_v4 = vpop.permute.xlu0 %3809 }
0x1bf5   :  { %v3816_v36 = vadd.f32 %v3812_v49, %v7769_v0  ;;  %v3815_v12 = vadd.f32 %v3810_v4, %v7771_v29  ;;  %v3839_v29 = vld [vmem:[%s8490_s17] sm:$0xff]  ;;  %v5931_v49 = vld [vmem:[%s8494_s21 + $0x78] sm:$0xff]  ;;  %v5930_v4 = vld [vmem:[%s8494_s21 + $0x70] sm:$0xff] }
0x1bf6   :  { %6287 = vmatpush3.msra.mxu0 %v3839_v29  ;;  %v5939_v29 = vld [vmem:[%s8494_s21 + $0xa8] sm:$0xff] }
0x1bf7   :  { %6664 = vtanh.f32 %v3816_v36  ;;  %6302 = vmatprep.subr.mxu0 %v6738_v6  ;;  %v5929_v36 = vld [vmem:[%s8494_s21 + $0x68] sm:$0xff] }
0x1bf8   :  { %6666 = vtanh.f32 %v3815_v12 }
0x1c04   :  { %v6665_v0 = vpop.eup %6664 }
0x1c05   :  { %v6667_v16 = vpop.eup %6666  ;;  %3825 = vrot.lane.b32.xlu1 %v6665_v0, %s6745_s15  ;;  %v5940_v0 = vld [vmem:[%s8494_s21 + $0xb0] sm:$0xff] }
0x1c06   :  { %3823 = vrot.lane.b32.xlu0 %v6667_v16, %s6745_s15 }
0x1c77   :  { %v3826_v7 = vpop.permute.xlu1 %3825 }
0x1c78   :  { %v3830_v51 = vmul.f32 %v3826_v7, %v3820_v53  ;;  %v3824_v62 = vpop.permute.xlu0 %3823  ;;  %v5950_v7 = vld [vmem:[%s8494_s21 + $0xf0] sm:$0xff] }
0x1c79   :  { %v3829_v45 = vmul.f32 %v3824_v62, %v3819_v24  ;;  %v5949_v24 = vld [vmem:[%s8494_s21 + $0xe8] sm:$0xff] }
0x1c7a   :  { %v3838_v9 = vadd.f32 %v3836_v39, %v3830_v51  ;;  %v5948_v51 = vld [vmem:[%s8494_s21 + $0xe0] sm:$0xff] }
0x1c7b   :  { %v3837_v18 = vadd.f32 %v3835_v40, %v3829_v45  ;;  %v8198_v40 = vld [vmem:[%s8497_s24] ss:$0 sm:$0xff] }
0x1c7c   :  { %v3853_v50 = vrot.slane %v3838_v9, 6 }
0x1c7d   :  { %v3852_v14 = vrot.slane %v3837_v18, 7 }
0x1c7f   :  { %v3854_v11 = vsel %vm593_vm8, %v3853_v50, %v3852_v14  ;;  %v8215_v50 = vld [vmem:[%s8496_s23] ss:$0 sm:$0xff] }
0x1c80   :  { %3855 = vrot.lane.b32.xlu0 %v3854_v11, %s6745_s15 }
0x1cf2   :  { %v7973_v15 = vpop.permute.xlu0 %3855 }
0x1cf3   :  { %6289 = vmatmul.mubr.msk.f32.vlgmr.msra.gmra.mxu0 %vm2749_vm0, %v7973_v15 }
0x1cf4   :  { %6303 = vmatpush3.msra.mxu0 %v4020_v55  ;;  %6310 = vmatprep.mubr.msk.f32.mxu0 %vm6739_vm2, %v6738_v6 }
0x1cf5   :  { %6304 = vmatprep.subr.mxu0 %v6738_v6 }
0x1cf6   :  { %6305 = vmatpush3.msra.mxu0 %v4019_v42 }
0x1cf7   :  { %6306 = vmatprep.subr.mxu0 %v6738_v6 }
0x1cf8   :  { %6307 = vmatpush3.msra.mxu0 %v4018_v59 }
0x1cf9   :  { %6308 = vmatprep.subr.mxu0 %v6738_v6 }
0x1cfa   :  { %6309 = vmatpush3.msra.mxu0 %v4017_v17  ;;  %v5914_v17 = vld [vmem:[%s8493_s20] ss:$0 sm:$0xff] }
0x1cfb   :  { %6311 = vmatmul.mubr.msk.f32.vlgmr.msra.gmra.mxu0 %vm2749_vm0, %v7973_v15  ;;  %6324 = vmatprep.subr.mxu0 %v6738_v6 }
0x1cfc   :  { %6325 = vmatpush3.msra.mxu0 %v5926_v52  ;;  %6332 = vmatprep.mubr.msk.f32.mxu0 %vm6739_vm2, %v6738_v6 }
0x1cfd   :  { %6326 = vmatprep.subr.mxu0 %v6738_v6 }
0x1cfe   :  { %6327 = vmatpush3.msra.mxu0 %v5925_v34 }
0x1cff   :  { %6328 = vmatprep.subr.mxu0 %v6738_v6 }
0x1d00   :  { %6329 = vmatpush3.msra.mxu0 %v5924_v28 }
0x1d01   :  { %6330 = vmatprep.subr.mxu0 %v6738_v6 }
0x1d02   :  { %6331 = vmatpush3.msra.mxu0 %v5923_v10 }
0x1d03   :  { %6333 = vmatmul.mubr.msk.f32.vlgmr.msra.gmra.mxu0 %vm2749_vm0, %v7973_v15  ;;  %6346 = vmatprep.subr.mxu0 %v6738_v6 }
0x1d04   :  { %6347 = vmatpush3.msra.mxu0 %v5936_v60  ;;  %6354 = vmatprep.mubr.msk.f32.mxu0 %vm6739_vm2, %v6738_v6 }
0x1d05   :  { %6348 = vmatprep.subr.mxu0 %v6738_v6 }
0x1d06   :  { %6349 = vmatpush3.msra.mxu0 %v5935_v35 }
0x1d07   :  { %6350 = vmatprep.subr.mxu0 %v6738_v6 }
0x1d08   :  { %6351 = vmatpush3.msra.mxu0 %v5934_v19 }
0x1d09   :  { %6352 = vmatprep.subr.mxu0 %v6738_v6 }
0x1d0a   :  { %6353 = vmatpush3.msra.mxu0 %v5933_v2 }
0x1d0b   :  { %6355 = vmatmul.mubr.msk.f32.vlgmr.msra.gmra.mxu0 %vm2749_vm0, %v7973_v15  ;;  %6368 = vmatprep.subr.mxu0 %v6738_v6 }
0x1d0c   :  { %6369 = vmatpush3.msra.mxu0 %v5946_v1  ;;  %6376 = vmatprep.mubr.msk.f32.mxu0 %vm6739_vm2, %v6738_v6 }
0x1d0d   :  { %6370 = vmatprep.subr.mxu0 %v6738_v6 }
0x1d0e   :  { %6371 = vmatpush3.msra.mxu0 %v5945_v23 }
0x1d0f   :  { %6372 = vmatprep.subr.mxu0 %v6738_v6 }
0x1d10   :  { %6373 = vmatpush3.msra.mxu0 %v5944_v20 }
0x1d11   :  { %6374 = vmatprep.subr.mxu0 %v6738_v6 }
0x1d12   :  { %6375 = vmatpush3.msra.mxu0 %v5943_v32 }
0x1d13   :  { %6377 = vmatmul.mubr.msk.f32.vlgmr.msra.gmra.mxu0 %vm2749_vm0, %v7973_v15  ;;  %6390 = vmatprep.subr.mxu0 %v6738_v6 }
0x1d14   :  { %6391 = vmatpush3.msra.mxu0 %v8054_v5  ;;  %6398 = vmatprep.mubr.msk.f32.mxu0 %vm6739_vm2, %v6738_v6 }
0x1d15   :  { %6392 = vmatprep.subr.mxu0 %v6738_v6 }
0x1d16   :  { %6393 = vmatpush3.msra.mxu0 %v8062_v37 }
0x1d17   :  { %6394 = vmatprep.subr.mxu0 %v6738_v6 }
0x1d18   :  { %6395 = vmatpush3.msra.mxu0 %v8071_v56 }
0x1d19   :  { %6396 = vmatprep.subr.mxu0 %v6738_v6 }
0x1d1a   :  { %6397 = vmatpush3.msra.mxu0 %v8078_v47 }
0x1d1b   :  { %6399 = vmatmul.mubr.f32.vlgmr.msra.gmra.mxu0 %v6738_v6  ;;  %6412 = vmatprep.subr.mxu0 %v6738_v6 }
0x1d1c   :  { %6413 = vmatpush3.msra.mxu0 %v8054_v5  ;;  %6420 = vmatprep.mubr.msk.f32.mxu0 %vm6739_vm2, %v6738_v6 }
0x1d1d   :  { %6414 = vmatprep.subr.mxu0 %v6738_v6 }
0x1d1e   :  { %6415 = vmatpush3.msra.mxu0 %v8062_v37 }
0x1d1f   :  { %6416 = vmatprep.subr.mxu0 %v6738_v6 }
0x1d20   :  { %6417 = vmatpush3.msra.mxu0 %v8071_v56 }
0x1d21   :  { %6418 = vmatprep.subr.mxu0 %v6738_v6 }
0x1d22   :  { %6419 = vmatpush3.msra.mxu0 %v8078_v47 }
0x1d23   :  { %6434 = vmatprep.subr.mxu0 %v6738_v6 }
0x1db3   :  { %v3925_v21 = vpop.f32.mrf.mxu0 }
0x1db4   :  { %v3926_v26 = vadd.f32 %v5912_v48, %v3925_v21 }
0x1db5   :  { %v6290_v61 = vpop.f32.mrf.mxu0 }
0x1db6   :  { %v3929_v57 = vmax.f32 %v3926_v26, 0.0 }
0x1db8   :  { %6300 = vmatmul.mubr.msk.f32.vlgmr.msra.gmra.mxu1 %vm2749_vm0, %v3929_v57 }
0x1db9   :  { %6314 = vmatpush3.msra.mxu1 %v5921_v22  ;;  %6321 = vmatprep.mubr.msk.f32.mxu1 %vm6739_vm2, %v6738_v6 }
0x1dba   :  { %6315 = vmatprep.subr.mxu1 %v6738_v6 }
0x1dbb   :  { %v8119_v8 = vpop.f32.mrf.mxu0  ;;  %6316 = vmatpush3.msra.mxu1 %v5920_v25 }
0x1dbc   :  { %6317 = vmatprep.subr.mxu1 %v6738_v6  ;;  %v4094_v14 = vadd.f32 %v8215_v50, %v8119_v8 }
0x1dbd   :  { %v6312_v43 = vpop.f32.mrf.mxu0  ;;  %6318 = vmatpush3.msra.mxu1 %v5919_v58 }
0x1dbe   :  { %6319 = vmatprep.subr.mxu1 %v6738_v6 }
0x1dbf   :  { %6320 = vmatpush3.msra.mxu1 %v5918_v41 }
0x1dc0   :  { %6322 = vmatmul.mubr.msk.f32.vlgmr.msra.gmra.mxu1 %vm2749_vm0, %v7973_v15  ;;  %6335 = vmatprep.subr.mxu1 %v6738_v6 }
0x1dc1   :  { %6336 = vmatpush3.msra.mxu1 %v5931_v49  ;;  %6343 = vmatprep.mubr.msk.f32.mxu1 %vm6739_vm2, %v6738_v6 }
0x1dc2   :  { %6337 = vmatprep.subr.mxu1 %v6738_v6 }
0x1dc3   :  { %v8141_v12 = vpop.f32.mrf.mxu0  ;;  %6338 = vmatpush3.msra.mxu1 %v5930_v4 }
0x1dc4   :  { %6339 = vmatprep.subr.mxu1 %v6738_v6 }
0x1dc5   :  { %v6334_v63 = vpop.f32.mrf.mxu0  ;;  %6340 = vmatpush3.msra.mxu1 %v5929_v36 }
0x1dc6   :  { %6341 = vmatprep.subr.mxu1 %v6738_v6 }
0x1dc7   :  { %6342 = vmatpush3.msra.mxu1 %v5928_v31 }
0x1dc8   :  { %6344 = vmatmul.mubr.msk.f32.vlgmr.msra.gmra.mxu1 %vm2749_vm0, %v7973_v15  ;;  %6357 = vmatprep.subr.mxu1 %v6738_v6 }
0x1dc9   :  { %6358 = vmatpush3.msra.mxu1 %v5941_v3  ;;  %6365 = vmatprep.mubr.msk.f32.mxu1 %vm6739_vm2, %v6738_v6 }
0x1dca   :  { %6359 = vmatprep.subr.mxu1 %v6738_v6 }
0x1dcb   :  { %v8163_v16 = vpop.f32.mrf.mxu0  ;;  %6360 = vmatpush3.msra.mxu1 %v5940_v0 }
0x1dcc   :  { %6361 = vmatprep.subr.mxu1 %v6738_v6 }
0x1dcd   :  { %v6356_v53 = vpop.f32.mrf.mxu0  ;;  %6362 = vmatpush3.msra.mxu1 %v5939_v29 }
0x1dce   :  { %6363 = vmatprep.subr.mxu1 %v6738_v6 }
0x1dcf   :  { %6364 = vmatpush3.msra.mxu1 %v5938_v13 }
0x1dd0   :  { %6366 = vmatmul.mubr.msk.f32.vlgmr.msra.gmra.mxu1 %vm2749_vm0, %v7973_v15  ;;  %6379 = vmatprep.subr.mxu1 %v6738_v6 }
0x1dd1   :  { %6380 = vmatpush3.msra.mxu1 %v5951_v46  ;;  %6387 = vmatprep.mubr.msk.f32.mxu1 %vm6739_vm2, %v6738_v6 }
0x1dd2   :  { %6381 = vmatprep.subr.mxu1 %v6738_v6 }
0x1dd3   :  { %v8185_v39 = vpop.f32.mrf.mxu0  ;;  %6382 = vmatpush3.msra.mxu1 %v5950_v7 }
0x1dd4   :  { %6383 = vmatprep.subr.mxu1 %v6738_v6 }
0x1dd5   :  { %v6378_v62 = vpop.f32.mrf.mxu0  ;;  %6384 = vmatpush3.msra.mxu1 %v5949_v24 }
0x1dd6   :  { %6385 = vmatprep.subr.mxu1 %v6738_v6 }
0x1dd7   :  { %6386 = vmatpush3.msra.mxu1 %v5948_v51 }
0x1dd8   :  { %6388 = vmatmul.mubr.msk.f32.vlgmr.msra.gmra.mxu1 %vm2749_vm0, %v7973_v15  ;;  %6401 = vmatprep.subr.mxu1 %v6738_v6 }
0x1dd9   :  { %6402 = vmatpush3.msra.mxu1 %v8054_v5  ;;  %6409 = vmatprep.mubr.msk.f32.mxu1 %vm6739_vm2, %v6738_v6 }
0x1dda   :  { %6403 = vmatprep.subr.mxu1 %v6738_v6 }
0x1ddb   :  { %v4699_v45 = vpop.f32.mrf.mxu0  ;;  %6404 = vmatpush3.msra.mxu1 %v8062_v37 }
0x1ddc   :  { %v4700_v9 = vadd.f32 %v8198_v40, %v4699_v45  ;;  %6405 = vmatprep.subr.mxu1 %v6738_v6 }
0x1ddd   :  { %v6400_v18 = vpop.f32.mrf.mxu0  ;;  %6406 = vmatpush3.msra.mxu1 %v8071_v56 }
0x1dde   :  { %4711 = vrot.lane.b32.xlu1 %v4700_v9, %s6744_s13  ;;  %6407 = vmatprep.subr.mxu1 %v6738_v6  ;;  %v4703_v11 = vadd.f32 %v4700_v9, %v4094_v14 }
0x1ddf   :  { %6408 = vmatpush3.msra.mxu1 %v8078_v47 }
0x1de0   :  { %6423 = vmatprep.subr.mxu1 %v6738_v6  ;;  %v5954_v38 = vmul.f32 -1.442695, %v4703_v11 }
0x1de2   :  { %6668 = vpow2.f32 %v5954_v38 }
0x1def   :  { %v6669_v54 = vpop.eup %6668 }
0x1df0   :  { %v4707_v55 = vadd.f32 1.0, %v6669_v54 }
0x1df2   :  { %6670 = vrcp.f32 %v4707_v55 }
0x1dff   :  { %v6671_v15 = vpop.eup %6670 }
0x1e00   :  { %v4721_v48 = vsub.f32 1.0, %v6671_v15  ;;  %v4727_v26 = vmul.f32 0.0, %v6671_v15 }
0x1e50   :  { %v4712_v42 = vpop.permute.xlu1 %4711 }
0x1e51   :  { %v4714_v59 = vmul.f32 %v6671_v15, %v4712_v42 }
0x1e53   :  { %4716 = vrot.lane.b32.xlu0 %v4714_v59, %s6744_s13 }
0x1e78   :  { %v4010_v52 = vpop.f32.mrf.mxu1 }
0x1e79   :  { %v4011_v34 = vadd.f32 %v5914_v17, %v4010_v52 }
0x1e7a   :  { %v6301_v28 = vpop.f32.mrf.mxu1 }
0x1e7b   :  { %4015 = vst.msk [vmem:[#allocation3] sm:$0x3] %vm4014_vm3, %v4011_v34 }
0x1e80   :  { %v4168_v10 = vpop.f32.mrf.mxu1 }
0x1e81   :  { %v4169_v41 = vadd.f32 %v8215_v50, %v4168_v10 }
0x1e82   :  { %v6323_v60 = vpop.f32.mrf.mxu1 }
0x1e88   :  { %v8223_v35 = vpop.f32.mrf.mxu1 }
0x1e8a   :  { %v6345_v19 = vpop.f32.mrf.mxu1 }
0x1e90   :  { %v8225_v2 = vpop.f32.mrf.mxu1 }
0x1e92   :  { %v6367_v1 = vpop.f32.mrf.mxu1 }
0x1e98   :  { %v8227_v23 = vpop.f32.mrf.mxu1 }
0x1e9a   :  { %v6389_v20 = vpop.f32.mrf.mxu1 }
0x1ec5   :  { %v4717_v32 = vpop.permute.xlu0 %4716 }
0x1ec6   :  { %v4719_v33 = vadd.f32 %v4717_v32, %v4094_v14  ;;  %v4244_v14 = vadd.f32 %v8215_v50, %v8141_v12 }
0x1ec8   :  { %6672 = vtanh.f32 %v4719_v33 }
0x1ed5   :  { %v6673_v30 = vpop.eup %6672 }
0x1ed6   :  { %4723 = vrot.lane.b32.xlu1 %v6673_v30, %s6745_s15  ;;  %v4319_v30 = vadd.f32 %v8215_v50, %v8223_v35 }
0x1f48   :  { %v4724_v21 = vpop.permute.xlu1 %4723 }
0x1f49   :  { %v4726_v61 = vmul.f32 %v4724_v21, %v4721_v48 }
0x1f4b   :  { %v8230_v57 = vadd.f32 %v4727_v26, %v4726_v61 }
0x1f4d   :  { %4769 = vrot.lane.b32.xlu0 %v8230_v57, %s6745_s15 }
0x1fbf   :  { %v4770_v22 = vpop.permute.xlu0 %4769 }
0x1fc0   :  { %6410 = vmatmul.mubr.msk.f32.vlgmr.msra.gmra.mxu1 %vm2749_vm0, %v4770_v22 }
0x1fc1   :  { %6424 = vmatpush3.msra.mxu1 %v8054_v5  ;;  %6431 = vmatprep.mubr.msk.f32.mxu1 %vm6739_vm2, %v6738_v6 }
0x1fc2   :  { %6425 = vmatprep.subr.mxu1 %v6738_v6 }
0x1fc3   :  { %6426 = vmatpush3.msra.mxu1 %v8062_v37 }
0x1fc4   :  { %6427 = vmatprep.subr.mxu1 %v6738_v6 }
0x1fc5   :  { %6428 = vmatpush3.msra.mxu1 %v8071_v56 }
0x1fc6   :  { %6429 = vmatprep.subr.mxu1 %v6738_v6 }
0x1fc7   :  { %6430 = vmatpush3.msra.mxu1 %v8078_v47 }
0x1fc8   :  { %6445 = vmatprep.subr.mxu1 %v6738_v6 }
0x2080   :  { %v4839_v25 = vpop.f32.mrf.mxu1 }
0x2081   :  { %v4840_v58 = vadd.f32 %v8198_v40, %v4839_v25 }
0x2082   :  { %v6411_v8 = vpop.f32.mrf.mxu1 }
0x2083   :  { %4851 = vrot.lane.b32.xlu1 %v4840_v58, %s6744_s13  ;;  %v4843_v43 = vadd.f32 %v4840_v58, %v4169_v41 }
0x2085   :  { %v5956_v49 = vmul.f32 -1.442695, %v4843_v43 }
0x2087   :  { %6674 = vpow2.f32 %v5956_v49 }
0x2094   :  { %v6675_v4 = vpop.eup %6674 }
0x2095   :  { %v4847_v36 = vadd.f32 1.0, %v6675_v4 }
0x2097   :  { %6676 = vrcp.f32 %v4847_v36 }
0x20a4   :  { %v6677_v31 = vpop.eup %6676 }
0x20a5   :  { %v4861_v53 = vsub.f32 1.0, %v6677_v31  ;;  %v4867_v7 = vmul.f32 %v6677_v31, %v8230_v57 }
0x20f5   :  { %v4852_v63 = vpop.permute.xlu1 %4851 }
0x20f6   :  { %v4854_v3 = vmul.f32 %v6677_v31, %v4852_v63 }
0x20f8   :  { %4856 = vrot.lane.b32.xlu0 %v4854_v3, %s6744_s13 }
0x216a   :  { %v4857_v0 = vpop.permute.xlu0 %4856 }
0x216b   :  { %v4859_v29 = vadd.f32 %v4857_v0, %v4169_v41 }
0x216d   :  { %6678 = vtanh.f32 %v4859_v29 }
0x217a   :  { %v6679_v13 = vpop.eup %6678 }
0x217b   :  { %4863 = vrot.lane.b32.xlu1 %v6679_v13, %s6745_s15  ;;  %v4394_v13 = vadd.f32 %v8215_v50, %v8163_v16 }
0x21ed   :  { %v4864_v46 = vpop.permute.xlu1 %4863 }
0x21ee   :  { %v4866_v24 = vmul.f32 %v4864_v46, %v4861_v53 }
0x21f0   :  { %v8251_v51 = vadd.f32 %v4867_v7, %v4866_v24 }
0x21f2   :  { %4908 = vrot.lane.b32.xlu0 %v8251_v51, %s6745_s15 }
0x2264   :  { %v4909_v62 = vpop.permute.xlu0 %4908 }
0x2265   :  { %6421 = vmatmul.mubr.msk.f32.vlgmr.msra.gmra.mxu0 %vm2749_vm0, %v4909_v62 }
0x2266   :  { %6435 = vmatpush3.msra.mxu0 %v8054_v5  ;;  %6442 = vmatprep.mubr.msk.f32.mxu0 %vm6739_vm2, %v6738_v6 }
0x2267   :  { %6436 = vmatprep.subr.mxu0 %v6738_v6 }
0x2268   :  { %6437 = vmatpush3.msra.mxu0 %v8062_v37 }
0x2269   :  { %6438 = vmatprep.subr.mxu0 %v6738_v6 }
0x226a   :  { %6439 = vmatpush3.msra.mxu0 %v8071_v56 }
0x226b   :  { %6440 = vmatprep.subr.mxu0 %v6738_v6 }
0x226c   :  { %6441 = vmatpush3.msra.mxu0 %v8078_v47 }
0x226d   :  { %6456 = vmatprep.subr.mxu0 %v6738_v6 }
0x2325   :  { %v4978_v45 = vpop.f32.mrf.mxu0 }
0x2326   :  { %v4979_v9 = vadd.f32 %v8198_v40, %v4978_v45 }
0x2327   :  { %v6422_v18 = vpop.f32.mrf.mxu0 }
0x2328   :  { %4990 = vrot.lane.b32.xlu1 %v4979_v9, %s6744_s13  ;;  %v4982_v11 = vadd.f32 %v4979_v9, %v4244_v14 }
0x232a   :  { %v5958_v38 = vmul.f32 -1.442695, %v4982_v11 }
0x232c   :  { %6680 = vpow2.f32 %v5958_v38 }
0x2339   :  { %v6681_v54 = vpop.eup %6680 }
0x233a   :  { %v4986_v55 = vadd.f32 1.0, %v6681_v54 }
0x233c   :  { %6682 = vrcp.f32 %v4986_v55 }
0x2349   :  { %v6683_v15 = vpop.eup %6682 }
0x234a   :  { %v5000_v28 = vsub.f32 1.0, %v6683_v15  ;;  %v5006_v12 = vmul.f32 %v6683_v15, %v8251_v51 }
0x239a   :  { %v4991_v42 = vpop.permute.xlu1 %4990 }
0x239b   :  { %v4993_v59 = vmul.f32 %v6683_v15, %v4991_v42 }
0x239d   :  { %4995 = vrot.lane.b32.xlu0 %v4993_v59, %s6744_s13 }
0x240f   :  { %v4996_v17 = vpop.permute.xlu0 %4995 }
0x2410   :  { %v4998_v52 = vadd.f32 %v4996_v17, %v4244_v14 }
0x2412   :  { %6684 = vtanh.f32 %v4998_v52 }
0x241f   :  { %v6685_v34 = vpop.eup %6684 }
0x2420   :  { %5002 = vrot.lane.b32.xlu1 %v6685_v34, %s6745_s15 }
0x2492   :  { %v5003_v10 = vpop.permute.xlu1 %5002 }
0x2493   :  { %v5005_v60 = vmul.f32 %v5003_v10, %v5000_v28 }
0x2495   :  { %v8273_v19 = vadd.f32 %v5006_v12, %v5005_v60 }
0x2497   :  { %5047 = vrot.lane.b32.xlu0 %v8273_v19, %s6745_s15 }
0x2509   :  { %v5048_v1 = vpop.permute.xlu0 %5047 }
0x250a   :  { %6432 = vmatmul.mubr.msk.f32.vlgmr.msra.gmra.mxu1 %vm2749_vm0, %v5048_v1 }
0x250b   :  { %6446 = vmatpush3.msra.mxu1 %v8054_v5  ;;  %6453 = vmatprep.mubr.msk.f32.mxu1 %vm6739_vm2, %v6738_v6 }
0x250c   :  { %6447 = vmatprep.subr.mxu1 %v6738_v6 }
0x250d   :  { %6448 = vmatpush3.msra.mxu1 %v8062_v37 }
0x250e   :  { %6449 = vmatprep.subr.mxu1 %v6738_v6 }
0x250f   :  { %6450 = vmatpush3.msra.mxu1 %v8071_v56 }
0x2510   :  { %6451 = vmatprep.subr.mxu1 %v6738_v6 }
0x2511   :  { %6452 = vmatpush3.msra.mxu1 %v8078_v47 }
0x2512   :  { %6467 = vmatprep.subr.mxu1 %v6738_v6 }
0x25ca   :  { %v5117_v20 = vpop.f32.mrf.mxu1 }
0x25cb   :  { %v5118_v32 = vadd.f32 %v8198_v40, %v5117_v20 }
0x25cc   :  { %v6433_v33 = vpop.f32.mrf.mxu1 }
0x25cd   :  { %5129 = vrot.lane.b32.xlu1 %v5118_v32, %s6744_s13  ;;  %v5121_v48 = vadd.f32 %v5118_v32, %v4319_v30 }
0x25cf   :  { %v5960_v21 = vmul.f32 -1.442695, %v5121_v48 }
0x25d1   :  { %6686 = vpow2.f32 %v5960_v21 }
0x25de   :  { %v6687_v26 = vpop.eup %6686 }
0x25df   :  { %v5125_v61 = vadd.f32 1.0, %v6687_v26 }
0x25e1   :  { %6688 = vrcp.f32 %v5125_v61 }
0x25ee   :  { %v6689_v22 = vpop.eup %6688 }
0x25ef   :  { %v5139_v49 = vsub.f32 1.0, %v6689_v22  ;;  %v5145_v35 = vmul.f32 %v6689_v22, %v8273_v19 }
0x263f   :  { %v5130_v25 = vpop.permute.xlu1 %5129 }
0x2640   :  { %v5132_v58 = vmul.f32 %v6689_v22, %v5130_v25  ;;  %v4544_v22 = vadd.f32 %v8215_v50, %v8185_v39 }
0x2642   :  { %5134 = vrot.lane.b32.xlu0 %v5132_v58, %s6744_s13 }
0x26b4   :  { %v5135_v8 = vpop.permute.xlu0 %5134 }
0x26b5   :  { %v5137_v41 = vadd.f32 %v5135_v8, %v4319_v30 }
0x26b7   :  { %6690 = vtanh.f32 %v5137_v41 }
0x26c4   :  { %v6691_v43 = vpop.eup %6690 }
0x26c5   :  { %5141 = vrot.lane.b32.xlu1 %v6691_v43, %s6745_s15 }
0x2737   :  { %v5142_v4 = vpop.permute.xlu1 %5141 }
0x2738   :  { %v5144_v36 = vmul.f32 %v5142_v4, %v5139_v49 }
0x273a   :  { %v8295_v31 = vadd.f32 %v5145_v35, %v5144_v36 }
0x273c   :  { %5186 = vrot.lane.b32.xlu0 %v8295_v31, %s6745_s15 }
0x27ae   :  { %v5187_v63 = vpop.permute.xlu0 %5186 }
0x27af   :  { %6443 = vmatmul.mubr.msk.f32.vlgmr.msra.gmra.mxu0 %vm2749_vm0, %v5187_v63 }
0x27b0   :  { %6457 = vmatpush3.msra.mxu0 %v8054_v5  ;;  %6464 = vmatprep.mubr.msk.f32.mxu0 %vm6739_vm2, %v6738_v6 }
0x27b1   :  { %6458 = vmatprep.subr.mxu0 %v6738_v6 }
0x27b2   :  { %6459 = vmatpush3.msra.mxu0 %v8062_v37 }
0x27b3   :  { %6460 = vmatprep.subr.mxu0 %v6738_v6 }
0x27b4   :  { %6461 = vmatpush3.msra.mxu0 %v8071_v56 }
0x27b5   :  { %6462 = vmatprep.subr.mxu0 %v6738_v6 }
0x27b6   :  { %6463 = vmatpush3.msra.mxu0 %v8078_v47 }
0x286f   :  { %v5256_v3 = vpop.f32.mrf.mxu0 }
0x2870   :  { %v5257_v0 = vadd.f32 %v8198_v40, %v5256_v3 }
0x2871   :  { %v6444_v29 = vpop.f32.mrf.mxu0 }
0x2872   :  { %5268 = vrot.lane.b32.xlu1 %v5257_v0, %s6744_s13  ;;  %v5260_v53 = vadd.f32 %v5257_v0, %v4394_v13 }
0x2874   :  { %v5962_v46 = vmul.f32 -1.442695, %v5260_v53 }
0x2876   :  { %6692 = vpow2.f32 %v5962_v46 }
0x2883   :  { %v6693_v7 = vpop.eup %6692 }
0x2884   :  { %v5264_v24 = vadd.f32 1.0, %v6693_v7 }
0x2886   :  { %6694 = vrcp.f32 %v5264_v24 }
0x2893   :  { %v6695_v62 = vpop.eup %6694 }
0x2894   :  { %v5278_v38 = vsub.f32 1.0, %v6695_v62  ;;  %v5284_v16 = vmul.f32 %v6695_v62, %v8295_v31 }
0x28e4   :  { %v5269_v45 = vpop.permute.xlu1 %5268 }
0x28e5   :  { %v5271_v9 = vmul.f32 %v6695_v62, %v5269_v45  ;;  %v4619_v62 = vadd.f32 %v8215_v50, %v8227_v23 }
0x28e7   :  { %5273 = vrot.lane.b32.xlu0 %v5271_v9, %s6744_s13 }
0x2959   :  { %v5274_v18 = vpop.permute.xlu0 %5273 }
0x295a   :  { %v5276_v14 = vadd.f32 %v5274_v18, %v4394_v13 }
0x295c   :  { %6696 = vtanh.f32 %v5276_v14 }
0x2969   :  { %v6697_v11 = vpop.eup %6696 }
0x296a   :  { %5280 = vrot.lane.b32.xlu1 %v6697_v11, %s6745_s15  ;;  %v4736_v11 = vrot.slane %v8230_v57, %v6992_v44 }
0x29dc   :  { %v5281_v54 = vpop.permute.xlu1 %5280 }
0x29dd   :  { %v5283_v55 = vmul.f32 %v5281_v54, %v5278_v38 }
0x29df   :  { %v8316_v15 = vadd.f32 %v5284_v16, %v5283_v55  ;;  %v5015_v16 = vrot.slane %v8273_v19, %v6992_v44 }
0x29e1   :  { %5325 = vrot.lane.b32.xlu0 %v8316_v15, %s6745_s15  ;;  %v5293_v23 = vrot.slane %v8316_v15, %v6992_v44 }
0x29e3   :  { %v5301_v57 = vrot.slane %v5293_v23, %v6992_v44 }
0x2a53   :  { %v5326_v42 = vpop.permute.xlu0 %5325 }
0x2a54   :  { %6454 = vmatmul.mubr.msk.f32.vlgmr.msra.gmra.mxu1 %vm2749_vm0, %v5326_v42 }
0x2a55   :  { %6468 = vmatpush3.msra.mxu1 %v8054_v5  ;;  %6475 = vmatprep.mubr.msk.f32.mxu1 %vm6739_vm2, %v6738_v6  ;;  %v4469_v5 = vadd.f32 %v8215_v50, %v8225_v2  ;;  %v5023_v50 = vrot.slane %v5015_v16, %v6992_v44  ;;  %vm4766_vm2 = vcmask 253952  }
0x2a56   :  { %6469 = vmatprep.subr.mxu1 %v6738_v6 }
0x2a57   :  { %6470 = vmatpush3.msra.mxu1 %v8062_v37  ;;  %v5034_v19 = vrot.slane %v5023_v50, %v6964_v27 }
0x2a58   :  { %6471 = vmatprep.subr.mxu1 %v6738_v6 }
0x2a59   :  { %6472 = vmatpush3.msra.mxu1 %v8071_v56 }
0x2a5a   :  { %6473 = vmatprep.subr.mxu1 %v6738_v6 }
0x2a5b   :  { %6474 = vmatpush3.msra.mxu1 %v8078_v47 }
0x2b14   :  { %v5395_v59 = vpop.f32.mrf.mxu1 }
0x2b15   :  { %v5396_v17 = vadd.f32 %v8198_v40, %v5395_v59 }
0x2b16   :  { %v6455_v52 = vpop.f32.mrf.mxu1 }
0x2b17   :  { %5407 = vrot.lane.b32.xlu1 %v5396_v17, %s6744_s13  ;;  %v5399_v34 = vadd.f32 %v5396_v17, %v4469_v5  ;;  %v4737_v17 = vcombine.high %v4736_v11, %v4736_v11 }
0x2b19   :  { %v5964_v28 = vmul.f32 -1.442695, %v5399_v34 }
0x2b1b   :  { %6698 = vpow2.f32 %v5964_v28  ;;  %v4751_v28 = vrot.slane %v4737_v17, %v6992_v44 }
0x2b28   :  { %v6699_v37 = vpop.eup %6698 }
0x2b29   :  { %v5403_v10 = vadd.f32 1.0, %v6699_v37  ;;  %v5294_v37 = vcombine.high %v5293_v23, %v5293_v23 }
0x2b2b   :  { %6700 = vrcp.f32 %v5403_v10  ;;  %v4759_v10 = vrot.slane %v4751_v28, %v6964_v27 }
0x2b38   :  { %v6701_v56 = vpop.eup %6700 }
0x2b39   :  { %v5417_v20 = vsub.f32 1.0, %v6701_v56  ;;  %v5423_v2 = vmul.f32 %v6701_v56, %v8316_v15  ;;  %v5016_v15 = vcombine.high %v5015_v16, %v5015_v16  ;;  %v5745_v16 = vld [vmem:[%s8498_s25 + $0x8] sm:$0xff] }
0x2b89   :  { %v5408_v12 = vpop.permute.xlu1 %5407 }
0x2b8a   :  { %v5410_v6 = vmul.f32 %v6701_v56, %v5408_v12  ;;  %v5030_v56 = vrot.slane %v5016_v15, %v6992_v44 }
0x2b8c   :  { %5412 = vrot.lane.b32.xlu0 %v5410_v6, %s6744_s13  ;;  %v5038_v6 = vrot.slane %v5030_v56, %v6964_v27 }
0x2bfe   :  { %v5413_v47 = vpop.permute.xlu0 %5412 }
0x2bff   :  { %v5415_v60 = vadd.f32 %v5413_v47, %v4469_v5  ;;  %v5312_v5 = vrot.slane %v5301_v57, %v6964_v27  ;;  %v5308_v47 = vrot.slane %v5294_v37, %v6992_v44 }
0x2c01   :  { %6702 = vtanh.f32 %v5415_v60  ;;  %v5316_v60 = vrot.slane %v5308_v47, %v6964_v27 }
0x2c0e   :  { %v6703_v1 = vpop.eup %6702 }
0x2c0f   :  { %5419 = vrot.lane.b32.xlu1 %v6703_v1, %s6745_s15 }
0x2c81   :  { %v5420_v32 = vpop.permute.xlu1 %5419 }
0x2c82   :  { %v5422_v33 = vmul.f32 %v5420_v32, %v5417_v20 }
0x2c84   :  { %v8337_v30 = vadd.f32 %v5423_v2, %v5422_v33 }
0x2c86   :  { %5464 = vrot.lane.b32.xlu0 %v8337_v30, %s6745_s15 }
0x2cf8   :  { %v5465_v48 = vpop.permute.xlu0 %5464 }
0x2cf9   :  { %6465 = vmatmul.mubr.msk.f32.vlgmr.msra.gmra.mxu0 %vm2749_vm0, %v5465_v48 }
0x2db9   :  { %v5534_v21 = vpop.f32.mrf.mxu0 }
0x2dba   :  { %v5535_v26 = vadd.f32 %v8198_v40, %v5534_v21  ;;  %v4876_v21 = vrot.slane %v8251_v51, %v6992_v44 }
0x2dbb   :  { %v6466_v61 = vpop.f32.mrf.mxu0 }
0x2dbc   :  { %5546 = vrot.lane.b32.xlu1 %v5535_v26, %s6744_s13  ;;  %v5538_v25 = vadd.f32 %v5535_v26, %v4544_v22  ;;  %v4884_v61 = vrot.slane %v4876_v21, %v6992_v44 }
0x2dbe   :  { %v5966_v58 = vmul.f32 -1.442695, %v5538_v25  ;;  %v4895_v51 = vrot.slane %v4884_v61, %v6964_v27 }
0x2dc0   :  { %6704 = vpow2.f32 %v5966_v58 }
0x2dcd   :  { %v6705_v8 = vpop.eup %6704 }
0x2dce   :  { %v5542_v41 = vadd.f32 1.0, %v6705_v8 }
0x2dd0   :  { %6706 = vrcp.f32 %v5542_v41  ;;  %v5432_v41 = vrot.slane %v8337_v30, %v6992_v44 }
0x2ddd   :  { %v6707_v43 = vpop.eup %6706 }
0x2dde   :  { %v5556_v3 = vsub.f32 1.0, %v6707_v43  ;;  %v5562_v39 = vmul.f32 %v6707_v43, %v8337_v30 }
0x2e2e   :  { %v5547_v49 = vpop.permute.xlu1 %5546 }
0x2e2f   :  { %v5549_v4 = vmul.f32 %v6707_v43, %v5547_v49  ;;  %v4877_v49 = vcombine.high %v4876_v21, %v4876_v21 }
0x2e31   :  { %5551 = vrot.lane.b32.xlu0 %v5549_v4, %s6744_s13 }
0x2ea3   :  { %v5552_v35 = vpop.permute.xlu0 %5551 }
0x2ea4   :  { %v5554_v36 = vadd.f32 %v5552_v35, %v4544_v22  ;;  %v5154_v22 = vrot.slane %v8295_v31, %v6992_v44  ;;  %v5440_v31 = vrot.slane %v5432_v41, %v6992_v44 }
0x2ea6   :  { %6708 = vtanh.f32 %v5554_v36  ;;  %v5162_v8 = vrot.slane %v5154_v22, %v6992_v44  ;;  %v5155_v36 = vcombine.high %v5154_v22, %v5154_v22  ;;  %v5451_v30 = vrot.slane %v5440_v31, %v6964_v27 }
0x2ea8   :  { %v5173_v4 = vrot.slane %v5162_v8, %v6964_v27 }
0x2eb3   :  { %v6709_v63 = vpop.eup %6708 }
0x2eb4   :  { %5558 = vrot.lane.b32.xlu1 %v6709_v63, %s6745_s15  ;;  %v4891_v63 = vrot.slane %v4877_v49, %v6992_v44 }
0x2f26   :  { %v5559_v0 = vpop.permute.xlu1 %5558 }
0x2f27   :  { %v5561_v29 = vmul.f32 %v5559_v0, %v5556_v3  ;;  %v5433_v0 = vcombine.high %v5432_v41, %v5432_v41 }
0x2f29   :  { %v8349_v13 = vadd.f32 %v5562_v39, %v5561_v29  ;;  %v4899_v39 = vrot.slane %v4891_v63, %v6964_v27  ;;  %v5169_v29 = vrot.slane %v5155_v36, %v6992_v44 }
0x2f2b   :  { %5603 = vrot.lane.b32.xlu0 %v8349_v13, %s6745_s15  ;;  %v5571_v59 = vrot.slane %v8349_v13, %v6992_v44 }
0x2f2d   :  { %v5579_v52 = vrot.slane %v5571_v59, %v6992_v44  ;;  %v5572_v12 = vcombine.high %v5571_v59, %v5571_v59 }
0x2f2f   :  { %v5590_v34 = vrot.slane %v5579_v52, %v6964_v27  ;;  %v5586_v1 = vrot.slane %v5572_v12, %v6992_v44 }
0x2f31   :  { %v5594_v20 = vrot.slane %v5586_v1, %v6964_v27 }
0x2f9d   :  { %v5604_v53 = vpop.permute.xlu0 %5603 }
0x2f9e   :  { %6476 = vmatmul.mubr.msk.f32.vlgmr.msra.gmra.mxu1 %vm2749_vm0, %v5604_v53 }
0x305e   :  { %v5673_v46 = vpop.f32.mrf.mxu1 }
0x305f   :  { %v5674_v7 = vadd.f32 %v8198_v40, %v5673_v46  ;;  %v4744_v40 = vrot.slane %v4736_v11, %v6992_v44  ;;  %v5177_v46 = vrot.slane %v5169_v29, %v6964_v27  ;;  %v5746_v11 = vld [vmem:[%s8498_s25 + $0x10] sm:$0xff] }
0x3060   :  { %v6477_v24 = vpop.f32.mrf.mxu1 }
0x3061   :  { %5685 = vrot.lane.b32.xlu1 %v5674_v7, %s6744_s13  ;;  %v5677_v45 = vadd.f32 %v5674_v7, %v4619_v62  ;;  %v4755_v42 = vrot.slane %v4744_v40, %v6964_v27  ;;  %v5447_v7 = vrot.slane %v5433_v0, %v6992_v44 }
0x3063   :  { %v5968_v9 = vmul.f32 -1.442695, %v5677_v45  ;;  %v5455_v24 = vrot.slane %v5447_v7, %v6964_v27 }
0x3065   :  { %6710 = vpow2.f32 %v5968_v9 }
0x3072   :  { %v6711_v18 = vpop.eup %6710 }
0x3073   :  { %v5681_v14 = vadd.f32 1.0, %v6711_v18 }
0x3075   :  { %6712 = vrcp.f32 %v5681_v14  ;;  %v5747_v14 = vld [vmem:[%s8498_s25 + $0x18] sm:$0xff] }
0x3076   :  { %6478 = vmatprep.subr.mxu0 %v5747_v14 }
0x3077   :  { %6479 = vmatpush3.msra.mxu0 %v5747_v14 }
0x3078   :  { %6480 = vmatprep.subr.mxu0 %v5746_v11 }
0x3079   :  { %6481 = vmatpush3.msra.mxu0 %v5746_v11 }
0x307a   :  { %6482 = vmatprep.subr.mxu0 %v5745_v16 }
0x307b   :  { %6483 = vmatpush3.msra.mxu0 %v5745_v16 }
0x3082   :  { %v8360_v38 = vpop.eup %6712 }
0x3083   :  { %v5701_v9 = vmul.f32 %v8360_v38, %v8349_v13  ;;  %v5744_v13 = vld [vmem:[%s8498_s25] sm:$0xff]  ;;  %s6746_s25 = smov [#allocation3]  }
0x3084   :  { %6484 = vmatprep.subr.mxu0 %v5744_v13 }
0x3085   :  { %6485 = vmatpush3.msra.mxu0 %v5744_v13 }
0x30d3   :  { %v5686_v54 = vpop.permute.xlu1 %5685 }
0x30d4   :  { %v5688_v55 = vmul.f32 %v8360_v38, %v5686_v54 }
0x30d6   :  { %5690 = vrot.lane.b32.xlu0 %v5688_v55, %s6744_s13 }
0x30da   :  { %4760 = vrot.lane.b32.xlu0 %v4755_v42, %s6745_s15 }
0x30de   :  { %5039 = vrot.lane.b32.xlu0 %v5034_v19, %s6745_s15 }
0x30e2   :  { %5317 = vrot.lane.b32.xlu0 %v5312_v5, %s6745_s15 }
0x30e6   :  { %5595 = vrot.lane.b32.xlu0 %v5590_v34, %s6745_s15 }
0x30ea   :  { %4762 = vrot.lane.b32.xlu0 %v4759_v10, %s6745_s15 }
0x30ee   :  { %5041 = vrot.lane.b32.xlu0 %v5038_v6, %s6745_s15 }
0x30f2   :  { %5319 = vrot.lane.b32.xlu0 %v5316_v60, %s6745_s15 }
0x30f6   :  { %5597 = vrot.lane.b32.xlu0 %v5594_v20, %s6745_s15 }
0x3148   :  { %v5691_v32 = vpop.permute.xlu0 %5690 }
0x3149   :  { %v5693_v2 = vadd.f32 %v5691_v32, %v4619_v62  ;;  %v5695_v62 = vsub.f32 1.0, %v8360_v38 }
0x314b   :  { %6714 = vtanh.f32 %v5693_v2 }
0x314c   :  { %v4761_v33 = vpop.permute.xlu0 %4760 }
0x314d   :  { %4767 = vst.msk [vmem:[#allocation2] sm:$0x1] %vm4766_vm2, %v4761_v33 }
0x3150   :  { %v5040_v48 = vpop.permute.xlu0 %5039 }
0x3151   :  { %5045 = vst.msk [vmem:[#allocation2 + $0x2] sm:$0x1] %vm4766_vm2, %v5040_v48 }
0x3154   :  { %v5318_v26 = vpop.permute.xlu0 %5317 }
0x3155   :  { %5323 = vst.msk [vmem:[#allocation2 + $0x4] sm:$0x1] %vm4766_vm2, %v5318_v26 }
0x3158   :  { %v6715_v25 = vpop.eup %6714  ;;  %v5596_v58 = vpop.permute.xlu0 %5595 }
0x3159   :  { %5601 = vst.msk [vmem:[#allocation2 + $0x6] sm:$0x1] %vm4766_vm2, %v5596_v58  ;;  %5697 = vrot.lane.b32.xlu1 %v6715_v25, %s6745_s15 }
0x315c   :  { %v4763_v43 = vpop.permute.xlu0 %4762 }
0x315d   :  { %4768 = vst.msk [vmem:[#allocation2 + $0x8] sm:$0x1] %vm4766_vm2, %v4763_v43  ;;  %4900 = vrot.lane.b32.xlu1 %v4895_v51, %s6745_s15 }
0x3160   :  { %v5042_v35 = vpop.permute.xlu0 %5041 }
0x3161   :  { %5046 = vst.msk [vmem:[#allocation2 + $0xa] sm:$0x1] %vm4766_vm2, %v5042_v35  ;;  %5178 = vrot.lane.b32.xlu1 %v5173_v4, %s6745_s15 }
0x3164   :  { %v5320_v3 = vpop.permute.xlu0 %5319 }
0x3165   :  { %5324 = vst.msk [vmem:[#allocation2 + $0xc] sm:$0x1] %vm4766_vm2, %v5320_v3  ;;  %5456 = vrot.lane.b32.xlu1 %v5451_v30, %s6745_s15 }
0x3168   :  { %v5598_v53 = vpop.permute.xlu0 %5597 }
0x3169   :  { %5602 = vst.msk [vmem:[#allocation2 + $0xe] sm:$0x1] %vm4766_vm2, %v5598_v53  ;;  %4902 = vrot.lane.b32.xlu1 %v4899_v39, %s6745_s15 }
0x316d   :  { %5180 = vrot.lane.b32.xlu1 %v5177_v46, %s6745_s15 }
0x3171   :  { %5458 = vrot.lane.b32.xlu1 %v5455_v24, %s6745_s15 }
0x31cb   :  { %v5698_v45 = vpop.permute.xlu1 %5697 }
0x31cc   :  { %v5700_v18 = vmul.f32 %v5698_v45, %v5695_v62 }
0x31ce   :  { %v5702_v54 = vadd.f32 %v5701_v9, %v5700_v18 }
0x31cf   :  { %v4901_v40 = vpop.permute.xlu1 %4900 }
0x31d0   :  { %v5710_v55 = vrot.slane %v5702_v54, %v6992_v44  ;;  %4906 = vst.msk [vmem:[#allocation2 + $0x1] sm:$0x1] %vm4766_vm2, %v4901_v40 }
0x31d2   :  { %v5711_v38 = vcombine.high %v5710_v55, %v5710_v55  ;;  %v5718_v50 = vrot.slane %v5710_v55, %v6992_v44 }
0x31d3   :  { %v5179_v23 = vpop.permute.xlu1 %5178 }
0x31d4   :  { %v5725_v42 = vrot.slane %v5711_v38, %v6992_v44  ;;  %5184 = vst.msk [vmem:[#allocation2 + $0x3] sm:$0x1] %vm4766_vm2, %v5179_v23  ;;  %v5729_v57 = vrot.slane %v5718_v50, %v6964_v27 }
0x31d6   :  { %5734 = vrot.lane.b32.xlu1 %v5729_v57, %s6745_s15  ;;  %v5733_v19 = vrot.slane %v5725_v42, %v6964_v27 }
0x31d7   :  { %v5457_v59 = vpop.permute.xlu1 %5456 }
0x31d8   :  { %5462 = vst.msk [vmem:[#allocation2 + $0x5] sm:$0x1] %vm4766_vm2, %v5457_v59 }
0x31da   :  { %5736 = vrot.lane.b32.xlu1 %v5733_v19, %s6745_s15  ;;  %s5844_s15 = sshll.u32 %s6746_s25, 4  ;;  %s5845_s15 = int_to_ptr.vmem [resolvable:$true] %s5844_s15 }
0x31db   :  { %v4903_v17 = vpop.permute.xlu1 %4902  ;;  %s6716_s30 = scalar_lea.vmem %s5845_s15, 32  ;;  %p6721_p1 = scmp.lt.s32.totalorder %s5845_s15, %s5845_s15 }
0x31dc   :  { %4907 = vst.msk [vmem:[#allocation2 + $0x9] sm:$0x1] %vm4766_vm2, %v4903_v17  ;;  %p6717_p0 = scmp.ne.s32.totalorder %s5845_s15, %s6716_s30  ;;  %p6722_p2 = scmp.lt.s32.totalorder %s6716_s30, %s6716_s30 }
0x31de   :  { %p6723_p3 = por %p6722_p2, %p6721_p1 }
0x31df   :  { %v5181_v52 = vpop.permute.xlu1 %5180 }
0x31e0   :  { %5185 = vst.msk [vmem:[#allocation2 + $0xb] sm:$0x1] %vm4766_vm2, %v5181_v52  ;;  %p6724_p4 = pnand %p6723_p3, %p6717_p0 }
0x31e3   :  { %v5459_v44 = vpop.permute.xlu1 %5458 }
0x31e4   :  { %5463 = vst.msk [vmem:[#allocation2 + $0xd] sm:$0x1] %vm4766_vm2, %v5459_v44 }
0x3248   :  { %v5735_v5 = vpop.permute.xlu1 %5734 }
0x3249   :  { %5740 = vst.msk [vmem:[#allocation2 + $0x7] sm:$0x1] %vm4766_vm2, %v5735_v5 }
0x324c   :  { %v5737_v15 = vpop.permute.xlu1 %5736 }
0x324d   :  { %5741 = vst.msk [vmem:[#allocation2 + $0xf] sm:$0x1] %vm4766_vm2, %v5737_v15 }
0x3250   :  { %v5742_v34 = vld [vmem:[#allocation2] sm:$0xff] }
0x3251   :  { %6486 = vmatprep.mubr.msk.f32.mxu0 %vm2749_vm0, %v5742_v34 }
0x3254   :  { %v5743_v27 = vld [vmem:[#allocation2 + $0x8] sm:$0xff] }
0x3255   :  { %6487 = vmatmul.mubr.msk.f32.vlgmr.msra.gmra.mxu0 %vm2749_vm0, %v5743_v27 }
0x3256   :  { %6727 = shalt.err (!%p6724_p4)
}
0x3257   :  { %5847 = dma.vmem_to_hbm [thread:$0]  %s5845_s15, 32, %s8500_s27, [#allocation4]   ;;  %v5969_v28 = vld [vmem:[%s8499_s26] ss:$0 sm:$0xff] }
0x3315   :  { %v6488_v37 = vpop.f32.mrf.mxu0 }
0x3316   :  { %v5833_v10 = vadd.f32 %v6488_v37, %v5969_v28 }
0x3317   :  { %v5827_v56 = vpop.f32.mrf.mxu0 }
0x3318   :  { %5837 = vst.msk [vmem:[%s8501_s28 + $0x8] sm:$0xff] %vm334_vm4, %v5833_v10  ;;  %v5828_v12 = vadd.f32 %v5969_v28, %v5827_v56 }
0x331a   :  { %5836 = vst.msk [vmem:[%s8501_s28] sm:$0xff] %vm334_vm4, %v5828_v12 }
0x331b   :  { %6736 = dma.done.wait [#allocation4], 32  }
0x331c   :  { %6737 = vsyncadd [#allocation4], 4294967264 }
0x331d   :  { %5855 = vsyncpa [#allocation4], 1 }

</bundles_post_ra>
